<compile_context>
chip_gen: v7x
topology: tpu7x:2x2x1
jax: 0.10.0
libtpu: 0.0.40
codegen_flags: <defaults>
</compile_context>

<pallas_src>
import functools

import numpy as np
import jax
import jax.numpy as jnp
from jax.experimental import pallas as pl
from jax.experimental.pallas import tpu as pltpu


# ----------------------------------------------------------------------------
# Fused kernel: one batch-chunk (n_img images folded into lanes) per grid step.
# ----------------------------------------------------------------------------
def _residual_group_kernel(x_ref, tapmask_ref,
                           w1_ref, b1_ref, w2_ref, b2_ref,
                           caw1_ref, cab1_ref, caw2_ref, cab2_ref,
                           wt_ref, bt_ref,
                           o_ref,
                           patches_ref,
                           *, H, W, n_img, n_blocks, res_scale, rcab_scale):
    HW = H * W
    L = n_img * HW
    C = x_ref.shape[1]
    patch_dt = patches_ref.dtype

    # Hoist the 9 tap-mask rows once for the whole group (center tap needs none).
    masks = [tapmask_ref[t:t + 1, :] if t != 4 else None for t in range(9)]

    def conv3x3(x2d, w_flat, bias, cin, relu):
        """x2d: (cin, L) f32, w_flat: (Cout, 9*cin), bias: (Cout, 1) -> (Cout, L) f32."""
        # im2col into the persistent VMEM scratch: tap t -> rows [t*cin, (t+1)*cin).
        for t in range(9):
            dy, dx = t // 3 - 1, t % 3 - 1               # tap offset in {-1,0,1}^2
            s = dy * W + dx                              # flat spatial offset
            tap = x2d if s == 0 else pltpu.roll(x2d, (-s) % L, 1)
            if t != 4:                                   # zero halo / cross-image wrap
                tap = tap * masks[t]
            patches_ref[t * cin:(t + 1) * cin, :] = tap.astype(patch_dt)
        acc = jnp.dot(w_flat, patches_ref[0:9 * cin, :],
                      preferred_element_type=jnp.float32) + bias
        if relu:
            acc = jnp.maximum(acc, 0.0)
        return acc

    x0 = x_ref[0]                                        # (C, L)
    h = x0
    for blk in range(n_blocks):                          # statically unrolled RCABs
        w1 = w1_ref[blk]
        bf = w1.shape[0]
        t1 = conv3x3(h, w1, b1_ref[blk], C, relu=True)                 # (BF, L)
        res = conv3x3(t1, w2_ref[blk], b2_ref[blk], bf, relu=False)    # (C, L)

        # CALayer.  In the reference module "max_pool" is ALSO AdaptiveAvgPool2d,
        # so sigmoid(conv_du(avg)+conv_du(max)) == sigmoid(2*conv_du(avg)).
        # Pool per image (128-aligned lane slices), then batch the two tiny dots
        # across the n_img images folded into the lane axis.
        pooled = jnp.concatenate(
            [jnp.mean(res[:, n * HW:(n + 1) * HW], axis=1, keepdims=True)
             for n in range(n_img)], axis=1)                           # (C, n_img)
        hidden = jnp.maximum(
            jnp.dot(caw1_ref[blk], pooled,
                    preferred_element_type=jnp.float32) + cab1_ref[blk], 0.0)
        y = jnp.dot(caw2_ref[blk], hidden,
                    preferred_element_type=jnp.float32) + cab2_ref[blk]
        gate = jax.nn.sigmoid(2.0 * y)                                 # (C, n_img)

        # Apply the per-image gate on 128-aligned lane slices + RCAB residual.
        gated = jnp.concatenate(
            [res[:, n * HW:(n + 1) * HW] * gate[:, n:n + 1] for n in range(n_img)],
            axis=1)                                                    # (C, L)
        h = gated + rcab_scale * h

    tail = conv3x3(h, wt_ref[...], bt_ref[...], C, relu=False)         # (C, L)
    out = tail + res_scale * x0                                        # group residual
    o_ref[...] = out.reshape((1,) + out.shape)


# ----------------------------------------------------------------------------
# Wrapper: weight packing, tap masks, batch folding, BlockSpecs, grid.
# ----------------------------------------------------------------------------
def _flatten_conv_weight(w_hwio):
    """(KH, KW, Cin, Cout) -> (Cout, KH*KW*Cin), tap-major / channel-minor."""
    kh, kw, cin, cout = w_hwio.shape
    return jnp.transpose(w_hwio, (3, 0, 1, 2)).reshape(cout, kh * kw * cin)


def _tap_masks(H, W, n_img):
    """(9, n_img*H*W) f32: mask[t] zeroes positions whose tap (dy,dx) is OOB."""
    m = np.zeros((9, H, W), np.float32)
    for t in range(9):
        dy, dx = t // 3 - 1, t % 3 - 1
        m[t, max(0, -dy):min(H, H - dy), max(0, -dx):min(W, W - dx)] = 1.0
    return np.tile(m.reshape(9, H * W), (1, n_img))


def residual_group_forward(x_nchw, params, res_scale, *,
                           batch_chunks=None, use_bf16=False):
    N, C, H, W = x_nchw.shape
    HW = H * W
    blocks = params['blocks']
    nb = len(blocks)
    BF = blocks[0]['w1'].shape[-1]
    Cr = blocks[0]['ca_w1'].shape[0]

    # Batch chunking: fold n_img images into the lane axis per grid step.
    #   v5e/v6e (1 TC): 1 mega-step (no per-step overhead, widest lanes)
    #   v7x (2 TCs)   : 2 "parallel" chunks so both TensorCores get work.
    if batch_chunks is None:
        batch_chunks = 1
        try:
            if 'v7' in jax.devices()[0].device_kind.lower():
                batch_chunks = 2
        except Exception:
            pass
    batch_chunks = max(1, min(int(batch_chunks), N))
    while N % batch_chunks != 0:
        batch_chunks -= 1
    n_img = N // batch_chunks
    L = n_img * HW

    # Pack weights once (VMEM-resident across the grid); conv-matmul operands
    # optionally bf16 for the v6e/v7x MXU (f32 accumulate). Biases/CA stay f32.
    wdt = jnp.bfloat16 if use_bf16 else jnp.float32
    w1 = jnp.stack([_flatten_conv_weight(b['w1']) for b in blocks]).astype(wdt)
    b1 = jnp.stack([b['b1'].reshape(BF, 1) for b in blocks])
    w2 = jnp.stack([_flatten_conv_weight(b['w2']) for b in blocks]).astype(wdt)
    b2 = jnp.stack([b['b2'].reshape(C, 1) for b in blocks])
    caw1 = jnp.stack([b['ca_w1'] for b in blocks])
    cab1 = jnp.stack([b['ca_b1'].reshape(Cr, 1) for b in blocks])
    caw2 = jnp.stack([b['ca_w2'] for b in blocks])
    cab2 = jnp.stack([b['ca_b2'].reshape(C, 1) for b in blocks])
    wt = _flatten_conv_weight(params['tail_w']).astype(wdt)
    bt = params['tail_b'].reshape(C, 1)
    tapmask = jnp.asarray(_tap_masks(H, W, n_img))                     # (9, L)

    # NCHW -> (chunks, C, n_img*HW): lane-dense slab per grid step (tiny one-off
    # layout plumbing outside the kernel).
    x2 = (x_nchw.reshape(batch_chunks, n_img, C, HW)
                 .transpose(0, 2, 1, 3)
                 .reshape(batch_chunks, C, L))

    kernel = functools.partial(_residual_group_kernel, H=H, W=W, n_img=n_img,
                               n_blocks=nb, res_scale=float(res_scale),
                               rcab_scale=0.5)

    out = pl.pallas_call(
        kernel,
        out_shape=jax.ShapeDtypeStruct((batch_chunks, C, L), jnp.float32),
        grid=(batch_chunks,),
        in_specs=[
            pl.BlockSpec((1, C, L), lambda g: (g, 0, 0)),            # x slab
            pl.BlockSpec((9, L), lambda g: (0, 0)),                  # tap masks
            pl.BlockSpec((nb, BF, 9 * C), lambda g: (0, 0, 0)),      # w1
            pl.BlockSpec((nb, BF, 1), lambda g: (0, 0, 0)),          # b1
            pl.BlockSpec((nb, C, 9 * BF), lambda g: (0, 0, 0)),      # w2
            pl.BlockSpec((nb, C, 1), lambda g: (0, 0, 0)),           # b2
            pl.BlockSpec((nb, Cr, C), lambda g: (0, 0, 0)),          # ca_w1
            pl.BlockSpec((nb, Cr, 1), lambda g: (0, 0, 0)),          # ca_b1
            pl.BlockSpec((nb, C, Cr), lambda g: (0, 0, 0)),          # ca_w2
            pl.BlockSpec((nb, C, 1), lambda g: (0, 0, 0)),           # ca_b2
            pl.BlockSpec((C, 9 * C), lambda g: (0, 0)),              # tail w
            pl.BlockSpec((C, 1), lambda g: (0, 0)),                  # tail b
        ],
        out_specs=pl.BlockSpec((1, C, L), lambda g: (g, 0, 0)),
        scratch_shapes=[pltpu.VMEM((9 * max(C, BF), L), wdt)],        # im2col patches
        compiler_params=pltpu.CompilerParams(
            dimension_semantics=("parallel",),
            vmem_limit_bytes=32 * 1024 * 1024),
    )(x2, tapmask, w1, b1, w2, b2, caw1, cab1, caw2, cab2, wt, bt)

    # (chunks, C, n_img*HW) -> NCHW
    return (out.reshape(batch_chunks, C, n_img, HW)
               .transpose(0, 2, 1, 3)
               .reshape(N, C, H, W))


# ----------------------------------------------------------------------------
# Pure-JAX reference (for correctness check)
# ----------------------------------------------------------------------------
def _ref_conv(x, w_hwio, b):
    return jax.lax.conv_general_dilated(
        x, w_hwio, (1, 1), 'SAME',
        dimension_numbers=('NCHW', 'HWIO', 'NCHW')) + b[None, :, None, None]


def _ref_rcab(x, p):
    h = jax.nn.relu(_ref_conv(x, p['w1'], p['b1']))
    res = _ref_conv(h, p['w2'], p['b2'])
    pooled = jnp.mean(res, axis=(2, 3))                              # (N, C)
    hidden = jax.nn.relu(pooled @ p['ca_w1'].T + p['ca_b1'])         # (N, Cr)
    y = jax.nn.sigmoid(2.0 * (hidden @ p['ca_w2'].T + p['ca_b2']))   # (N, C)
    return res * y[:, :, None, None] + 0.5 * x


def _ref_group(x, params, res_scale):
    h = x
    for blk in params['blocks']:
        h = _ref_rcab(h, blk)
    return _ref_conv(h, params['tail_w'], params['tail_b']) + res_scale * x


# ----------------------------------------------------------------------------
# Deterministic parameter init
# ----------------------------------------------------------------------------
def init_params(key, n_feat, block_feat, reduction, n_resblocks):
    cr = n_feat // reduction
    keys = iter(jax.random.split(key, n_resblocks * 8 + 2))
    nxt = lambda: next(keys)
    params = {'blocks': []}
    for _ in range(n_resblocks):
        params['blocks'].append({
            'w1': 0.1 * jax.random.normal(nxt(), (3, 3, n_feat, block_feat), jnp.float32),
            'b1': 0.1 * jax.random.normal(nxt(), (block_feat,), jnp.float32),
            'w2': 0.1 * jax.random.normal(nxt(), (3, 3, block_feat, n_feat), jnp.float32),
            'b2': 0.1 * jax.random.normal(nxt(), (n_feat,), jnp.float32),
            'ca_w1': 0.1 * jax.random.normal(nxt(), (cr, n_feat), jnp.float32),
            'ca_b1': 0.1 * jax.random.normal(nxt(), (cr,), jnp.float32),
            'ca_w2': 0.1 * jax.random.normal(nxt(), (n_feat, cr), jnp.float32),
            'ca_b2': 0.1 * jax.random.normal(nxt(), (n_feat,), jnp.float32),
        })
    params['tail_w'] = 0.1 * jax.random.normal(nxt(), (3, 3, n_feat, n_feat), jnp.float32)
    params['tail_b'] = 0.1 * jax.random.normal(nxt(), (n_feat,), jnp.float32)
    return params


# ----------------------------------------------------------------------------
if __name__ == "__main__":
    # ResidualGroup(conv=default_conv, n_feat=16, block_feat=32, kernel_size=3,
    #               reduction=4, act=ReLU, res_scale=1.0, n_resblocks=2)
    n_feat, block_feat, reduction, n_resblocks = 16, 32, 4, 2
    res_scale = 1.0

    key = jax.random.PRNGKey(0)
    kx, kp = jax.random.split(key)
    x = jax.random.normal(kx, (2, n_feat, 16, 16), jnp.float32)      # NCHW input
    params = init_params(kp, n_feat, block_feat, reduction, n_resblocks)

    ref = _ref_group(x, params, res_scale)

    # f32 conv-matmul operands (default; required on v5e, tight numerics everywhere).
    out = jax.block_until_ready(residual_group_forward(x, params, res_scale))
    assert out.shape == x.shape, (out.shape, x.shape)
    err_f32 = float(jnp.max(jnp.abs(out - ref)))
    assert err_f32 < 1e-3, f"f32 path mismatch vs reference: {err_f32}"

    # bf16 conv-matmul operands (v6e/v7x MXU fast path), f32 accumulate.
    out_bf16 = jax.block_until_ready(
        residual_group_forward(x, params, res_scale, use_bf16=True))
    err_bf16 = float(jnp.max(jnp.abs(out_bf16 - ref)))
    assert err_bf16 < 5e-2, f"bf16 path mismatch vs reference: {err_bf16}"

    print("KERNEL_OK")
</pallas_src>

<mosaic_0001>
module attributes {stable_mosaic.version = 11 : i64} {
  func.func @_residual_group_kernel(%arg0: i32, %arg1: memref<1x16x512xf32, #tpu.memory_space<vmem>>, %arg2: memref<9x512xf32, #tpu.memory_space<vmem>>, %arg3: memref<2x32x144xf32, #tpu.memory_space<vmem>>, %arg4: memref<2x32x1xf32, #tpu.memory_space<vmem>>, %arg5: memref<2x16x288xf32, #tpu.memory_space<vmem>>, %arg6: memref<2x16x1xf32, #tpu.memory_space<vmem>>, %arg7: memref<2x4x16xf32, #tpu.memory_space<vmem>>, %arg8: memref<2x4x1xf32, #tpu.memory_space<vmem>>, %arg9: memref<2x16x4xf32, #tpu.memory_space<vmem>>, %arg10: memref<2x16x1xf32, #tpu.memory_space<vmem>>, %arg11: memref<16x144xf32, #tpu.memory_space<vmem>>, %arg12: memref<16x1xf32, #tpu.memory_space<vmem>>, %arg13: memref<1x16x512xf32, #tpu.memory_space<vmem>>, %arg14: memref<288x512xf32, #tpu.memory_space<vmem>>) attributes {dimension_semantics = [#tpu.dimension_semantics<parallel>], iteration_bounds = array<i64: 1>, scalar_prefetch = 0 : i64, scratch_operands = 1 : i64, tpu.core_type = #tpu.core_type<tc>, window_params = [{transform_indices = @transform_0, window_bounds = array<i64: 1, 16, 512>}, {pipeline_mode = #tpu.pipeline_mode<synchronous>, transform_indices = @transform_1, window_bounds = array<i64: 9, 512>}, {pipeline_mode = #tpu.pipeline_mode<synchronous>, transform_indices = @transform_2, window_bounds = array<i64: 2, 32, 144>}, {pipeline_mode = #tpu.pipeline_mode<synchronous>, transform_indices = @transform_3, window_bounds = array<i64: 2, 32, 1>}, {pipeline_mode = #tpu.pipeline_mode<synchronous>, transform_indices = @transform_4, window_bounds = array<i64: 2, 16, 288>}, {pipeline_mode = #tpu.pipeline_mode<synchronous>, transform_indices = @transform_5, window_bounds = array<i64: 2, 16, 1>}, {pipeline_mode = #tpu.pipeline_mode<synchronous>, transform_indices = @transform_6, window_bounds = array<i64: 2, 4, 16>}, {pipeline_mode = #tpu.pipeline_mode<synchronous>, transform_indices = @transform_7, window_bounds = array<i64: 2, 4, 1>}, {pipeline_mode = #tpu.pipeline_mode<synchronous>, transform_indices = @transform_8, window_bounds = array<i64: 2, 16, 4>}, {pipeline_mode = #tpu.pipeline_mode<synchronous>, transform_indices = @transform_9, window_bounds = array<i64: 2, 16, 1>}, {pipeline_mode = #tpu.pipeline_mode<synchronous>, transform_indices = @transform_10, window_bounds = array<i64: 16, 144>}, {pipeline_mode = #tpu.pipeline_mode<synchronous>, transform_indices = @transform_11, window_bounds = array<i64: 16, 1>}, {transform_indices = @transform_12, window_bounds = array<i64: 1, 16, 512>}]} {
    %c0 = arith.constant 0 : index
    %c0_0 = arith.constant 0 : index
    %0 = vector.load %arg2[%c0, %c0_0] : memref<9x512xf32, #tpu.memory_space<vmem>>, vector<1x512xf32>
    %c1 = arith.constant 1 : index
    %c0_1 = arith.constant 0 : index
    %1 = vector.load %arg2[%c1, %c0_1] : memref<9x512xf32, #tpu.memory_space<vmem>>, vector<1x512xf32>
    %c2 = arith.constant 2 : index
    %c0_2 = arith.constant 0 : index
    %2 = vector.load %arg2[%c2, %c0_2] : memref<9x512xf32, #tpu.memory_space<vmem>>, vector<1x512xf32>
    %c3 = arith.constant 3 : index
    %c0_3 = arith.constant 0 : index
    %3 = vector.load %arg2[%c3, %c0_3] : memref<9x512xf32, #tpu.memory_space<vmem>>, vector<1x512xf32>
    %c5 = arith.constant 5 : index
    %c0_4 = arith.constant 0 : index
    %4 = vector.load %arg2[%c5, %c0_4] : memref<9x512xf32, #tpu.memory_space<vmem>>, vector<1x512xf32>
    %c6 = arith.constant 6 : index
    %c0_5 = arith.constant 0 : index
    %5 = vector.load %arg2[%c6, %c0_5] : memref<9x512xf32, #tpu.memory_space<vmem>>, vector<1x512xf32>
    %c7 = arith.constant 7 : index
    %c0_6 = arith.constant 0 : index
    %6 = vector.load %arg2[%c7, %c0_6] : memref<9x512xf32, #tpu.memory_space<vmem>>, vector<1x512xf32>
    %c8 = arith.constant 8 : index
    %c0_7 = arith.constant 0 : index
    %7 = vector.load %arg2[%c8, %c0_7] : memref<9x512xf32, #tpu.memory_space<vmem>>, vector<1x512xf32>
    %c0_8 = arith.constant 0 : index
    %c0_9 = arith.constant 0 : index
    %c0_10 = arith.constant 0 : index
    %8 = vector.load %arg1[%c0_8, %c0_9, %c0_10] : memref<1x16x512xf32, #tpu.memory_space<vmem>>, vector<1x16x512xf32>
    %9 = vector.shape_cast %8 : vector<1x16x512xf32> to vector<16x512xf32>
    %c0_11 = arith.constant 0 : index
    %c0_12 = arith.constant 0 : index
    %c0_13 = arith.constant 0 : index
    %10 = vector.load %arg3[%c0_11, %c0_12, %c0_13] : memref<2x32x144xf32, #tpu.memory_space<vmem>>, vector<1x32x144xf32>
    %11 = vector.shape_cast %10 : vector<1x32x144xf32> to vector<32x144xf32>
    %c0_14 = arith.constant 0 : index
    %c0_15 = arith.constant 0 : index
    %c0_16 = arith.constant 0 : index
    %12 = vector.load %arg4[%c0_14, %c0_15, %c0_16] : memref<2x32x1xf32, #tpu.memory_space<vmem>>, vector<1x32x1xf32>
    %13 = vector.shape_cast %12 : vector<1x32x1xf32> to vector<32x1xf32>
    %c17_i32 = arith.constant 17 : i32
    %14 = tpu.dynamic_rotate %9 by %c17_i32 dim 1 : vector<16x512xf32>, i32 -> vector<16x512xf32>
    %15 = vector.broadcast %0 : vector<1x512xf32> to vector<16x512xf32>
    %16 = arith.mulf %14, %15 : vector<16x512xf32>
    %c0_17 = arith.constant 0 : index
    %c0_18 = arith.constant 0 : index
    %17 = vector.load %arg14[%c0_17, %c0_18] : memref<288x512xf32, #tpu.memory_space<vmem>>, vector<16x512xf32>
    tpu.vector_store %arg14[%c0_17, %c0_18], %16 {strides = array<i32>} : memref<288x512xf32, #tpu.memory_space<vmem>>, vector<16x512xf32>,
    %c16_i32 = arith.constant 16 : i32
    %18 = tpu.dynamic_rotate %9 by %c16_i32 dim 1 : vector<16x512xf32>, i32 -> vector<16x512xf32>
    %19 = vector.broadcast %1 : vector<1x512xf32> to vector<16x512xf32>
    %20 = arith.mulf %18, %19 : vector<16x512xf32>
    %c16 = arith.constant 16 : index
    %c0_19 = arith.constant 0 : index
    %21 = vector.load %arg14[%c16, %c0_19] : memref<288x512xf32, #tpu.memory_space<vmem>>, vector<16x512xf32>
    tpu.vector_store %arg14[%c16, %c0_19], %20 {strides = array<i32>} : memref<288x512xf32, #tpu.memory_space<vmem>>, vector<16x512xf32>,
    %c15_i32 = arith.constant 15 : i32
    %22 = tpu.dynamic_rotate %9 by %c15_i32 dim 1 : vector<16x512xf32>, i32 -> vector<16x512xf32>
    %23 = vector.broadcast %2 : vector<1x512xf32> to vector<16x512xf32>
    %24 = arith.mulf %22, %23 : vector<16x512xf32>
    %c32 = arith.constant 32 : index
    %c0_20 = arith.constant 0 : index
    %25 = vector.load %arg14[%c32, %c0_20] : memref<288x512xf32, #tpu.memory_space<vmem>>, vector<16x512xf32>
    tpu.vector_store %arg14[%c32, %c0_20], %24 {strides = array<i32>} : memref<288x512xf32, #tpu.memory_space<vmem>>, vector<16x512xf32>,
    %c1_i32 = arith.constant 1 : i32
    %26 = tpu.dynamic_rotate %9 by %c1_i32 dim 1 : vector<16x512xf32>, i32 -> vector<16x512xf32>
    %27 = vector.broadcast %3 : vector<1x512xf32> to vector<16x512xf32>
    %28 = arith.mulf %26, %27 : vector<16x512xf32>
    %c48 = arith.constant 48 : index
    %c0_21 = arith.constant 0 : index
    %29 = vector.load %arg14[%c48, %c0_21] : memref<288x512xf32, #tpu.memory_space<vmem>>, vector<16x512xf32>
    tpu.vector_store %arg14[%c48, %c0_21], %28 {strides = array<i32>} : memref<288x512xf32, #tpu.memory_space<vmem>>, vector<16x512xf32>,
    %c64 = arith.constant 64 : index
    %c0_22 = arith.constant 0 : index
    %30 = vector.load %arg14[%c64, %c0_22] : memref<288x512xf32, #tpu.memory_space<vmem>>, vector<16x512xf32>
    tpu.vector_store %arg14[%c64, %c0_22], %9 {strides = array<i32>} : memref<288x512xf32, #tpu.memory_space<vmem>>, vector<16x512xf32>,
    %c511_i32 = arith.constant 511 : i32
    %31 = tpu.dynamic_rotate %9 by %c511_i32 dim 1 : vector<16x512xf32>, i32 -> vector<16x512xf32>
    %32 = vector.broadcast %4 : vector<1x512xf32> to vector<16x512xf32>
    %33 = arith.mulf %31, %32 : vector<16x512xf32>
    %c80 = arith.constant 80 : index
    %c0_23 = arith.constant 0 : index
    %34 = vector.load %arg14[%c80, %c0_23] : memref<288x512xf32, #tpu.memory_space<vmem>>, vector<16x512xf32>
    tpu.vector_store %arg14[%c80, %c0_23], %33 {strides = array<i32>} : memref<288x512xf32, #tpu.memory_space<vmem>>, vector<16x512xf32>,
    %c497_i32 = arith.constant 497 : i32
    %35 = tpu.dynamic_rotate %9 by %c497_i32 dim 1 : vector<16x512xf32>, i32 -> vector<16x512xf32>
    %36 = vector.broadcast %5 : vector<1x512xf32> to vector<16x512xf32>
    %37 = arith.mulf %35, %36 : vector<16x512xf32>
    %c96 = arith.constant 96 : index
    %c0_24 = arith.constant 0 : index
    %38 = vector.load %arg14[%c96, %c0_24] : memref<288x512xf32, #tpu.memory_space<vmem>>, vector<16x512xf32>
    tpu.vector_store %arg14[%c96, %c0_24], %37 {strides = array<i32>} : memref<288x512xf32, #tpu.memory_space<vmem>>, vector<16x512xf32>,
    %c496_i32 = arith.constant 496 : i32
    %39 = tpu.dynamic_rotate %9 by %c496_i32 dim 1 : vector<16x512xf32>, i32 -> vector<16x512xf32>
    %40 = vector.broadcast %6 : vector<1x512xf32> to vector<16x512xf32>
    %41 = arith.mulf %39, %40 : vector<16x512xf32>
    %c112 = arith.constant 112 : index
    %c0_25 = arith.constant 0 : index
    %42 = vector.load %arg14[%c112, %c0_25] : memref<288x512xf32, #tpu.memory_space<vmem>>, vector<16x512xf32>
    tpu.vector_store %arg14[%c112, %c0_25], %41 {strides = array<i32>} : memref<288x512xf32, #tpu.memory_space<vmem>>, vector<16x512xf32>,
    %c495_i32 = arith.constant 495 : i32
    %43 = tpu.dynamic_rotate %9 by %c495_i32 dim 1 : vector<16x512xf32>, i32 -> vector<16x512xf32>
    %44 = vector.broadcast %7 : vector<1x512xf32> to vector<16x512xf32>
    %45 = arith.mulf %43, %44 : vector<16x512xf32>
    %c128 = arith.constant 128 : index
    %c0_26 = arith.constant 0 : index
    %46 = vector.load %arg14[%c128, %c0_26] : memref<288x512xf32, #tpu.memory_space<vmem>>, vector<16x512xf32>
    tpu.vector_store %arg14[%c128, %c0_26], %45 {strides = array<i32>} : memref<288x512xf32, #tpu.memory_space<vmem>>, vector<16x512xf32>,
    %c0_27 = arith.constant 0 : index
    %c0_28 = arith.constant 0 : index
    %47 = vector.load %arg14[%c0_27, %c0_28] : memref<288x512xf32, #tpu.memory_space<vmem>>, vector<144x512xf32>
    %cst = arith.constant dense<0.000000e+00> : vector<32x512xf32>
    %48 = tpu.matmul %11, %47, %cst {dimension_numbers = #tpu.dot_dimension_numbers<[1], [0], [0], [1], [0, 0, 1, 1], [], []>} : vector<32x144xf32>, vector<144x512xf32>, vector<32x512xf32> -> vector<32x512xf32>
    %49 = vector.broadcast %13 : vector<32x1xf32> to vector<32x512xf32>
    %50 = arith.addf %48, %49 : vector<32x512xf32>
    %cst_29 = arith.constant 0.000000e+00 : f32
    %51 = vector.broadcast %cst_29 : f32 to vector<32x512xf32>
    %52 = arith.maximumf %50, %51 : vector<32x512xf32>
    %c0_30 = arith.constant 0 : index
    %c0_31 = arith.constant 0 : index
    %c0_32 = arith.constant 0 : index
    %53 = vector.load %arg5[%c0_30, %c0_31, %c0_32] : memref<2x16x288xf32, #tpu.memory_space<vmem>>, vector<1x16x288xf32>
    %54 = vector.shape_cast %53 : vector<1x16x288xf32> to vector<16x288xf32>
    %c0_33 = arith.constant 0 : index
    %c0_34 = arith.constant 0 : index
    %c0_35 = arith.constant 0 : index
    %55 = vector.load %arg6[%c0_33, %c0_34, %c0_35] : memref<2x16x1xf32, #tpu.memory_space<vmem>>, vector<1x16x1xf32>
    %56 = vector.shape_cast %55 : vector<1x16x1xf32> to vector<16x1xf32>
    %c17_i32_36 = arith.constant 17 : i32
    %57 = tpu.dynamic_rotate %52 by %c17_i32_36 dim 1 : vector<32x512xf32>, i32 -> vector<32x512xf32>
    %58 = vector.broadcast %0 : vector<1x512xf32> to vector<32x512xf32>
    %59 = arith.mulf %57, %58 : vector<32x512xf32>
    %c0_37 = arith.constant 0 : index
    %c0_38 = arith.constant 0 : index
    %60 = vector.load %arg14[%c0_37, %c0_38] : memref<288x512xf32, #tpu.memory_space<vmem>>, vector<32x512xf32>
    tpu.vector_store %arg14[%c0_37, %c0_38], %59 {strides = array<i32>} : memref<288x512xf32, #tpu.memory_space<vmem>>, vector<32x512xf32>,
    %c16_i32_39 = arith.constant 16 : i32
    %61 = tpu.dynamic_rotate %52 by %c16_i32_39 dim 1 : vector<32x512xf32>, i32 -> vector<32x512xf32>
    %62 = vector.broadcast %1 : vector<1x512xf32> to vector<32x512xf32>
    %63 = arith.mulf %61, %62 : vector<32x512xf32>
    %c32_40 = arith.constant 32 : index
    %c0_41 = arith.constant 0 : index
    %64 = vector.load %arg14[%c32_40, %c0_41] : memref<288x512xf32, #tpu.memory_space<vmem>>, vector<32x512xf32>
    tpu.vector_store %arg14[%c32_40, %c0_41], %63 {strides = array<i32>} : memref<288x512xf32, #tpu.memory_space<vmem>>, vector<32x512xf32>,
    %c15_i32_42 = arith.constant 15 : i32
    %65 = tpu.dynamic_rotate %52 by %c15_i32_42 dim 1 : vector<32x512xf32>, i32 -> vector<32x512xf32>
    %66 = vector.broadcast %2 : vector<1x512xf32> to vector<32x512xf32>
    %67 = arith.mulf %65, %66 : vector<32x512xf32>
    %c64_43 = arith.constant 64 : index
    %c0_44 = arith.constant 0 : index
    %68 = vector.load %arg14[%c64_43, %c0_44] : memref<288x512xf32, #tpu.memory_space<vmem>>, vector<32x512xf32>
    tpu.vector_store %arg14[%c64_43, %c0_44], %67 {strides = array<i32>} : memref<288x512xf32, #tpu.memory_space<vmem>>, vector<32x512xf32>,
    %c1_i32_45 = arith.constant 1 : i32
    %69 = tpu.dynamic_rotate %52 by %c1_i32_45 dim 1 : vector<32x512xf32>, i32 -> vector<32x512xf32>
    %70 = vector.broadcast %3 : vector<1x512xf32> to vector<32x512xf32>
    %71 = arith.mulf %69, %70 : vector<32x512xf32>
    %c96_46 = arith.constant 96 : index
    %c0_47 = arith.constant 0 : index
    %72 = vector.load %arg14[%c96_46, %c0_47] : memref<288x512xf32, #tpu.memory_space<vmem>>, vector<32x512xf32>
    tpu.vector_store %arg14[%c96_46, %c0_47], %71 {strides = array<i32>} : memref<288x512xf32, #tpu.memory_space<vmem>>, vector<32x512xf32>,
    %c128_48 = arith.constant 128 : index
    %c0_49 = arith.constant 0 : index
    %73 = vector.load %arg14[%c128_48, %c0_49] : memref<288x512xf32, #tpu.memory_space<vmem>>, vector<32x512xf32>
    tpu.vector_store %arg14[%c128_48, %c0_49], %52 {strides = array<i32>} : memref<288x512xf32, #tpu.memory_space<vmem>>, vector<32x512xf32>,
    %c511_i32_50 = arith.constant 511 : i32
    %74 = tpu.dynamic_rotate %52 by %c511_i32_50 dim 1 : vector<32x512xf32>, i32 -> vector<32x512xf32>
    %75 = vector.broadcast %4 : vector<1x512xf32> to vector<32x512xf32>
    %76 = arith.mulf %74, %75 : vector<32x512xf32>
    %c160 = arith.constant 160 : index
    %c0_51 = arith.constant 0 : index
    %77 = vector.load %arg14[%c160, %c0_51] : memref<288x512xf32, #tpu.memory_space<vmem>>, vector<32x512xf32>
    tpu.vector_store %arg14[%c160, %c0_51], %76 {strides = array<i32>} : memref<288x512xf32, #tpu.memory_space<vmem>>, vector<32x512xf32>,
    %c497_i32_52 = arith.constant 497 : i32
    %78 = tpu.dynamic_rotate %52 by %c497_i32_52 dim 1 : vector<32x512xf32>, i32 -> vector<32x512xf32>
    %79 = vector.broadcast %5 : vector<1x512xf32> to vector<32x512xf32>
    %80 = arith.mulf %78, %79 : vector<32x512xf32>
    %c192 = arith.constant 192 : index
    %c0_53 = arith.constant 0 : index
    %81 = vector.load %arg14[%c192, %c0_53] : memref<288x512xf32, #tpu.memory_space<vmem>>, vector<32x512xf32>
    tpu.vector_store %arg14[%c192, %c0_53], %80 {strides = array<i32>} : memref<288x512xf32, #tpu.memory_space<vmem>>, vector<32x512xf32>,
    %c496_i32_54 = arith.constant 496 : i32
    %82 = tpu.dynamic_rotate %52 by %c496_i32_54 dim 1 : vector<32x512xf32>, i32 -> vector<32x512xf32>
    %83 = vector.broadcast %6 : vector<1x512xf32> to vector<32x512xf32>
    %84 = arith.mulf %82, %83 : vector<32x512xf32>
    %c224 = arith.constant 224 : index
    %c0_55 = arith.constant 0 : index
    %85 = vector.load %arg14[%c224, %c0_55] : memref<288x512xf32, #tpu.memory_space<vmem>>, vector<32x512xf32>
    tpu.vector_store %arg14[%c224, %c0_55], %84 {strides = array<i32>} : memref<288x512xf32, #tpu.memory_space<vmem>>, vector<32x512xf32>,
    %c495_i32_56 = arith.constant 495 : i32
    %86 = tpu.dynamic_rotate %52 by %c495_i32_56 dim 1 : vector<32x512xf32>, i32 -> vector<32x512xf32>
    %87 = vector.broadcast %7 : vector<1x512xf32> to vector<32x512xf32>
    %88 = arith.mulf %86, %87 : vector<32x512xf32>
    %c256 = arith.constant 256 : index
    %c0_57 = arith.constant 0 : index
    %89 = vector.load %arg14[%c256, %c0_57] : memref<288x512xf32, #tpu.memory_space<vmem>>, vector<32x512xf32>
    tpu.vector_store %arg14[%c256, %c0_57], %88 {strides = array<i32>} : memref<288x512xf32, #tpu.memory_space<vmem>>, vector<32x512xf32>,
    %c0_58 = arith.constant 0 : index
    %c0_59 = arith.constant 0 : index
    %90 = vector.load %arg14[%c0_58, %c0_59] : memref<288x512xf32, #tpu.memory_space<vmem>>, vector<288x512xf32>
    %cst_60 = arith.constant dense<0.000000e+00> : vector<16x512xf32>
    %91 = tpu.matmul %54, %90, %cst_60 {dimension_numbers = #tpu.dot_dimension_numbers<[1], [0], [0], [1], [0, 0, 1, 1], [], []>} : vector<16x288xf32>, vector<288x512xf32>, vector<16x512xf32> -> vector<16x512xf32>
    %92 = vector.broadcast %56 : vector<16x1xf32> to vector<16x512xf32>
    %93 = arith.addf %91, %92 : vector<16x512xf32>
    %94 = vector.extract_strided_slice %93 {offsets = [0, 0], sizes = [16, 256], strides = [1, 1]} : vector<16x512xf32> to vector<16x256xf32>
    %cst_61 = arith.constant dense<0.000000e+00> : vector<16xf32>
    %95 = vector.multi_reduction <add>, %94, %cst_61 [1] : vector<16x256xf32> to vector<16xf32>
    %96 = vector.shape_cast %95 : vector<16xf32> to vector<16x1xf32>
    %cst_62 = arith.constant 2.560000e+02 : f32
    %97 = vector.broadcast %cst_62 : f32 to vector<16x1xf32>
    %98 = arith.divf %96, %97 : vector<16x1xf32>
    %99 = vector.extract_strided_slice %93 {offsets = [0, 256], sizes = [16, 256], strides = [1, 1]} : vector<16x512xf32> to vector<16x256xf32>
    %cst_63 = arith.constant dense<0.000000e+00> : vector<16xf32>
    %100 = vector.multi_reduction <add>, %99, %cst_63 [1] : vector<16x256xf32> to vector<16xf32>
    %101 = vector.shape_cast %100 : vector<16xf32> to vector<16x1xf32>
    %cst_64 = arith.constant 2.560000e+02 : f32
    %102 = vector.broadcast %cst_64 : f32 to vector<16x1xf32>
    %103 = arith.divf %101, %102 : vector<16x1xf32>
    %104 = tpu.concatenate %98, %103 in 1 : vector<16x1xf32>, vector<16x1xf32> -> vector<16x2xf32>
    %c0_65 = arith.constant 0 : index
    %c0_66 = arith.constant 0 : index
    %c0_67 = arith.constant 0 : index
    %105 = vector.load %arg7[%c0_65, %c0_66, %c0_67] : memref<2x4x16xf32, #tpu.memory_space<vmem>>, vector<1x4x16xf32>
    %106 = vector.shape_cast %105 : vector<1x4x16xf32> to vector<4x16xf32>
    %cst_68 = arith.constant dense<0.000000e+00> : vector<4x2xf32>
    %107 = tpu.matmul %106, %104, %cst_68 {dimension_numbers = #tpu.dot_dimension_numbers<[1], [0], [0], [1], [0, 0, 1, 1], [], []>} : vector<4x16xf32>, vector<16x2xf32>, vector<4x2xf32> -> vector<4x2xf32>
    %c0_69 = arith.constant 0 : index
    %c0_70 = arith.constant 0 : index
    %c0_71 = arith.constant 0 : index
    %108 = vector.load %arg8[%c0_69, %c0_70, %c0_71] : memref<2x4x1xf32, #tpu.memory_space<vmem>>, vector<1x4x1xf32>
    %109 = vector.shape_cast %108 : vector<1x4x1xf32> to vector<4x1xf32>
    %110 = vector.broadcast %109 : vector<4x1xf32> to vector<4x2xf32>
    %111 = arith.addf %107, %110 : vector<4x2xf32>
    %cst_72 = arith.constant 0.000000e+00 : f32
    %112 = vector.broadcast %cst_72 : f32 to vector<4x2xf32>
    %113 = arith.maximumf %111, %112 : vector<4x2xf32>
    %c0_73 = arith.constant 0 : index
    %c0_74 = arith.constant 0 : index
    %c0_75 = arith.constant 0 : index
    %114 = vector.load %arg9[%c0_73, %c0_74, %c0_75] : memref<2x16x4xf32, #tpu.memory_space<vmem>>, vector<1x16x4xf32>
    %115 = vector.shape_cast %114 : vector<1x16x4xf32> to vector<16x4xf32>
    %cst_76 = arith.constant dense<0.000000e+00> : vector<16x2xf32>
    %116 = tpu.matmul %115, %113, %cst_76 {dimension_numbers = #tpu.dot_dimension_numbers<[1], [0], [0], [1], [0, 0, 1, 1], [], []>} : vector<16x4xf32>, vector<4x2xf32>, vector<16x2xf32> -> vector<16x2xf32>
    %c0_77 = arith.constant 0 : index
    %c0_78 = arith.constant 0 : index
    %c0_79 = arith.constant 0 : index
    %117 = vector.load %arg10[%c0_77, %c0_78, %c0_79] : memref<2x16x1xf32, #tpu.memory_space<vmem>>, vector<1x16x1xf32>
    %118 = vector.shape_cast %117 : vector<1x16x1xf32> to vector<16x1xf32>
    %119 = vector.broadcast %118 : vector<16x1xf32> to vector<16x2xf32>
    %120 = arith.addf %116, %119 : vector<16x2xf32>
    %cst_80 = arith.constant 2.000000e+00 : f32
    %121 = vector.broadcast %cst_80 : f32 to vector<16x2xf32>
    %122 = arith.mulf %121, %120 : vector<16x2xf32>
    %123 = arith.negf %122 : vector<16x2xf32>
    %124 = math.exp %123 : vector<16x2xf32>
    %cst_81 = arith.constant 1.000000e+00 : f32
    %125 = vector.broadcast %cst_81 : f32 to vector<16x2xf32>
    %126 = arith.addf %125, %124 : vector<16x2xf32>
    %127 = arith.divf %125, %126 : vector<16x2xf32>
    %128 = vector.extract_strided_slice %93 {offsets = [0, 0], sizes = [16, 256], strides = [1, 1]} : vector<16x512xf32> to vector<16x256xf32>
    %129 = vector.extract_strided_slice %127 {offsets = [0, 0], sizes = [16, 1], strides = [1, 1]} : vector<16x2xf32> to vector<16x1xf32>
    %130 = vector.broadcast %129 : vector<16x1xf32> to vector<16x256xf32>
    %131 = arith.mulf %128, %130 : vector<16x256xf32>
    %132 = vector.extract_strided_slice %93 {offsets = [0, 256], sizes = [16, 256], strides = [1, 1]} : vector<16x512xf32> to vector<16x256xf32>
    %133 = vector.extract_strided_slice %127 {offsets = [0, 1], sizes = [16, 1], strides = [1, 1]} : vector<16x2xf32> to vector<16x1xf32>
    %134 = vector.broadcast %133 : vector<16x1xf32> to vector<16x256xf32>
    %135 = arith.mulf %132, %134 : vector<16x256xf32>
    %136 = tpu.concatenate %131, %135 in 1 : vector<16x256xf32>, vector<16x256xf32> -> vector<16x512xf32>
    %cst_82 = arith.constant 5.000000e-01 : f32
    %137 = vector.broadcast %cst_82 : f32 to vector<16x512xf32>
    %138 = arith.mulf %137, %9 : vector<16x512xf32>
    %139 = arith.addf %136, %138 : vector<16x512xf32>
    %c1_83 = arith.constant 1 : index
    %c0_84 = arith.constant 0 : index
    %c0_85 = arith.constant 0 : index
    %140 = vector.load %arg3[%c1_83, %c0_84, %c0_85] : memref<2x32x144xf32, #tpu.memory_space<vmem>>, vector<1x32x144xf32>
    %141 = vector.shape_cast %140 : vector<1x32x144xf32> to vector<32x144xf32>
    %c1_86 = arith.constant 1 : index
    %c0_87 = arith.constant 0 : index
    %c0_88 = arith.constant 0 : index
    %142 = vector.load %arg4[%c1_86, %c0_87, %c0_88] : memref<2x32x1xf32, #tpu.memory_space<vmem>>, vector<1x32x1xf32>
    %143 = vector.shape_cast %142 : vector<1x32x1xf32> to vector<32x1xf32>
    %c17_i32_89 = arith.constant 17 : i32
    %144 = tpu.dynamic_rotate %139 by %c17_i32_89 dim 1 : vector<16x512xf32>, i32 -> vector<16x512xf32>
    %145 = vector.broadcast %0 : vector<1x512xf32> to vector<16x512xf32>
    %146 = arith.mulf %144, %145 : vector<16x512xf32>
    %c0_90 = arith.constant 0 : index
    %c0_91 = arith.constant 0 : index
    %147 = vector.load %arg14[%c0_90, %c0_91] : memref<288x512xf32, #tpu.memory_space<vmem>>, vector<16x512xf32>
    tpu.vector_store %arg14[%c0_90, %c0_91], %146 {strides = array<i32>} : memref<288x512xf32, #tpu.memory_space<vmem>>, vector<16x512xf32>,
    %c16_i32_92 = arith.constant 16 : i32
    %148 = tpu.dynamic_rotate %139 by %c16_i32_92 dim 1 : vector<16x512xf32>, i32 -> vector<16x512xf32>
    %149 = vector.broadcast %1 : vector<1x512xf32> to vector<16x512xf32>
    %150 = arith.mulf %148, %149 : vector<16x512xf32>
    %c16_93 = arith.constant 16 : index
    %c0_94 = arith.constant 0 : index
    %151 = vector.load %arg14[%c16_93, %c0_94] : memref<288x512xf32, #tpu.memory_space<vmem>>, vector<16x512xf32>
    tpu.vector_store %arg14[%c16_93, %c0_94], %150 {strides = array<i32>} : memref<288x512xf32, #tpu.memory_space<vmem>>, vector<16x512xf32>,
    %c15_i32_95 = arith.constant 15 : i32
    %152 = tpu.dynamic_rotate %139 by %c15_i32_95 dim 1 : vector<16x512xf32>, i32 -> vector<16x512xf32>
    %153 = vector.broadcast %2 : vector<1x512xf32> to vector<16x512xf32>
    %154 = arith.mulf %152, %153 : vector<16x512xf32>
    %c32_96 = arith.constant 32 : index
    %c0_97 = arith.constant 0 : index
    %155 = vector.load %arg14[%c32_96, %c0_97] : memref<288x512xf32, #tpu.memory_space<vmem>>, vector<16x512xf32>
    tpu.vector_store %arg14[%c32_96, %c0_97], %154 {strides = array<i32>} : memref<288x512xf32, #tpu.memory_space<vmem>>, vector<16x512xf32>,
    %c1_i32_98 = arith.constant 1 : i32
    %156 = tpu.dynamic_rotate %139 by %c1_i32_98 dim 1 : vector<16x512xf32>, i32 -> vector<16x512xf32>
    %157 = vector.broadcast %3 : vector<1x512xf32> to vector<16x512xf32>
    %158 = arith.mulf %156, %157 : vector<16x512xf32>
    %c48_99 = arith.constant 48 : index
    %c0_100 = arith.constant 0 : index
    %159 = vector.load %arg14[%c48_99, %c0_100] : memref<288x512xf32, #tpu.memory_space<vmem>>, vector<16x512xf32>
    tpu.vector_store %arg14[%c48_99, %c0_100], %158 {strides = array<i32>} : memref<288x512xf32, #tpu.memory_space<vmem>>, vector<16x512xf32>,
    %c64_101 = arith.constant 64 : index
    %c0_102 = arith.constant 0 : index
    %160 = vector.load %arg14[%c64_101, %c0_102] : memref<288x512xf32, #tpu.memory_space<vmem>>, vector<16x512xf32>
    tpu.vector_store %arg14[%c64_101, %c0_102], %139 {strides = array<i32>} : memref<288x512xf32, #tpu.memory_space<vmem>>, vector<16x512xf32>,
    %c511_i32_103 = arith.constant 511 : i32
    %161 = tpu.dynamic_rotate %139 by %c511_i32_103 dim 1 : vector<16x512xf32>, i32 -> vector<16x512xf32>
    %162 = vector.broadcast %4 : vector<1x512xf32> to vector<16x512xf32>
    %163 = arith.mulf %161, %162 : vector<16x512xf32>
    %c80_104 = arith.constant 80 : index
    %c0_105 = arith.constant 0 : index
    %164 = vector.load %arg14[%c80_104, %c0_105] : memref<288x512xf32, #tpu.memory_space<vmem>>, vector<16x512xf32>
    tpu.vector_store %arg14[%c80_104, %c0_105], %163 {strides = array<i32>} : memref<288x512xf32, #tpu.memory_space<vmem>>, vector<16x512xf32>,
    %c497_i32_106 = arith.constant 497 : i32
    %165 = tpu.dynamic_rotate %139 by %c497_i32_106 dim 1 : vector<16x512xf32>, i32 -> vector<16x512xf32>
    %166 = vector.broadcast %5 : vector<1x512xf32> to vector<16x512xf32>
    %167 = arith.mulf %165, %166 : vector<16x512xf32>
    %c96_107 = arith.constant 96 : index
    %c0_108 = arith.constant 0 : index
    %168 = vector.load %arg14[%c96_107, %c0_108] : memref<288x512xf32, #tpu.memory_space<vmem>>, vector<16x512xf32>
    tpu.vector_store %arg14[%c96_107, %c0_108], %167 {strides = array<i32>} : memref<288x512xf32, #tpu.memory_space<vmem>>, vector<16x512xf32>,
    %c496_i32_109 = arith.constant 496 : i32
    %169 = tpu.dynamic_rotate %139 by %c496_i32_109 dim 1 : vector<16x512xf32>, i32 -> vector<16x512xf32>
    %170 = vector.broadcast %6 : vector<1x512xf32> to vector<16x512xf32>
    %171 = arith.mulf %169, %170 : vector<16x512xf32>
    %c112_110 = arith.constant 112 : index
    %c0_111 = arith.constant 0 : index
    %172 = vector.load %arg14[%c112_110, %c0_111] : memref<288x512xf32, #tpu.memory_space<vmem>>, vector<16x512xf32>
    tpu.vector_store %arg14[%c112_110, %c0_111], %171 {strides = array<i32>} : memref<288x512xf32, #tpu.memory_space<vmem>>, vector<16x512xf32>,
    %c495_i32_112 = arith.constant 495 : i32
    %173 = tpu.dynamic_rotate %139 by %c495_i32_112 dim 1 : vector<16x512xf32>, i32 -> vector<16x512xf32>
    %174 = vector.broadcast %7 : vector<1x512xf32> to vector<16x512xf32>
    %175 = arith.mulf %173, %174 : vector<16x512xf32>
    %c128_113 = arith.constant 128 : index
    %c0_114 = arith.constant 0 : index
    %176 = vector.load %arg14[%c128_113, %c0_114] : memref<288x512xf32, #tpu.memory_space<vmem>>, vector<16x512xf32>
    tpu.vector_store %arg14[%c128_113, %c0_114], %175 {strides = array<i32>} : memref<288x512xf32, #tpu.memory_space<vmem>>, vector<16x512xf32>,
    %c0_115 = arith.constant 0 : index
    %c0_116 = arith.constant 0 : index
    %177 = vector.load %arg14[%c0_115, %c0_116] : memref<288x512xf32, #tpu.memory_space<vmem>>, vector<144x512xf32>
    %cst_117 = arith.constant dense<0.000000e+00> : vector<32x512xf32>
    %178 = tpu.matmul %141, %177, %cst_117 {dimension_numbers = #tpu.dot_dimension_numbers<[1], [0], [0], [1], [0, 0, 1, 1], [], []>} : vector<32x144xf32>, vector<144x512xf32>, vector<32x512xf32> -> vector<32x512xf32>
    %179 = vector.broadcast %143 : vector<32x1xf32> to vector<32x512xf32>
    %180 = arith.addf %178, %179 : vector<32x512xf32>
    %cst_118 = arith.constant 0.000000e+00 : f32
    %181 = vector.broadcast %cst_118 : f32 to vector<32x512xf32>
    %182 = arith.maximumf %180, %181 : vector<32x512xf32>
    %c1_119 = arith.constant 1 : index
    %c0_120 = arith.constant 0 : index
    %c0_121 = arith.constant 0 : index
    %183 = vector.load %arg5[%c1_119, %c0_120, %c0_121] : memref<2x16x288xf32, #tpu.memory_space<vmem>>, vector<1x16x288xf32>
    %184 = vector.shape_cast %183 : vector<1x16x288xf32> to vector<16x288xf32>
    %c1_122 = arith.constant 1 : index
    %c0_123 = arith.constant 0 : index
    %c0_124 = arith.constant 0 : index
    %185 = vector.load %arg6[%c1_122, %c0_123, %c0_124] : memref<2x16x1xf32, #tpu.memory_space<vmem>>, vector<1x16x1xf32>
    %186 = vector.shape_cast %185 : vector<1x16x1xf32> to vector<16x1xf32>
    %c17_i32_125 = arith.constant 17 : i32
    %187 = tpu.dynamic_rotate %182 by %c17_i32_125 dim 1 : vector<32x512xf32>, i32 -> vector<32x512xf32>
    %188 = vector.broadcast %0 : vector<1x512xf32> to vector<32x512xf32>
    %189 = arith.mulf %187, %188 : vector<32x512xf32>
    %c0_126 = arith.constant 0 : index
    %c0_127 = arith.constant 0 : index
    %190 = vector.load %arg14[%c0_126, %c0_127] : memref<288x512xf32, #tpu.memory_space<vmem>>, vector<32x512xf32>
    tpu.vector_store %arg14[%c0_126, %c0_127], %189 {strides = array<i32>} : memref<288x512xf32, #tpu.memory_space<vmem>>, vector<32x512xf32>,
    %c16_i32_128 = arith.constant 16 : i32
    %191 = tpu.dynamic_rotate %182 by %c16_i32_128 dim 1 : vector<32x512xf32>, i32 -> vector<32x512xf32>
    %192 = vector.broadcast %1 : vector<1x512xf32> to vector<32x512xf32>
    %193 = arith.mulf %191, %192 : vector<32x512xf32>
    %c32_129 = arith.constant 32 : index
    %c0_130 = arith.constant 0 : index
    %194 = vector.load %arg14[%c32_129, %c0_130] : memref<288x512xf32, #tpu.memory_space<vmem>>, vector<32x512xf32>
    tpu.vector_store %arg14[%c32_129, %c0_130], %193 {strides = array<i32>} : memref<288x512xf32, #tpu.memory_space<vmem>>, vector<32x512xf32>,
    %c15_i32_131 = arith.constant 15 : i32
    %195 = tpu.dynamic_rotate %182 by %c15_i32_131 dim 1 : vector<32x512xf32>, i32 -> vector<32x512xf32>
    %196 = vector.broadcast %2 : vector<1x512xf32> to vector<32x512xf32>
    %197 = arith.mulf %195, %196 : vector<32x512xf32>
    %c64_132 = arith.constant 64 : index
    %c0_133 = arith.constant 0 : index
    %198 = vector.load %arg14[%c64_132, %c0_133] : memref<288x512xf32, #tpu.memory_space<vmem>>, vector<32x512xf32>
    tpu.vector_store %arg14[%c64_132, %c0_133], %197 {strides = array<i32>} : memref<288x512xf32, #tpu.memory_space<vmem>>, vector<32x512xf32>,
    %c1_i32_134 = arith.constant 1 : i32
    %199 = tpu.dynamic_rotate %182 by %c1_i32_134 dim 1 : vector<32x512xf32>, i32 -> vector<32x512xf32>
    %200 = vector.broadcast %3 : vector<1x512xf32> to vector<32x512xf32>
    %201 = arith.mulf %199, %200 : vector<32x512xf32>
    %c96_135 = arith.constant 96 : index
    %c0_136 = arith.constant 0 : index
    %202 = vector.load %arg14[%c96_135, %c0_136] : memref<288x512xf32, #tpu.memory_space<vmem>>, vector<32x512xf32>
    tpu.vector_store %arg14[%c96_135, %c0_136], %201 {strides = array<i32>} : memref<288x512xf32, #tpu.memory_space<vmem>>, vector<32x512xf32>,
    %c128_137 = arith.constant 128 : index
    %c0_138 = arith.constant 0 : index
    %203 = vector.load %arg14[%c128_137, %c0_138] : memref<288x512xf32, #tpu.memory_space<vmem>>, vector<32x512xf32>
    tpu.vector_store %arg14[%c128_137, %c0_138], %182 {strides = array<i32>} : memref<288x512xf32, #tpu.memory_space<vmem>>, vector<32x512xf32>,
    %c511_i32_139 = arith.constant 511 : i32
    %204 = tpu.dynamic_rotate %182 by %c511_i32_139 dim 1 : vector<32x512xf32>, i32 -> vector<32x512xf32>
    %205 = vector.broadcast %4 : vector<1x512xf32> to vector<32x512xf32>
    %206 = arith.mulf %204, %205 : vector<32x512xf32>
    %c160_140 = arith.constant 160 : index
    %c0_141 = arith.constant 0 : index
    %207 = vector.load %arg14[%c160_140, %c0_141] : memref<288x512xf32, #tpu.memory_space<vmem>>, vector<32x512xf32>
    tpu.vector_store %arg14[%c160_140, %c0_141], %206 {strides = array<i32>} : memref<288x512xf32, #tpu.memory_space<vmem>>, vector<32x512xf32>,
    %c497_i32_142 = arith.constant 497 : i32
    %208 = tpu.dynamic_rotate %182 by %c497_i32_142 dim 1 : vector<32x512xf32>, i32 -> vector<32x512xf32>
    %209 = vector.broadcast %5 : vector<1x512xf32> to vector<32x512xf32>
    %210 = arith.mulf %208, %209 : vector<32x512xf32>
    %c192_143 = arith.constant 192 : index
    %c0_144 = arith.constant 0 : index
    %211 = vector.load %arg14[%c192_143, %c0_144] : memref<288x512xf32, #tpu.memory_space<vmem>>, vector<32x512xf32>
    tpu.vector_store %arg14[%c192_143, %c0_144], %210 {strides = array<i32>} : memref<288x512xf32, #tpu.memory_space<vmem>>, vector<32x512xf32>,
    %c496_i32_145 = arith.constant 496 : i32
    %212 = tpu.dynamic_rotate %182 by %c496_i32_145 dim 1 : vector<32x512xf32>, i32 -> vector<32x512xf32>
    %213 = vector.broadcast %6 : vector<1x512xf32> to vector<32x512xf32>
    %214 = arith.mulf %212, %213 : vector<32x512xf32>
    %c224_146 = arith.constant 224 : index
    %c0_147 = arith.constant 0 : index
    %215 = vector.load %arg14[%c224_146, %c0_147] : memref<288x512xf32, #tpu.memory_space<vmem>>, vector<32x512xf32>
    tpu.vector_store %arg14[%c224_146, %c0_147], %214 {strides = array<i32>} : memref<288x512xf32, #tpu.memory_space<vmem>>, vector<32x512xf32>,
    %c495_i32_148 = arith.constant 495 : i32
    %216 = tpu.dynamic_rotate %182 by %c495_i32_148 dim 1 : vector<32x512xf32>, i32 -> vector<32x512xf32>
    %217 = vector.broadcast %7 : vector<1x512xf32> to vector<32x512xf32>
    %218 = arith.mulf %216, %217 : vector<32x512xf32>
    %c256_149 = arith.constant 256 : index
    %c0_150 = arith.constant 0 : index
    %219 = vector.load %arg14[%c256_149, %c0_150] : memref<288x512xf32, #tpu.memory_space<vmem>>, vector<32x512xf32>
    tpu.vector_store %arg14[%c256_149, %c0_150], %218 {strides = array<i32>} : memref<288x512xf32, #tpu.memory_space<vmem>>, vector<32x512xf32>,
    %c0_151 = arith.constant 0 : index
    %c0_152 = arith.constant 0 : index
    %220 = vector.load %arg14[%c0_151, %c0_152] : memref<288x512xf32, #tpu.memory_space<vmem>>, vector<288x512xf32>
    %cst_153 = arith.constant dense<0.000000e+00> : vector<16x512xf32>
    %221 = tpu.matmul %184, %220, %cst_153 {dimension_numbers = #tpu.dot_dimension_numbers<[1], [0], [0], [1], [0, 0, 1, 1], [], []>} : vector<16x288xf32>, vector<288x512xf32>, vector<16x512xf32> -> vector<16x512xf32>
    %222 = vector.broadcast %186 : vector<16x1xf32> to vector<16x512xf32>
    %223 = arith.addf %221, %222 : vector<16x512xf32>
    %224 = vector.extract_strided_slice %223 {offsets = [0, 0], sizes = [16, 256], strides = [1, 1]} : vector<16x512xf32> to vector<16x256xf32>
    %cst_154 = arith.constant dense<0.000000e+00> : vector<16xf32>
    %225 = vector.multi_reduction <add>, %224, %cst_154 [1] : vector<16x256xf32> to vector<16xf32>
    %226 = vector.shape_cast %225 : vector<16xf32> to vector<16x1xf32>
    %cst_155 = arith.constant 2.560000e+02 : f32
    %227 = vector.broadcast %cst_155 : f32 to vector<16x1xf32>
    %228 = arith.divf %226, %227 : vector<16x1xf32>
    %229 = vector.extract_strided_slice %223 {offsets = [0, 256], sizes = [16, 256], strides = [1, 1]} : vector<16x512xf32> to vector<16x256xf32>
    %cst_156 = arith.constant dense<0.000000e+00> : vector<16xf32>
    %230 = vector.multi_reduction <add>, %229, %cst_156 [1] : vector<16x256xf32> to vector<16xf32>
    %231 = vector.shape_cast %230 : vector<16xf32> to vector<16x1xf32>
    %cst_157 = arith.constant 2.560000e+02 : f32
    %232 = vector.broadcast %cst_157 : f32 to vector<16x1xf32>
    %233 = arith.divf %231, %232 : vector<16x1xf32>
    %234 = tpu.concatenate %228, %233 in 1 : vector<16x1xf32>, vector<16x1xf32> -> vector<16x2xf32>
    %c1_158 = arith.constant 1 : index
    %c0_159 = arith.constant 0 : index
    %c0_160 = arith.constant 0 : index
    %235 = vector.load %arg7[%c1_158, %c0_159, %c0_160] : memref<2x4x16xf32, #tpu.memory_space<vmem>>, vector<1x4x16xf32>
    %236 = vector.shape_cast %235 : vector<1x4x16xf32> to vector<4x16xf32>
    %cst_161 = arith.constant dense<0.000000e+00> : vector<4x2xf32>
    %237 = tpu.matmul %236, %234, %cst_161 {dimension_numbers = #tpu.dot_dimension_numbers<[1], [0], [0], [1], [0, 0, 1, 1], [], []>} : vector<4x16xf32>, vector<16x2xf32>, vector<4x2xf32> -> vector<4x2xf32>
    %c1_162 = arith.constant 1 : index
    %c0_163 = arith.constant 0 : index
    %c0_164 = arith.constant 0 : index
    %238 = vector.load %arg8[%c1_162, %c0_163, %c0_164] : memref<2x4x1xf32, #tpu.memory_space<vmem>>, vector<1x4x1xf32>
    %239 = vector.shape_cast %238 : vector<1x4x1xf32> to vector<4x1xf32>
    %240 = vector.broadcast %239 : vector<4x1xf32> to vector<4x2xf32>
    %241 = arith.addf %237, %240 : vector<4x2xf32>
    %cst_165 = arith.constant 0.000000e+00 : f32
    %242 = vector.broadcast %cst_165 : f32 to vector<4x2xf32>
    %243 = arith.maximumf %241, %242 : vector<4x2xf32>
    %c1_166 = arith.constant 1 : index
    %c0_167 = arith.constant 0 : index
    %c0_168 = arith.constant 0 : index
    %244 = vector.load %arg9[%c1_166, %c0_167, %c0_168] : memref<2x16x4xf32, #tpu.memory_space<vmem>>, vector<1x16x4xf32>
    %245 = vector.shape_cast %244 : vector<1x16x4xf32> to vector<16x4xf32>
    %cst_169 = arith.constant dense<0.000000e+00> : vector<16x2xf32>
    %246 = tpu.matmul %245, %243, %cst_169 {dimension_numbers = #tpu.dot_dimension_numbers<[1], [0], [0], [1], [0, 0, 1, 1], [], []>} : vector<16x4xf32>, vector<4x2xf32>, vector<16x2xf32> -> vector<16x2xf32>
    %c1_170 = arith.constant 1 : index
    %c0_171 = arith.constant 0 : index
    %c0_172 = arith.constant 0 : index
    %247 = vector.load %arg10[%c1_170, %c0_171, %c0_172] : memref<2x16x1xf32, #tpu.memory_space<vmem>>, vector<1x16x1xf32>
    %248 = vector.shape_cast %247 : vector<1x16x1xf32> to vector<16x1xf32>
    %249 = vector.broadcast %248 : vector<16x1xf32> to vector<16x2xf32>
    %250 = arith.addf %246, %249 : vector<16x2xf32>
    %cst_173 = arith.constant 2.000000e+00 : f32
    %251 = vector.broadcast %cst_173 : f32 to vector<16x2xf32>
    %252 = arith.mulf %251, %250 : vector<16x2xf32>
    %253 = arith.negf %252 : vector<16x2xf32>
    %254 = math.exp %253 : vector<16x2xf32>
    %cst_174 = arith.constant 1.000000e+00 : f32
    %255 = vector.broadcast %cst_174 : f32 to vector<16x2xf32>
    %256 = arith.addf %255, %254 : vector<16x2xf32>
    %257 = arith.divf %255, %256 : vector<16x2xf32>
    %258 = vector.extract_strided_slice %223 {offsets = [0, 0], sizes = [16, 256], strides = [1, 1]} : vector<16x512xf32> to vector<16x256xf32>
    %259 = vector.extract_strided_slice %257 {offsets = [0, 0], sizes = [16, 1], strides = [1, 1]} : vector<16x2xf32> to vector<16x1xf32>
    %260 = vector.broadcast %259 : vector<16x1xf32> to vector<16x256xf32>
    %261 = arith.mulf %258, %260 : vector<16x256xf32>
    %262 = vector.extract_strided_slice %223 {offsets = [0, 256], sizes = [16, 256], strides = [1, 1]} : vector<16x512xf32> to vector<16x256xf32>
    %263 = vector.extract_strided_slice %257 {offsets = [0, 1], sizes = [16, 1], strides = [1, 1]} : vector<16x2xf32> to vector<16x1xf32>
    %264 = vector.broadcast %263 : vector<16x1xf32> to vector<16x256xf32>
    %265 = arith.mulf %262, %264 : vector<16x256xf32>
    %266 = tpu.concatenate %261, %265 in 1 : vector<16x256xf32>, vector<16x256xf32> -> vector<16x512xf32>
    %cst_175 = arith.constant 5.000000e-01 : f32
    %267 = vector.broadcast %cst_175 : f32 to vector<16x512xf32>
    %268 = arith.mulf %267, %139 : vector<16x512xf32>
    %269 = arith.addf %266, %268 : vector<16x512xf32>
    %c0_176 = arith.constant 0 : index
    %c0_177 = arith.constant 0 : index
    %270 = vector.load %arg11[%c0_176, %c0_177] : memref<16x144xf32, #tpu.memory_space<vmem>>, vector<16x144xf32>
    %c0_178 = arith.constant 0 : index
    %c0_179 = arith.constant 0 : index
    %271 = vector.load %arg12[%c0_178, %c0_179] : memref<16x1xf32, #tpu.memory_space<vmem>>, vector<16x1xf32>
    %c17_i32_180 = arith.constant 17 : i32
    %272 = tpu.dynamic_rotate %269 by %c17_i32_180 dim 1 : vector<16x512xf32>, i32 -> vector<16x512xf32>
    %273 = vector.broadcast %0 : vector<1x512xf32> to vector<16x512xf32>
    %274 = arith.mulf %272, %273 : vector<16x512xf32>
    %c0_181 = arith.constant 0 : index
    %c0_182 = arith.constant 0 : index
    %275 = vector.load %arg14[%c0_181, %c0_182] : memref<288x512xf32, #tpu.memory_space<vmem>>, vector<16x512xf32>
    tpu.vector_store %arg14[%c0_181, %c0_182], %274 {strides = array<i32>} : memref<288x512xf32, #tpu.memory_space<vmem>>, vector<16x512xf32>,
    %c16_i32_183 = arith.constant 16 : i32
    %276 = tpu.dynamic_rotate %269 by %c16_i32_183 dim 1 : vector<16x512xf32>, i32 -> vector<16x512xf32>
    %277 = vector.broadcast %1 : vector<1x512xf32> to vector<16x512xf32>
    %278 = arith.mulf %276, %277 : vector<16x512xf32>
    %c16_184 = arith.constant 16 : index
    %c0_185 = arith.constant 0 : index
    %279 = vector.load %arg14[%c16_184, %c0_185] : memref<288x512xf32, #tpu.memory_space<vmem>>, vector<16x512xf32>
    tpu.vector_store %arg14[%c16_184, %c0_185], %278 {strides = array<i32>} : memref<288x512xf32, #tpu.memory_space<vmem>>, vector<16x512xf32>,
    %c15_i32_186 = arith.constant 15 : i32
    %280 = tpu.dynamic_rotate %269 by %c15_i32_186 dim 1 : vector<16x512xf32>, i32 -> vector<16x512xf32>
    %281 = vector.broadcast %2 : vector<1x512xf32> to vector<16x512xf32>
    %282 = arith.mulf %280, %281 : vector<16x512xf32>
    %c32_187 = arith.constant 32 : index
    %c0_188 = arith.constant 0 : index
    %283 = vector.load %arg14[%c32_187, %c0_188] : memref<288x512xf32, #tpu.memory_space<vmem>>, vector<16x512xf32>
    tpu.vector_store %arg14[%c32_187, %c0_188], %282 {strides = array<i32>} : memref<288x512xf32, #tpu.memory_space<vmem>>, vector<16x512xf32>,
    %c1_i32_189 = arith.constant 1 : i32
    %284 = tpu.dynamic_rotate %269 by %c1_i32_189 dim 1 : vector<16x512xf32>, i32 -> vector<16x512xf32>
    %285 = vector.broadcast %3 : vector<1x512xf32> to vector<16x512xf32>
    %286 = arith.mulf %284, %285 : vector<16x512xf32>
    %c48_190 = arith.constant 48 : index
    %c0_191 = arith.constant 0 : index
    %287 = vector.load %arg14[%c48_190, %c0_191] : memref<288x512xf32, #tpu.memory_space<vmem>>, vector<16x512xf32>
    tpu.vector_store %arg14[%c48_190, %c0_191], %286 {strides = array<i32>} : memref<288x512xf32, #tpu.memory_space<vmem>>, vector<16x512xf32>,
    %c64_192 = arith.constant 64 : index
    %c0_193 = arith.constant 0 : index
    %288 = vector.load %arg14[%c64_192, %c0_193] : memref<288x512xf32, #tpu.memory_space<vmem>>, vector<16x512xf32>
    tpu.vector_store %arg14[%c64_192, %c0_193], %269 {strides = array<i32>} : memref<288x512xf32, #tpu.memory_space<vmem>>, vector<16x512xf32>,
    %c511_i32_194 = arith.constant 511 : i32
    %289 = tpu.dynamic_rotate %269 by %c511_i32_194 dim 1 : vector<16x512xf32>, i32 -> vector<16x512xf32>
    %290 = vector.broadcast %4 : vector<1x512xf32> to vector<16x512xf32>
    %291 = arith.mulf %289, %290 : vector<16x512xf32>
    %c80_195 = arith.constant 80 : index
    %c0_196 = arith.constant 0 : index
    %292 = vector.load %arg14[%c80_195, %c0_196] : memref<288x512xf32, #tpu.memory_space<vmem>>, vector<16x512xf32>
    tpu.vector_store %arg14[%c80_195, %c0_196], %291 {strides = array<i32>} : memref<288x512xf32, #tpu.memory_space<vmem>>, vector<16x512xf32>,
    %c497_i32_197 = arith.constant 497 : i32
    %293 = tpu.dynamic_rotate %269 by %c497_i32_197 dim 1 : vector<16x512xf32>, i32 -> vector<16x512xf32>
    %294 = vector.broadcast %5 : vector<1x512xf32> to vector<16x512xf32>
    %295 = arith.mulf %293, %294 : vector<16x512xf32>
    %c96_198 = arith.constant 96 : index
    %c0_199 = arith.constant 0 : index
    %296 = vector.load %arg14[%c96_198, %c0_199] : memref<288x512xf32, #tpu.memory_space<vmem>>, vector<16x512xf32>
    tpu.vector_store %arg14[%c96_198, %c0_199], %295 {strides = array<i32>} : memref<288x512xf32, #tpu.memory_space<vmem>>, vector<16x512xf32>,
    %c496_i32_200 = arith.constant 496 : i32
    %297 = tpu.dynamic_rotate %269 by %c496_i32_200 dim 1 : vector<16x512xf32>, i32 -> vector<16x512xf32>
    %298 = vector.broadcast %6 : vector<1x512xf32> to vector<16x512xf32>
    %299 = arith.mulf %297, %298 : vector<16x512xf32>
    %c112_201 = arith.constant 112 : index
    %c0_202 = arith.constant 0 : index
    %300 = vector.load %arg14[%c112_201, %c0_202] : memref<288x512xf32, #tpu.memory_space<vmem>>, vector<16x512xf32>
    tpu.vector_store %arg14[%c112_201, %c0_202], %299 {strides = array<i32>} : memref<288x512xf32, #tpu.memory_space<vmem>>, vector<16x512xf32>,
    %c495_i32_203 = arith.constant 495 : i32
    %301 = tpu.dynamic_rotate %269 by %c495_i32_203 dim 1 : vector<16x512xf32>, i32 -> vector<16x512xf32>
    %302 = vector.broadcast %7 : vector<1x512xf32> to vector<16x512xf32>
    %303 = arith.mulf %301, %302 : vector<16x512xf32>
    %c128_204 = arith.constant 128 : index
    %c0_205 = arith.constant 0 : index
    %304 = vector.load %arg14[%c128_204, %c0_205] : memref<288x512xf32, #tpu.memory_space<vmem>>, vector<16x512xf32>
    tpu.vector_store %arg14[%c128_204, %c0_205], %303 {strides = array<i32>} : memref<288x512xf32, #tpu.memory_space<vmem>>, vector<16x512xf32>,
    %c0_206 = arith.constant 0 : index
    %c0_207 = arith.constant 0 : index
    %305 = vector.load %arg14[%c0_206, %c0_207] : memref<288x512xf32, #tpu.memory_space<vmem>>, vector<144x512xf32>
    %cst_208 = arith.constant dense<0.000000e+00> : vector<16x512xf32>
    %306 = tpu.matmul %270, %305, %cst_208 {dimension_numbers = #tpu.dot_dimension_numbers<[1], [0], [0], [1], [0, 0, 1, 1], [], []>} : vector<16x144xf32>, vector<144x512xf32>, vector<16x512xf32> -> vector<16x512xf32>
    %307 = vector.broadcast %271 : vector<16x1xf32> to vector<16x512xf32>
    %308 = arith.addf %306, %307 : vector<16x512xf32>
    %cst_209 = arith.constant 1.000000e+00 : f32
    %309 = vector.broadcast %cst_209 : f32 to vector<16x512xf32>
    %310 = arith.mulf %309, %9 : vector<16x512xf32>
    %311 = arith.addf %308, %310 : vector<16x512xf32>
    %312 = vector.shape_cast %311 : vector<16x512xf32> to vector<1x16x512xf32>
    %c0_210 = arith.constant 0 : index
    %c0_211 = arith.constant 0 : index
    %c0_212 = arith.constant 0 : index
    %313 = vector.load %arg13[%c0_210, %c0_211, %c0_212] : memref<1x16x512xf32, #tpu.memory_space<vmem>>, vector<1x16x512xf32>
    tpu.vector_store %arg13[%c0_210, %c0_211, %c0_212], %312 {strides = array<i32>} : memref<1x16x512xf32, #tpu.memory_space<vmem>>, vector<1x16x512xf32>,
    return
  }
  func.func @transform_0(%arg0: i32) -> (i32, i32, i32) {
    %c0_i32 = arith.constant 0 : i32
    %c0_i32_0 = arith.constant 0 : i32
    %c0_i32_1 = arith.constant 0 : i32
    return %arg0, %c0_i32, %c0_i32_0 : i32, i32, i32
  }
  func.func @transform_1(%arg0: i32) -> (i32, i32) {
    %c0_i32 = arith.constant 0 : i32
    %c0_i32_0 = arith.constant 0 : i32
    %c0_i32_1 = arith.constant 0 : i32
    return %c0_i32, %c0_i32_0 : i32, i32
  }
  func.func @transform_2(%arg0: i32) -> (i32, i32, i32) {
    %c0_i32 = arith.constant 0 : i32
    %c0_i32_0 = arith.constant 0 : i32
    %c0_i32_1 = arith.constant 0 : i32
    %c0_i32_2 = arith.constant 0 : i32
    return %c0_i32, %c0_i32_0, %c0_i32_1 : i32, i32, i32
  }
  func.func @transform_3(%arg0: i32) -> (i32, i32, i32) {
    %c0_i32 = arith.constant 0 : i32
    %c0_i32_0 = arith.constant 0 : i32
    %c0_i32_1 = arith.constant 0 : i32
    %c0_i32_2 = arith.constant 0 : i32
    return %c0_i32, %c0_i32_0, %c0_i32_1 : i32, i32, i32
  }
  func.func @transform_4(%arg0: i32) -> (i32, i32, i32) {
    %c0_i32 = arith.constant 0 : i32
    %c0_i32_0 = arith.constant 0 : i32
    %c0_i32_1 = arith.constant 0 : i32
    %c0_i32_2 = arith.constant 0 : i32
    return %c0_i32, %c0_i32_0, %c0_i32_1 : i32, i32, i32
  }
  func.func @transform_5(%arg0: i32) -> (i32, i32, i32) {
    %c0_i32 = arith.constant 0 : i32
    %c0_i32_0 = arith.constant 0 : i32
    %c0_i32_1 = arith.constant 0 : i32
    %c0_i32_2 = arith.constant 0 : i32
    return %c0_i32, %c0_i32_0, %c0_i32_1 : i32, i32, i32
  }
  func.func @transform_6(%arg0: i32) -> (i32, i32, i32) {
    %c0_i32 = arith.constant 0 : i32
    %c0_i32_0 = arith.constant 0 : i32
    %c0_i32_1 = arith.constant 0 : i32
    %c0_i32_2 = arith.constant 0 : i32
    return %c0_i32, %c0_i32_0, %c0_i32_1 : i32, i32, i32
  }
  func.func @transform_7(%arg0: i32) -> (i32, i32, i32) {
    %c0_i32 = arith.constant 0 : i32
    %c0_i32_0 = arith.constant 0 : i32
    %c0_i32_1 = arith.constant 0 : i32
    %c0_i32_2 = arith.constant 0 : i32
    return %c0_i32, %c0_i32_0, %c0_i32_1 : i32, i32, i32
  }
  func.func @transform_8(%arg0: i32) -> (i32, i32, i32) {
    %c0_i32 = arith.constant 0 : i32
    %c0_i32_0 = arith.constant 0 : i32
    %c0_i32_1 = arith.constant 0 : i32
    %c0_i32_2 = arith.constant 0 : i32
    return %c0_i32, %c0_i32_0, %c0_i32_1 : i32, i32, i32
  }
  func.func @transform_9(%arg0: i32) -> (i32, i32, i32) {
    %c0_i32 = arith.constant 0 : i32
    %c0_i32_0 = arith.constant 0 : i32
    %c0_i32_1 = arith.constant 0 : i32
    %c0_i32_2 = arith.constant 0 : i32
    return %c0_i32, %c0_i32_0, %c0_i32_1 : i32, i32, i32
  }
  func.func @transform_10(%arg0: i32) -> (i32, i32) {
    %c0_i32 = arith.constant 0 : i32
    %c0_i32_0 = arith.constant 0 : i32
    %c0_i32_1 = arith.constant 0 : i32
    return %c0_i32, %c0_i32_0 : i32, i32
  }
  func.func @transform_11(%arg0: i32) -> (i32, i32) {
    %c0_i32 = arith.constant 0 : i32
    %c0_i32_0 = arith.constant 0 : i32
    %c0_i32_1 = arith.constant 0 : i32
    return %c0_i32, %c0_i32_0 : i32, i32
  }
  func.func @transform_12(%arg0: i32) -> (i32, i32, i32) {
    %c0_i32 = arith.constant 0 : i32
    %c0_i32_0 = arith.constant 0 : i32
    %c0_i32_1 = arith.constant 0 : i32
    return %arg0, %c0_i32, %c0_i32_0 : i32, i32, i32
  }
}

</mosaic_0001>

<bundles_post_ra>
// kernel: tpu_custom_call.1
= control target key start
LH: loop header
LB: loop body
LE: loop exit
PB: predicated region body
PF: predicated region fallthrough
CT: control target
= control target key end

     0   :  { %17 = vsyncpa [#allocation4], 0  ;;  %s10118_s0 = inlined_call_operand.vmem [shape: f32[1,16,512], index: 0, kind: input, shape index: {}]   ;;  %s10119_s1 = inlined_call_operand.hbm [shape: f32[9,512], index: 1, kind: input, shape index: {}]   ;;  %s10120_s2 = inlined_call_operand.vmem [shape: f32[2,32,144], index: 2, kind: input, shape index: {}]   ;;  %s10121_s3 = inlined_call_operand.vmem [shape: f32[2,32,1], index: 3, kind: input, shape index: {}]   ;;  %s10122_s4 = inlined_call_operand.hbm [shape: f32[2,16,288], index: 4, kind: input, shape index: {}]   ;;  %s10123_s5 = inlined_call_operand.vmem [shape: f32[2,16,1], index: 5, kind: input, shape index: {}]   ;;  %s10124_s6 = inlined_call_operand.hbm [shape: f32[2,4,16], index: 6, kind: input, shape index: {}]   ;;  %s10125_s7 = inlined_call_operand.vmem [shape: f32[2,4,1], index: 7, kind: input, shape index: {}]   ;;  %s10126_s8 = inlined_call_operand.vmem [shape: f32[2,16,4], index: 8, kind: input, shape index: {}]   ;;  %s10127_s9 = inlined_call_operand.vmem [shape: f32[2,16,1], index: 9, kind: input, shape index: {}]   ;;  %s10128_s10 = inlined_call_operand.vmem [shape: f32[16,144], index: 10, kind: input, shape index: {}]   ;;  %s10129_s11 = inlined_call_operand.vmem [shape: f32[16,1], index: 11, kind: input, shape index: {}]   ;;  %s10130_s12 = inlined_call_operand.hbm [shape: f32[1,16,512], index: 12, kind: output, shape index: {}]  }
   0x1   :  { %18 = vsyncpa [#allocation7], 0 }
   0x2   :  { %19 = vsyncpa [#allocation5], 0  ;;  %s5750_s21 = smov [#allocation6]   ;;  %s5656_s25 = scalar_lea.hbm %s10122_s4, 1536 }
   0x3   :  { %s43_s22 = sshll.u32 %s5750_s21, 4  ;;  %p5657_p0 = scmp.ne.s32.totalorder %s10122_s4, %s5656_s25  ;;  %s44_s22 = int_to_ptr.vmem [resolvable:$true] %s43_s22 }
   0x4   :  { %p5660_p1 = scmp.lt.u32.totalorder %s5656_s25, %s10122_s4 }
   0x6   :  { %p5662_p2 = pnand %p5660_p1, %p5657_p0 }
   0x8   :  { %5665 = shalt.err (!%p5662_p2)
}
   0x9   :  { %s5666_s30 = scalar_lea.vmem %s44_s22, 1536  ;;  %p5671_p4 = scmp.lt.s32.totalorder %s44_s22, %s44_s22 }
   0xa   :  { %p5667_p3 = scmp.ne.s32.totalorder %s44_s22, %s5666_s30  ;;  %p5672_p5 = scmp.lt.s32.totalorder %s5666_s30, %s5666_s30 }
   0xc   :  { %p5673_p6 = por %p5672_p5, %p5671_p4 }
   0xe   :  { %p5674_p7 = pnand %p5673_p6, %p5667_p3 }
  0x10   :  { %5677 = shalt.err (!%p5674_p7)
}
  0x11   :  { %s5751_s13 = smov 384   ;;  %s5752_s14 = smov 24  }
  0x12   :  { %49 = dma.hbm_to_vmem [thread:$0]  %s10122_s4, 1536, %s44_s22, [#allocation7], %s5751_s13, %s5751_s13, %s5752_s14  }
  0x13   :  { %s5753_s17 = smov [#allocation3]   ;;  %s5678_s21 = scalar_lea.hbm %s10119_s1, 1024 }
  0x14   :  { %s27_s18 = sshll.u32 %s5753_s17, 4  ;;  %p5679_p8 = scmp.ne.s32.totalorder %s10119_s1, %s5678_s21  ;;  %s28_s18 = int_to_ptr.vmem [resolvable:$true] %s27_s18 }
  0x15   :  { %p5682_p9 = scmp.lt.u32.totalorder %s5678_s21, %s10119_s1 }
  0x17   :  { %p5684_p10 = pnand %p5682_p9, %p5679_p8 }
  0x19   :  { %5687 = shalt.err (!%p5684_p10)
}
  0x1a   :  { %s5688_s27 = scalar_lea.vmem %s28_s18, 1024  ;;  %p5693_p12 = scmp.lt.s32.totalorder %s28_s18, %s28_s18 }
  0x1b   :  { %p5689_p11 = scmp.ne.s32.totalorder %s28_s18, %s5688_s27  ;;  %p5694_p13 = scmp.lt.s32.totalorder %s5688_s27, %s5688_s27 }
  0x1d   :  { %p5695_p0 = por %p5694_p13, %p5693_p12 }
  0x1f   :  { %p5696_p1 = pnand %p5695_p0, %p5689_p11 }
  0x21   :  { %5699 = shalt.err (!%p5696_p1)
}
  0x22   :  { %s5754_s4 = smov 512   ;;  %s5755_s22 = smov 32  }
  0x23   :  { %33 = dma.hbm_to_vmem [thread:$0]  %s10119_s1, 1024, %s28_s18, [#allocation4], %s5754_s4, %s5754_s4, %s5755_s22  }
  0x24   :  { %s5756_s30 = smov [#allocation8]   ;;  %s5700_s16 = scalar_lea.hbm %s10124_s6, 128 }
  0x25   :  { %s57_s13 = sshll.u32 %s5756_s30, 4  ;;  %p5701_p2 = scmp.ne.s32.totalorder %s10124_s6, %s5700_s16  ;;  %s58_s13 = int_to_ptr.vmem [resolvable:$true] %s57_s13 }
  0x26   :  { %p5704_p3 = scmp.lt.u32.totalorder %s5700_s16, %s10124_s6 }
  0x28   :  { %p5706_p4 = pnand %p5704_p3, %p5701_p2 }
  0x2a   :  { %5709 = shalt.err (!%p5706_p4)
}
  0x2b   :  { %s5710_s23 = scalar_lea.vmem %s58_s13, 128  ;;  %p5715_p6 = scmp.lt.s32.totalorder %s58_s13, %s58_s13 }
  0x2c   :  { %p5711_p5 = scmp.ne.s32.totalorder %s58_s13, %s5710_s23  ;;  %p5716_p7 = scmp.lt.s32.totalorder %s5710_s23, %s5710_s23 }
  0x2e   :  { %p5717_p8 = por %p5716_p7, %p5715_p6 }
  0x30   :  { %p5718_p9 = pnand %p5717_p8, %p5711_p5 }
  0x32   :  { %5721 = shalt.err (!%p5718_p9)
}
  0x33   :  { %s5757_s1 = smov 64   ;;  %s5758_s18 = smov 4  }
  0x34   :  { %63 = dma.hbm_to_vmem [thread:$0]  %s10124_s6, 128, %s58_s13, [#allocation7], %s5757_s1, %s5757_s1, %s5758_s18  }
  0x35   :  { %5744 = dma.done.wait [#allocation4], 1024  }
  0x36   :  { %5745 = vsyncadd [#allocation4], 4294966272 }
  0x37   :  { %5746 = dma.done.wait [#allocation7], 1664  }
  0x38   :  { %5747 = vsyncadd [#allocation7], 4294965632  ;;  %v5880_v0 = vld [vmem:[%s10118_s0 + $0x8] sm:$0xff]  ;;  %v5885_v1 = vld [vmem:[%s10118_s0] sm:$0xff]  ;;  %s5759_s30 = smov 17   ;;  %s5760_s24 = smov 16   ;;  %v134_v8 = vlaneseq }
  0x39   :  { %122 = vrot.lane.b32.xlu1 %v5880_v0, %s5759_s30  ;;  %118 = vrot.lane.b32.xlu0 %v5885_v1, %s5759_s30  ;;  %v5894_v2 = vld [vmem:[%s10118_s0 + $0x28] sm:$0xff]  ;;  %v5899_v3 = vld [vmem:[%s10118_s0 + $0x20] sm:$0xff]  ;;  %s5761_s25 = smov 15   ;;  %s5762_s26 = smov 1   ;;  %vm716_vm0 = vcmask 130048   ;;  %v10131_v55 = vmov 0  }
  0x3a   :  { %v5908_v4 = vld [vmem:[%s10118_s0 + $0x30] sm:$0xff]  ;;  %v5922_v6 = vld [vmem:[%s10118_s0 + $0x38] sm:$0xff]  ;;  %s5763_s27 = smov 127   ;;  %s5764_s28 = smov 113   ;;  %v147_v9 = vshrl.u32 %v134_v8, 7  ;;  %v6029_v10 = vand.u32 127, %v134_v8  ;;  %5615 = vset.pattern.permute.xlu1 %v10131_v55  ;;  %5614 = vset.pattern.permute.xlu0 %v10131_v55 }
  0x3b   :  { %v5913_v5 = vld [vmem:[%s10118_s0 + $0x10] sm:$0xff]  ;;  %v5927_v7 = vld [vmem:[%s10118_s0 + $0x18] sm:$0xff]  ;;  %s5765_s29 = smov 112   ;;  %s5766_s6 = smov 111   ;;  %v107_v13 = vld [vmem:[%s10120_s2 + $0x8] sm:$0xff]  ;;  %vm1741_vm9 = vcmask 261120  }
  0x3c   :  { %v6035_v11 = vsub.s32 1, %v147_v9  ;;  %v83_v12 = vld [vmem:[#allocation3] ss:$8 sm:$0xf]  ;;  %vm136_vm1 = vcmp.lt.s32.totalorder %v6029_v10, 17  ;;  %4954 = vmatprep.mubr.msk.f32.mxu0 %vm716_vm0, %v107_v13  ;;  %4958 = vmatprep.mubr.msk.f32.mxu1 %vm716_vm0, %v107_v13  ;;  %v6052_v20 = vsub.s32 2, %v147_v9 }
  0x3d   :  { %124 = vrot.lane.b32.xlu1 %v5894_v2, %s5759_s30  ;;  %120 = vrot.lane.b32.xlu0 %v5899_v3, %s5759_s30  ;;  %v6062_v24 = vsub.s32 0, %v147_v9  ;;  %v6064_v25 = vsub.s32 3, %v147_v9  ;;  %v85_v46 = vld [vmem:[#allocation3 + $0x1] ss:$8 sm:$0xf]  ;;  %vm198_vm2 = vcmp.lt.s32.totalorder %v6029_v10, 16 }
  0x3e   :  { %v6048_v16 = vrot.slane %v83_v12, %v6035_v11  ;;  %v6067_v29 = vrot.slane %v83_v12, %v6052_v20  ;;  %v6099_v52 = vrot.slane %v85_v46, %v6035_v11  ;;  %v115_v53 = vld [vmem:[%s10121_s3 + $0x8] sm:$0xff]  ;;  %v114_v54 = vld [vmem:[%s10121_s3] sm:$0xff]  ;;  %v116_v60 = vld [vmem:[%s10121_s3 + $0x10] sm:$0xff]  ;;  %v6122_v9 = vrot.slane %v85_v46, %v6052_v20  ;;  %s5772_s17 = smov [#allocation9]  }
  0x3f   :  { %v6078_v32 = vrot.slane %v83_v12, %v6062_v24  ;;  %v6081_v33 = vrot.slane %v83_v12, %v6064_v25  ;;  %v117_v63 = vld [vmem:[%s10121_s3 + $0x18] sm:$0xff]  ;;  %vm260_vm3 = vcmp.lt.s32.totalorder %v6029_v10, 15  ;;  %vm322_vm4 = vcmp.lt.s32.totalorder %v6029_v10, 1  ;;  %s4941_s19 = sshll.u32 %s5772_s17, 4  ;;  %s4942_s19 = int_to_ptr.vmem [resolvable:$true] %s4941_s19 }
  0x40   :  { %10354 = vst [vmem:[#allocation13_spill] sm:$0xff] %v6048_v16  ;;  %10355 = vst [vmem:[#allocation14_spill] sm:$0xff] %v6067_v29  ;;  %vm392_vm5 = vcmp.lt.s32.totalorder %v6029_v10, 127  ;;  %vm454_vm6 = vcmp.lt.s32.totalorder %v6029_v10, 113  ;;  %vm516_vm7 = vcmp.lt.s32.totalorder %v6029_v10, 112  ;;  %vm578_vm8 = vcmp.lt.s32.totalorder %v6029_v10, 111  ;;  %p5727_p11 = scmp.lt.s32.totalorder %s4942_s19, %s4942_s19 }
  0x41   :  { %128 = vrot.lane.b32.xlu1 %v5908_v4, %s5759_s30  ;;  %126 = vrot.lane.b32.xlu0 %v5913_v5, %s5759_s30  ;;  %10356 = vst [vmem:[#allocation15_spill] sm:$0xff] %v6078_v32  ;;  %10357 = vst [vmem:[#allocation16_spill] sm:$0xff] %v6081_v33  ;;  %vm5770_vm10 = vmmov 0   ;;  %vm2073_vm11 = vcmask 7168   ;;  %vm2171_vm12 = vcmask 31744   ;;  %vm2178_vm13 = vcmask 1043456  }
  0x42   :  { %10358 = vst [vmem:[#allocation17_spill] sm:$0xff] %v6099_v52  ;;  %v4344_v10 = vld [vmem:[%s10128_s10] sm:$0xff] }
  0x45   :  { %132 = vrot.lane.b32.xlu1 %v5922_v6, %s5759_s30  ;;  %130 = vrot.lane.b32.xlu0 %v5927_v7, %s5759_s30 }
  0x49   :  { %184 = vrot.lane.b32.xlu1 %v5899_v3, %s5760_s24  ;;  %182 = vrot.lane.b32.xlu0 %v5885_v1, %s5760_s24 }
  0x4d   :  { %188 = vrot.lane.b32.xlu1 %v5894_v2, %s5760_s24  ;;  %186 = vrot.lane.b32.xlu0 %v5880_v0, %s5760_s24 }
  0x51   :  { %192 = vrot.lane.b32.xlu1 %v5908_v4, %s5760_s24  ;;  %190 = vrot.lane.b32.xlu0 %v5913_v5, %s5760_s24 }
  0x55   :  { %196 = vrot.lane.b32.xlu1 %v5922_v6, %s5760_s24  ;;  %194 = vrot.lane.b32.xlu0 %v5927_v7, %s5760_s24 }
  0x59   :  { %246 = vrot.lane.b32.xlu1 %v5899_v3, %s5761_s25  ;;  %244 = vrot.lane.b32.xlu0 %v5885_v1, %s5761_s25 }
  0x5d   :  { %250 = vrot.lane.b32.xlu1 %v5894_v2, %s5761_s25  ;;  %248 = vrot.lane.b32.xlu0 %v5880_v0, %s5761_s25 }
  0x61   :  { %254 = vrot.lane.b32.xlu1 %v5908_v4, %s5761_s25  ;;  %252 = vrot.lane.b32.xlu0 %v5913_v5, %s5761_s25 }
  0x65   :  { %258 = vrot.lane.b32.xlu1 %v5922_v6, %s5761_s25  ;;  %256 = vrot.lane.b32.xlu0 %v5927_v7, %s5761_s25 }
  0x69   :  { %308 = vrot.lane.b32.xlu1 %v5899_v3, %s5762_s26  ;;  %306 = vrot.lane.b32.xlu0 %v5885_v1, %s5762_s26 }
  0x6d   :  { %312 = vrot.lane.b32.xlu1 %v5894_v2, %s5762_s26  ;;  %310 = vrot.lane.b32.xlu0 %v5880_v0, %s5762_s26 }
  0x71   :  { %316 = vrot.lane.b32.xlu1 %v5908_v4, %s5762_s26  ;;  %314 = vrot.lane.b32.xlu0 %v5913_v5, %s5762_s26 }
  0x75   :  { %320 = vrot.lane.b32.xlu1 %v5922_v6, %s5762_s26  ;;  %318 = vrot.lane.b32.xlu0 %v5927_v7, %s5762_s26 }
  0x79   :  { %378 = vrot.lane.b32.xlu1 %v5899_v3, %s5763_s27  ;;  %376 = vrot.lane.b32.xlu0 %v5885_v1, %s5763_s27 }
  0x7d   :  { %382 = vrot.lane.b32.xlu1 %v5894_v2, %s5763_s27  ;;  %380 = vrot.lane.b32.xlu0 %v5880_v0, %s5763_s27 }
  0x81   :  { %386 = vrot.lane.b32.xlu1 %v5908_v4, %s5763_s27  ;;  %384 = vrot.lane.b32.xlu0 %v5913_v5, %s5763_s27 }
  0x85   :  { %390 = vrot.lane.b32.xlu1 %v5922_v6, %s5763_s27  ;;  %388 = vrot.lane.b32.xlu0 %v5927_v7, %s5763_s27 }
  0x89   :  { %440 = vrot.lane.b32.xlu1 %v5899_v3, %s5764_s28  ;;  %438 = vrot.lane.b32.xlu0 %v5885_v1, %s5764_s28 }
  0x8d   :  { %444 = vrot.lane.b32.xlu1 %v5894_v2, %s5764_s28  ;;  %442 = vrot.lane.b32.xlu0 %v5880_v0, %s5764_s28 }
  0x91   :  { %448 = vrot.lane.b32.xlu1 %v5908_v4, %s5764_s28  ;;  %446 = vrot.lane.b32.xlu0 %v5913_v5, %s5764_s28 }
  0x95   :  { %452 = vrot.lane.b32.xlu1 %v5922_v6, %s5764_s28  ;;  %450 = vrot.lane.b32.xlu0 %v5927_v7, %s5764_s28 }
  0x99   :  { %502 = vrot.lane.b32.xlu1 %v5899_v3, %s5765_s29  ;;  %500 = vrot.lane.b32.xlu0 %v5885_v1, %s5765_s29 }
  0x9d   :  { %506 = vrot.lane.b32.xlu1 %v5894_v2, %s5765_s29  ;;  %504 = vrot.lane.b32.xlu0 %v5880_v0, %s5765_s29 }
  0xa1   :  { %510 = vrot.lane.b32.xlu1 %v5908_v4, %s5765_s29  ;;  %508 = vrot.lane.b32.xlu0 %v5913_v5, %s5765_s29 }
  0xa5   :  { %514 = vrot.lane.b32.xlu1 %v5922_v6, %s5765_s29  ;;  %512 = vrot.lane.b32.xlu0 %v5927_v7, %s5765_s29 }
  0xa9   :  { %564 = vrot.lane.b32.xlu1 %v5899_v3, %s5766_s6  ;;  %562 = vrot.lane.b32.xlu0 %v5885_v1, %s5766_s6 }
  0xab   :  { %v123_v14 = vpop.permute.xlu1 %122  ;;  %v119_v15 = vpop.permute.xlu0 %118 }
  0xac   :  { %v141_v17 = vsel %vm136_vm1, %v119_v15, %v123_v14 }
  0xad   :  { %568 = vrot.lane.b32.xlu1 %v5894_v2, %s5766_s6  ;;  %566 = vrot.lane.b32.xlu0 %v5880_v0, %s5766_s6  ;;  %v167_v22 = vmul.f32 %v6048_v16, %v141_v17  ;;  %v6129_v17 = vrot.slane %v85_v46, %v6062_v24 }
  0xaf   :  { %v125_v18 = vpop.permute.xlu1 %124  ;;  %v121_v19 = vpop.permute.xlu0 %120 }
  0xb0   :  { %v142_v21 = vsel %vm136_vm1, %v121_v19, %v125_v18 }
  0xb1   :  { %572 = vrot.lane.b32.xlu1 %v5908_v4, %s5766_s6  ;;  %570 = vrot.lane.b32.xlu0 %v5913_v5, %s5766_s6  ;;  %v171_v23 = vmul.f32 %v6048_v16, %v142_v21 }
  0xb3   :  { %v129_v26 = vpop.permute.xlu1 %128  ;;  %v127_v27 = vpop.permute.xlu0 %126  ;;  %v5049_v28 = vpack.c.bf16 %v171_v23, %v167_v22 }
  0xb4   :  { %v140_v30 = vsel %vm136_vm1, %v125_v18, %v129_v26  ;;  %v139_v31 = vsel %vm136_vm1, %v123_v14, %v127_v27  ;;  %v6132_v18 = vrot.slane %v85_v46, %v6064_v25 }
  0xb5   :  { %576 = vrot.lane.b32.xlu1 %v5922_v6, %s5766_s6  ;;  %574 = vrot.lane.b32.xlu0 %v5927_v7, %s5766_s6  ;;  %v168_v36 = vmul.f32 %v6067_v29, %v139_v31  ;;  %v172_v37 = vmul.f32 %v6067_v29, %v140_v30 }
  0xb6   :  { %5050 = vmatprep.subr.bf16.mxu0 %v5049_v28  ;;  %10359 = vst [vmem:[#allocation18_spill] sm:$0xff] %v6132_v18 }
  0xb7   :  { %v133_v34 = vpop.permute.xlu1 %132  ;;  %v131_v35 = vpop.permute.xlu0 %130  ;;  %v5087_v51 = vpack.c.bf16 %v172_v37, %v168_v36  ;;  %v87_v37 = vld [vmem:[#allocation3 + $0x2] ss:$8 sm:$0xf] }
  0xb8   :  { %v144_v38 = vsel %vm136_vm1, %v133_v34, %v121_v19  ;;  %v143_v39 = vsel %vm136_vm1, %v131_v35, %v119_v15  ;;  %v137_v40 = vsel %vm136_vm1, %v127_v27, %v131_v35  ;;  %v138_v41 = vsel %vm136_vm1, %v129_v26, %v133_v34 }
  0xb9   :  { %v166_v42 = vmul.f32 %v6078_v32, %v143_v39  ;;  %v170_v43 = vmul.f32 %v6078_v32, %v144_v38  ;;  %v169_v44 = vmul.f32 %v6081_v33, %v137_v40  ;;  %v173_v45 = vmul.f32 %v6081_v33, %v138_v41  ;;  %703 = vperm.xlu1 %5615, %v115_v53  }
  0xba   :  { %698 = vperm.xlu0 %5614, %v114_v54  }
  0xbb   :  { %v185_v47 = vpop.permute.xlu1 %184  ;;  %v183_v48 = vpop.permute.xlu0 %182  ;;  %v5051_v49 = vpack.c.bf16 %v170_v43, %v166_v42  ;;  %v5085_v50 = vpack.c.bf16 %v173_v45, %v169_v44  ;;  %v6150_v43 = vrot.slane %v87_v37, %v6035_v11 }
  0xbd   :  { %5052 = vmatpush1.bf16.msra.mxu0 %v5051_v49  ;;  %5086 = vmatprep.subr.bf16.mxu1 %v5085_v50 }
  0xbe   :  { %5088 = vmatpush1.bf16.msra.mxu1 %v5087_v51  ;;  %708 = vperm.xlu1 %5615, %v116_v60   ;;  %v6159_v51 = vrot.slane %v87_v37, %v6052_v20 }
  0xbf   :  { %v189_v56 = vpop.permute.xlu1 %188  ;;  %v187_v57 = vpop.permute.xlu0 %186  ;;  %713 = vperm.xlu0 %5614, %v117_v63  }
  0xc0   :  { %v204_v58 = vsel %vm198_vm2, %v185_v47, %v189_v56  ;;  %v203_v59 = vsel %vm198_vm2, %v183_v48, %v187_v57 }
  0xc1   :  { %v233_v61 = vmul.f32 %v6099_v52, %v204_v58  ;;  %v229_v62 = vmul.f32 %v6099_v52, %v203_v59  ;;  %v6166_v58 = vrot.slane %v87_v37, %v6062_v24  ;;  %v6169_v59 = vrot.slane %v87_v37, %v6064_v25 }
  0xc3   :  { %v193_v8 = vpop.permute.xlu1 %192  ;;  %v191_v12 = vpop.permute.xlu0 %190  ;;  %v5053_v13 = vpack.c.bf16 %v233_v61, %v229_v62 }
  0xc4   :  { %v202_v14 = vsel %vm198_vm2, %v189_v56, %v193_v8  ;;  %v201_v15 = vsel %vm198_vm2, %v187_v57, %v191_v12 }
  0xc5   :  { %5054 = vmatprep.subr.bf16.mxu0 %v5053_v13  ;;  %v234_v19 = vmul.f32 %v6122_v9, %v202_v14  ;;  %v230_v21 = vmul.f32 %v6122_v9, %v201_v15 }
  0xc7   :  { %v197_v22 = vpop.permute.xlu1 %196  ;;  %v195_v23 = vpop.permute.xlu0 %194  ;;  %v5091_v42 = vpack.c.bf16 %v234_v19, %v230_v21 }
  0xc8   :  { %v200_v26 = vsel %vm198_vm2, %v193_v8, %v197_v22  ;;  %v206_v27 = vsel %vm198_vm2, %v197_v22, %v185_v47  ;;  %v199_v28 = vsel %vm198_vm2, %v191_v12, %v195_v23  ;;  %v205_v30 = vsel %vm198_vm2, %v195_v23, %v183_v48  ;;  %v89_v23 = vld [vmem:[#allocation3 + $0x3] ss:$8 sm:$0xf] }
  0xc9   :  { %v232_v31 = vmul.f32 %v6129_v17, %v206_v27  ;;  %v235_v34 = vmul.f32 %v6132_v18, %v200_v26  ;;  %v228_v35 = vmul.f32 %v6129_v17, %v205_v30  ;;  %v231_v36 = vmul.f32 %v6132_v18, %v199_v28 }
  0xcb   :  { %v247_v38 = vpop.permute.xlu1 %246  ;;  %v245_v39 = vpop.permute.xlu0 %244  ;;  %v5055_v40 = vpack.c.bf16 %v232_v31, %v228_v35  ;;  %v5089_v41 = vpack.c.bf16 %v235_v34, %v231_v36  ;;  %v6187_v34 = vrot.slane %v89_v23, %v6035_v11 }
  0xcd   :  { %5056 = vmatpush1.bf16.msra.mxu0 %v5055_v40  ;;  %5090 = vmatprep.subr.bf16.mxu1 %v5089_v41  ;;  %10360 = vst [vmem:[#allocation19_spill] sm:$0xff] %v6187_v34 }
  0xce   :  { %5092 = vmatpush1.bf16.msra.mxu1 %v5091_v42  ;;  %v6196_v42 = vrot.slane %v89_v23, %v6052_v20 }
  0xcf   :  { %v251_v44 = vpop.permute.xlu1 %250  ;;  %v249_v45 = vpop.permute.xlu0 %248 }
  0xd0   :  { %v266_v46 = vsel %vm260_vm3, %v247_v38, %v251_v44  ;;  %v265_v47 = vsel %vm260_vm3, %v245_v39, %v249_v45  ;;  %10361 = vst [vmem:[#allocation20_spill] sm:$0xff] %v6196_v42 }
  0xd1   :  { %v295_v48 = vmul.f32 %v6150_v43, %v266_v46  ;;  %v291_v49 = vmul.f32 %v6150_v43, %v265_v47 }
  0xd3   :  { %v255_v50 = vpop.permute.xlu1 %254  ;;  %v253_v53 = vpop.permute.xlu0 %252  ;;  %v5057_v54 = vpack.c.bf16 %v295_v48, %v291_v49  ;;  %v6203_v48 = vrot.slane %v89_v23, %v6062_v24  ;;  %v6206_v49 = vrot.slane %v89_v23, %v6064_v25  ;;  %v5101_v23 = vpack.c.bf16 %v5922_v6, %v5927_v7 }
  0xd4   :  { %v264_v56 = vsel %vm260_vm3, %v251_v44, %v255_v50  ;;  %v263_v57 = vsel %vm260_vm3, %v249_v45, %v253_v53 }
  0xd5   :  { %5058 = vmatprep.subr.bf16.mxu0 %v5057_v54  ;;  %v296_v60 = vmul.f32 %v6159_v51, %v264_v56  ;;  %v292_v61 = vmul.f32 %v6159_v51, %v263_v57  ;;  %10362 = vst [vmem:[#allocation21_spill] sm:$0xff] %v6203_v48  ;;  %10363 = vst [vmem:[#allocation22_spill] sm:$0xff] %v6206_v49 }
  0xd7   :  { %v259_v62 = vpop.permute.xlu1 %258  ;;  %v257_v63 = vpop.permute.xlu0 %256  ;;  %v5095_v31 = vpack.c.bf16 %v296_v60, %v292_v61 }
  0xd8   :  { %v262_v8 = vsel %vm260_vm3, %v255_v50, %v259_v62  ;;  %v268_v12 = vsel %vm260_vm3, %v259_v62, %v247_v38  ;;  %v261_v13 = vsel %vm260_vm3, %v253_v53, %v257_v63  ;;  %v267_v14 = vsel %vm260_vm3, %v257_v63, %v245_v39 }
  0xd9   :  { %v294_v15 = vmul.f32 %v6166_v58, %v268_v12  ;;  %v297_v19 = vmul.f32 %v6169_v59, %v262_v8  ;;  %v290_v21 = vmul.f32 %v6166_v58, %v267_v14  ;;  %v293_v22 = vmul.f32 %v6169_v59, %v261_v13 }
  0xda   :  { %v5065_v14 = vpack.c.bf16 %v5894_v2, %v5880_v0  ;;  %v5103_v0 = vpack.c.bf16 %v5908_v4, %v5913_v5 }
  0xdb   :  { %v309_v26 = vpop.permute.xlu1 %308  ;;  %v307_v27 = vpop.permute.xlu0 %306  ;;  %v5059_v28 = vpack.c.bf16 %v294_v15, %v290_v21  ;;  %v5093_v30 = vpack.c.bf16 %v297_v19, %v293_v22 }
  0xdd   :  { %5060 = vmatpush1.bf16.msra.mxu0 %v5059_v28  ;;  %5094 = vmatprep.subr.bf16.mxu1 %v5093_v30  ;;  %v5067_v28 = vpack.c.bf16 %v5899_v3, %v5885_v1 }
  0xde   :  { %5096 = vmatpush1.bf16.msra.mxu1 %v5095_v31 }
  0xdf   :  { %v313_v35 = vpop.permute.xlu1 %312  ;;  %v311_v36 = vpop.permute.xlu0 %310 }
  0xe0   :  { %v328_v37 = vsel %vm322_vm4, %v309_v26, %v313_v35  ;;  %v327_v38 = vsel %vm322_vm4, %v307_v27, %v311_v36 }
  0xe1   :  { %v357_v39 = vmul.f32 %v6187_v34, %v328_v37  ;;  %v353_v40 = vmul.f32 %v6187_v34, %v327_v38 }
  0xe3   :  { %v317_v41 = vpop.permute.xlu1 %316  ;;  %v315_v44 = vpop.permute.xlu0 %314  ;;  %v5061_v45 = vpack.c.bf16 %v357_v39, %v353_v40 }
  0xe4   :  { %v326_v46 = vsel %vm322_vm4, %v313_v35, %v317_v41  ;;  %v325_v47 = vsel %vm322_vm4, %v311_v36, %v315_v44 }
  0xe5   :  { %5062 = vmatprep.subr.bf16.mxu0 %v5061_v45  ;;  %v358_v50 = vmul.f32 %v6196_v42, %v326_v46  ;;  %v354_v53 = vmul.f32 %v6196_v42, %v325_v47 }
  0xe7   :  { %v321_v54 = vpop.permute.xlu1 %320  ;;  %v319_v56 = vpop.permute.xlu0 %318 }
  0xe8   :  { %v324_v57 = vsel %vm322_vm4, %v317_v41, %v321_v54  ;;  %v330_v60 = vsel %vm322_vm4, %v321_v54, %v309_v26  ;;  %v323_v61 = vsel %vm322_vm4, %v315_v44, %v319_v56  ;;  %v329_v62 = vsel %vm322_vm4, %v319_v56, %v307_v27  ;;  %v91_v27 = vld [vmem:[#allocation3 + $0x5] ss:$8 sm:$0xf] }
  0xe9   :  { %v356_v63 = vmul.f32 %v6203_v48, %v330_v60  ;;  %v359_v8 = vmul.f32 %v6206_v49, %v324_v57  ;;  %v352_v12 = vmul.f32 %v6203_v48, %v329_v62  ;;  %v355_v13 = vmul.f32 %v6206_v49, %v323_v61 }
  0xea   :  { %v5099_v26 = vpack.c.bf16 %v358_v50, %v354_v53  ;;  %v6232_v30 = vrot.slane %v91_v27, %v6062_v24  ;;  %v6239_v35 = vrot.slane %v91_v27, %v6035_v11  ;;  %v6250_v40 = vrot.slane %v91_v27, %v6052_v20 }
  0xeb   :  { %v379_v15 = vpop.permute.xlu1 %378  ;;  %v377_v19 = vpop.permute.xlu0 %376  ;;  %v5063_v21 = vpack.c.bf16 %v356_v63, %v352_v12  ;;  %v5097_v22 = vpack.c.bf16 %v359_v8, %v355_v13  ;;  %v6253_v41 = vrot.slane %v91_v27, %v6064_v25 }
  0xec   :  { %10364 = vst [vmem:[#allocation23_spill] sm:$0xff] %v6232_v30  ;;  %10365 = vst [vmem:[#allocation24_spill] sm:$0xff] %v6239_v35 }
  0xed   :  { %5064 = vmatpush1.bf16.msra.mxu0 %v5063_v21  ;;  %5098 = vmatprep.subr.bf16.mxu1 %v5097_v22  ;;  %10366 = vst [vmem:[#allocation25_spill] sm:$0xff] %v6250_v40  ;;  %10367 = vst [vmem:[#allocation26_spill] sm:$0xff] %v6253_v41 }
  0xee   :  { %5100 = vmatpush1.bf16.msra.mxu1 %v5099_v26  ;;  %5066 = vmatprep.subr.bf16.mxu0 %v5065_v14  ;;  %v93_v14 = vld [vmem:[#allocation3 + $0x6] ss:$8 sm:$0xf] }
  0xef   :  { %v383_v2 = vpop.permute.xlu1 %382  ;;  %v381_v31 = vpop.permute.xlu0 %380  ;;  %5102 = vmatprep.subr.bf16.mxu1 %v5101_v23  ;;  %v6276_v26 = vrot.slane %v93_v14, %v6035_v11 }
  0xf0   :  { %v398_v6 = vsel %vm392_vm5, %v379_v15, %v383_v2  ;;  %v397_v7 = vsel %vm392_vm5, %v377_v19, %v381_v31 }
  0xf1   :  { %5068 = vmatpush1.bf16.msra.mxu0 %v5067_v28  ;;  %v426_v1 = vmul.f32 %v6232_v30, %v398_v6  ;;  %v422_v3 = vmul.f32 %v6232_v30, %v397_v7  ;;  %10369 = vst [vmem:[#allocation28_spill] sm:$0xff] %v6276_v26  ;;  %v929_v30 = vld [vmem:[%s10123_s5] sm:$0xff] }
  0xf2   :  { %5104 = vmatpush1.bf16.msra.mxu1 %v5103_v0 }
  0xf3   :  { %v387_v4 = vpop.permute.xlu1 %386  ;;  %v385_v5 = vpop.permute.xlu0 %384  ;;  %v5071_v47 = vpack.c.bf16 %v426_v1, %v422_v3  ;;  %v6287_v3 = vrot.slane %v93_v14, %v6052_v20 }
  0xf4   :  { %v396_v36 = vsel %vm392_vm5, %v383_v2, %v387_v4  ;;  %v395_v37 = vsel %vm392_vm5, %v381_v31, %v385_v5 }
  0xf5   :  { %v427_v38 = vmul.f32 %v6239_v35, %v396_v36  ;;  %v423_v39 = vmul.f32 %v6239_v35, %v395_v37  ;;  %10370 = vst [vmem:[#allocation29_spill] sm:$0xff] %v6287_v3 }
  0xf7   :  { %v391_v44 = vpop.permute.xlu1 %390  ;;  %v389_v45 = vpop.permute.xlu0 %388  ;;  %v5069_v46 = vpack.c.bf16 %v427_v38, %v423_v39 }
  0xf8   :  { %v394_v50 = vsel %vm392_vm5, %v387_v4, %v391_v44  ;;  %v400_v53 = vsel %vm392_vm5, %v391_v44, %v379_v15  ;;  %v393_v54 = vsel %vm392_vm5, %v385_v5, %v389_v45  ;;  %v399_v56 = vsel %vm392_vm5, %v389_v45, %v377_v19 }
  0xf9   :  { %v428_v57 = vmul.f32 %v6250_v40, %v394_v50  ;;  %v429_v60 = vmul.f32 %v6253_v41, %v400_v53  ;;  %v424_v61 = vmul.f32 %v6250_v40, %v393_v54  ;;  %v425_v62 = vmul.f32 %v6253_v41, %v399_v56  ;;  %5070 = vmatprep.subr.bf16.mxu0 %v5069_v46 }
  0xfa   :  { %5072 = vmatpush1.bf16.msra.mxu0 %v5071_v47  ;;  %v6269_v19 = vrot.slane %v93_v14, %v6062_v24  ;;  %v6290_v4 = vrot.slane %v93_v14, %v6064_v25 }
  0xfb   :  { %v441_v63 = vpop.permute.xlu1 %440  ;;  %v439_v8 = vpop.permute.xlu0 %438  ;;  %v5105_v12 = vpack.c.bf16 %v429_v60, %v425_v62  ;;  %v5107_v13 = vpack.c.bf16 %v428_v57, %v424_v61  ;;  %v95_v62 = vld [vmem:[#allocation3 + $0x7] ss:$8 sm:$0xf] }
  0xfc   :  { %10368 = vst [vmem:[#allocation27_spill] sm:$0xff] %v6269_v19  ;;  %10371 = vst [vmem:[#allocation30_spill] sm:$0xff] %v6290_v4 }
  0xfd   :  { %5106 = vmatprep.subr.bf16.mxu1 %v5105_v12 }
  0xfe   :  { %5108 = vmatpush1.bf16.msra.mxu1 %v5107_v13 }
  0xff   :  { %v445_v15 = vpop.permute.xlu1 %444  ;;  %v443_v21 = vpop.permute.xlu0 %442 }
 0x100   :  { %v460_v22 = vsel %vm454_vm6, %v441_v63, %v445_v15  ;;  %v459_v23 = vsel %vm454_vm6, %v439_v8, %v443_v21 }
 0x101   :  { %v488_v27 = vmul.f32 %v6269_v19, %v460_v22  ;;  %v484_v28 = vmul.f32 %v6269_v19, %v459_v23 }
 0x103   :  { %v449_v0 = vpop.permute.xlu1 %448  ;;  %v447_v2 = vpop.permute.xlu0 %446  ;;  %v5075_v38 = vpack.c.bf16 %v488_v27, %v484_v28 }
 0x104   :  { %v458_v31 = vsel %vm454_vm6, %v445_v15, %v449_v0  ;;  %v457_v6 = vsel %vm454_vm6, %v443_v21, %v447_v2  ;;  %v6313_v15 = vrot.slane %v95_v62, %v6035_v11 }
 0x105   :  { %v489_v7 = vmul.f32 %v6276_v26, %v458_v31  ;;  %v485_v1 = vmul.f32 %v6276_v26, %v457_v6  ;;  %v6324_v6 = vrot.slane %v95_v62, %v6052_v20 }
 0x106   :  { %10373 = vst [vmem:[#allocation32_spill] sm:$0xff] %v6313_v15 }
 0x107   :  { %v453_v5 = vpop.permute.xlu1 %452  ;;  %v451_v36 = vpop.permute.xlu0 %450  ;;  %v5073_v37 = vpack.c.bf16 %v489_v7, %v485_v1  ;;  %10374 = vst [vmem:[#allocation33_spill] sm:$0xff] %v6324_v6  ;;  %v6327_v7 = vrot.slane %v95_v62, %v6064_v25 }
 0x108   :  { %v456_v39 = vsel %vm454_vm6, %v449_v0, %v453_v5  ;;  %v462_v44 = vsel %vm454_vm6, %v453_v5, %v441_v63  ;;  %v455_v45 = vsel %vm454_vm6, %v447_v2, %v451_v36  ;;  %v461_v46 = vsel %vm454_vm6, %v451_v36, %v439_v8 }
 0x109   :  { %v490_v47 = vmul.f32 %v6287_v3, %v456_v39  ;;  %v491_v50 = vmul.f32 %v6290_v4, %v462_v44  ;;  %v486_v53 = vmul.f32 %v6287_v3, %v455_v45  ;;  %v487_v54 = vmul.f32 %v6290_v4, %v461_v46  ;;  %5074 = vmatprep.subr.bf16.mxu0 %v5073_v37 }
 0x10a   :  { %5076 = vmatpush1.bf16.msra.mxu0 %v5075_v38  ;;  %v6306_v8 = vrot.slane %v95_v62, %v6062_v24  ;;  %10375 = vst [vmem:[#allocation34_spill] sm:$0xff] %v6327_v7  ;;  %v97_v62 = vld [vmem:[#allocation3 + $0x20] ss:$8 sm:$0xf] }
 0x10b   :  { %v503_v56 = vpop.permute.xlu1 %502  ;;  %v501_v57 = vpop.permute.xlu0 %500  ;;  %v5109_v60 = vpack.c.bf16 %v491_v50, %v487_v54  ;;  %v5111_v61 = vpack.c.bf16 %v490_v47, %v486_v53 }
 0x10c   :  { %10372 = vst [vmem:[#allocation31_spill] sm:$0xff] %v6306_v8 }
 0x10d   :  { %5110 = vmatprep.subr.bf16.mxu1 %v5109_v60 }
 0x10e   :  { %5112 = vmatpush1.bf16.msra.mxu1 %v5111_v61 }
 0x10f   :  { %v507_v63 = vpop.permute.xlu1 %506  ;;  %v505_v12 = vpop.permute.xlu0 %504 }
 0x110   :  { %v522_v13 = vsel %vm516_vm7, %v503_v56, %v507_v63  ;;  %v521_v14 = vsel %vm516_vm7, %v501_v57, %v505_v12 }
 0x111   :  { %v550_v21 = vmul.f32 %v6306_v8, %v522_v13  ;;  %v546_v22 = vmul.f32 %v6306_v8, %v521_v14 }
 0x113   :  { %v511_v23 = vpop.permute.xlu1 %510  ;;  %v509_v27 = vpop.permute.xlu0 %508  ;;  %v5079_v37 = vpack.c.bf16 %v550_v21, %v546_v22  ;;  %v6350_v21 = vrot.slane %v97_v62, %v6035_v11  ;;  %v6364_v11 = vrot.slane %v97_v62, %v6064_v25 }
 0x114   :  { %v520_v28 = vsel %vm516_vm7, %v507_v63, %v511_v23  ;;  %v519_v0 = vsel %vm516_vm7, %v505_v12, %v509_v27  ;;  %v6343_v63 = vrot.slane %v97_v62, %v6062_v24 }
 0x115   :  { %v551_v2 = vmul.f32 %v6313_v15, %v520_v28  ;;  %v547_v31 = vmul.f32 %v6313_v15, %v519_v0  ;;  %10377 = vst [vmem:[#allocation36_spill] sm:$0xff] %v6350_v21  ;;  %10379 = vst [vmem:[#allocation38_spill] sm:$0xff] %v6364_v11 }
 0x116   :  { %10376 = vst [vmem:[#allocation35_spill] sm:$0xff] %v6343_v63 }
 0x117   :  { %v515_v1 = vpop.permute.xlu1 %514  ;;  %v513_v5 = vpop.permute.xlu0 %512  ;;  %v5077_v36 = vpack.c.bf16 %v551_v2, %v547_v31 }
 0x118   :  { %v518_v38 = vsel %vm516_vm7, %v511_v23, %v515_v1  ;;  %v524_v39 = vsel %vm516_vm7, %v515_v1, %v503_v56  ;;  %v517_v44 = vsel %vm516_vm7, %v509_v27, %v513_v5  ;;  %v523_v45 = vsel %vm516_vm7, %v513_v5, %v501_v57 }
 0x119   :  { %v552_v46 = vmul.f32 %v6324_v6, %v518_v38  ;;  %v553_v47 = vmul.f32 %v6327_v7, %v524_v39  ;;  %v548_v50 = vmul.f32 %v6324_v6, %v517_v44  ;;  %v549_v53 = vmul.f32 %v6327_v7, %v523_v45  ;;  %5078 = vmatprep.subr.bf16.mxu0 %v5077_v36 }
 0x11a   :  { %5080 = vmatpush1.bf16.msra.mxu0 %v5079_v37  ;;  %v6361_v1 = vrot.slane %v97_v62, %v6052_v20  ;;  %v111_v62 = vld [vmem:[%s10120_s2 + $0x28] sm:$0xff] }
 0x11b   :  { %v565_v54 = vpop.permute.xlu1 %564  ;;  %v563_v60 = vpop.permute.xlu0 %562  ;;  %v5113_v61 = vpack.c.bf16 %v553_v47, %v549_v53  ;;  %v5115_v56 = vpack.c.bf16 %v552_v46, %v548_v50  ;;  %v106_v53 = vld [vmem:[%s10120_s2] sm:$0xff] }
 0x11c   :  { %10378 = vst [vmem:[#allocation37_spill] sm:$0xff] %v6361_v1 }
 0x11d   :  { %5114 = vmatprep.subr.bf16.mxu1 %v5113_v61 }
 0x11e   :  { %5116 = vmatpush1.bf16.msra.mxu1 %v5115_v56  ;;  %v108_v56 = vld [vmem:[%s10120_s2 + $0x10] sm:$0xff] }
 0x11f   :  { %v569_v57 = vpop.permute.xlu1 %568  ;;  %v567_v12 = vpop.permute.xlu0 %566 }
 0x120   :  { %v584_v13 = vsel %vm578_vm8, %v565_v54, %v569_v57  ;;  %v583_v14 = vsel %vm578_vm8, %v563_v60, %v567_v12 }
 0x121   :  { %v612_v22 = vmul.f32 %v6343_v63, %v584_v13  ;;  %v608_v23 = vmul.f32 %v6343_v63, %v583_v14  ;;  %v112_v13 = vld [vmem:[%s10120_s2 + $0x30] sm:$0xff] }
 0x123   :  { %v573_v27 = vpop.permute.xlu1 %572  ;;  %v571_v28 = vpop.permute.xlu0 %570  ;;  %v5083_v38 = vpack.c.bf16 %v612_v22, %v608_v23 }
 0x124   :  { %v582_v24 = vsel %vm578_vm8, %v569_v57, %v573_v27  ;;  %v581_v0 = vsel %vm578_vm8, %v567_v12, %v571_v28  ;;  %v110_v57 = vld [vmem:[%s10120_s2 + $0x20] sm:$0xff]  ;;  %v113_v12 = vld [vmem:[%s10120_s2 + $0x38] sm:$0xff] }
 0x125   :  { %v613_v2 = vmul.f32 %v6350_v21, %v582_v24  ;;  %v609_v31 = vmul.f32 %v6350_v21, %v581_v0 }
 0x127   :  { %v577_v5 = vpop.permute.xlu1 %576  ;;  %v575_v36 = vpop.permute.xlu0 %574  ;;  %v5081_v37 = vpack.c.bf16 %v613_v2, %v609_v31 }
 0x128   :  { %v580_v39 = vsel %vm578_vm8, %v573_v27, %v577_v5  ;;  %v586_v44 = vsel %vm578_vm8, %v577_v5, %v565_v54  ;;  %v579_v45 = vsel %vm578_vm8, %v571_v28, %v575_v36  ;;  %v585_v20 = vsel %vm578_vm8, %v575_v36, %v563_v60  ;;  %v109_v60 = vld [vmem:[%s10120_s2 + $0x18] sm:$0xff] }
 0x129   :  { %v614_v46 = vmul.f32 %v6361_v1, %v580_v39  ;;  %v615_v25 = vmul.f32 %v6364_v11, %v586_v44  ;;  %v610_v47 = vmul.f32 %v6361_v1, %v579_v45  ;;  %v611_v50 = vmul.f32 %v6364_v11, %v585_v20  ;;  %5082 = vmatprep.subr.bf16.mxu0 %v5081_v37 }
 0x12a   :  { %5084 = vmatpush1.bf16.msra.mxu0 %v5083_v38 }
 0x12b   :  { %v5117_v54 = vpack.c.bf16 %v615_v25, %v611_v50  ;;  %v5119_v61 = vpack.c.bf16 %v614_v46, %v610_v47 }
 0x12d   :  { %794 = vmatmul.mubr.f32.vlgmr.msra.gmra.mrb[0].mxu0 %v106_v53  ;;  %5118 = vmatprep.subr.bf16.mxu1 %v5117_v54 }
 0x12e   :  { %5120 = vmatpush1.bf16.msra.mxu1 %v5119_v61  ;;  %4955 = vmatprep.mubr.msk.f32.mxu0 %vm716_vm0, %v109_v60 }
 0x131   :  { %800 = vmatmul.mubr.f32.gmra.mrb[2].mxu0 %v108_v56  ;;  %883 = vmatmul.mubr.f32.vlgmr.msra.gmra.mrb[0].mxu1 %v106_v53 }
 0x132   :  { %4956 = vmatprep.mubr.msk.f32.mxu0 %vm716_vm0, %v111_v62  ;;  %4959 = vmatprep.mubr.msk.f32.mxu1 %vm716_vm0, %v109_v60 }
 0x135   :  { %806 = vmatmul.mubr.f32.gmra.mrb[4].mxu0 %v110_v57  ;;  %889 = vmatmul.mubr.f32.gmra.mrb[2].mxu1 %v108_v56 }
 0x136   :  { %4957 = vmatprep.mubr.msk.f32.mxu0 %vm716_vm0, %v113_v12  ;;  %4960 = vmatprep.mubr.msk.f32.mxu1 %vm716_vm0, %v111_v62 }
 0x138   :  { %v6405_v28 = vpop.permute.xlu1 %703 }
 0x139   :  { %812 = vmatmul.mubr.f32.gmra.mrb[6].mxu0 %v112_v13  ;;  %895 = vmatmul.mubr.f32.gmra.mrb[4].mxu1 %v110_v57  ;;  %v699_v14 = vpop.permute.xlu0 %698 }
 0x13a   :  { %4961 = vmatprep.mubr.msk.f32.mxu1 %vm716_vm0, %v113_v12 }
 0x13d   :  { %901 = vmatmul.mubr.f32.gmra.mrb[6].mxu1 %v112_v13 }
 0x200   :  { %v795_v22 = vpop.f32.mrb[0].mxu0 }
 0x201   :  { %v796_v23 = vadd.f32 %v795_v22, %v699_v14  ;;  %v797_v27 = vpop.f32.mrb[1].mxu0 }
 0x202   :  { %v798_v12 = vadd.f32 %v797_v27, %v699_v14 }
 0x203   :  { %v6407_v24 = vmax.f32 %v796_v23, 0.0 }
 0x204   :  { %v801_v0 = vpop.f32.mrb[2].mxu0  ;;  %v884_v2 = vpop.f32.mrb[0].mxu1  ;;  %v6499_v13 = vmax.f32 %v798_v12, 0.0 }
 0x205   :  { %10380 = vst [vmem:[#allocation39_spill] sm:$0xff] %v6407_v24  ;;  %v802_v31 = vadd.f32 %v801_v0, %v6405_v28  ;;  %v885_v5 = vadd.f32 %v884_v2, %v699_v14  ;;  %v803_v36 = vpop.f32.mrb[3].mxu0  ;;  %v886_v37 = vpop.f32.mrb[1].mxu1  ;;  %931 = vrot.lane.b32.xlu1 %v6407_v24, %s5759_s30 }
 0x206   :  { %v804_v22 = vadd.f32 %v803_v36, %v6405_v28  ;;  %v887_v23 = vadd.f32 %v886_v37, %v699_v14  ;;  %v6557_v14 = vpop.permute.xlu1 %708 }
 0x207   :  { %v6412_v38 = vmax.f32 %v802_v31, 0.0  ;;  %v6414_v39 = vmax.f32 %v885_v5, 0.0 }
 0x208   :  { %v6416_v44 = vpop.f32.mrb[4].mxu0  ;;  %v890_v45 = vpop.f32.mrb[2].mxu1  ;;  %v6506_v0 = vmax.f32 %v804_v22, 0.0  ;;  %v6508_v27 = vmax.f32 %v887_v23, 0.0 }
 0x209   :  { %10381 = vst [vmem:[#allocation40_spill] sm:$0xff] %v6412_v38  ;;  %10382 = vst [vmem:[#allocation41_spill] sm:$0xff] %v6414_v39  ;;  %v891_v20 = vadd.f32 %v890_v45, %v6405_v28  ;;  %v6419_v46 = vpop.f32.mrb[5].mxu0  ;;  %v892_v25 = vpop.f32.mrb[3].mxu1  ;;  %933 = vrot.lane.b32.xlu0 %v6412_v38, %s5759_s30  ;;  %947 = vrot.lane.b32.xlu1 %v6414_v39, %s5759_s30  ;;  %v808_v45 = vadd.f32 %v6416_v44, %v6557_v14 }
 0x20a   :  { %v893_v2 = vadd.f32 %v892_v25, %v6405_v28  ;;  %v6563_v28 = vpop.permute.xlu0 %713 }
 0x20b   :  { %v6427_v50 = vmax.f32 %v891_v20, 0.0  ;;  %v6589_v12 = vmax.f32 %v808_v45, 0.0 }
 0x20c   :  { %v6429_v53 = vpop.f32.mrb[6].mxu0  ;;  %v6431_v54 = vpop.f32.mrb[4].mxu1  ;;  %v6515_v31 = vmax.f32 %v893_v2, 0.0 }
 0x20d   :  { %10383 = vst [vmem:[#allocation42_spill] sm:$0xff] %v6427_v50  ;;  %v6433_v61 = vpop.f32.mrb[7].mxu0  ;;  %v6435_v60 = vpop.f32.mrb[5].mxu1  ;;  %949 = vrot.lane.b32.xlu0 %v6427_v50, %s5759_s30  ;;  %1011 = vrot.lane.b32.xlu1 %v6407_v24, %s5760_s24  ;;  %10384 = vst [vmem:[#allocation43_spill] sm:$0xff] %v6589_v12  ;;  %v814_v22 = vadd.f32 %v6429_v53, %v6563_v28  ;;  %v897_v23 = vadd.f32 %v6431_v54, %v6557_v14 }
 0x20f   :  { %v6603_v55 = vmax.f32 %v814_v22, 0.0  ;;  %v6605_v45 = vmax.f32 %v897_v23, 0.0 }
 0x210   :  { %v6443_v62 = vpop.f32.mrb[6].mxu1 }
 0x211   :  { %v6445_v57 = vpop.f32.mrb[7].mxu1  ;;  %1013 = vrot.lane.b32.xlu0 %v6412_v38, %s5760_s24  ;;  %1027 = vrot.lane.b32.xlu1 %v6414_v39, %s5760_s24  ;;  %10385 = vst [vmem:[#allocation44_spill] sm:$0xff] %v6605_v45  ;;  %v903_v53 = vadd.f32 %v6443_v62, %v6563_v28 }
 0x213   :  { %v6617_v47 = vmax.f32 %v903_v53, 0.0 }
 0x215   :  { %1029 = vrot.lane.b32.xlu0 %v6427_v50, %s5760_s24  ;;  %1091 = vrot.lane.b32.xlu1 %v6407_v24, %s5761_s25  ;;  %10386 = vst [vmem:[#allocation45_spill] sm:$0xff] %v6617_v47 }
 0x219   :  { %1093 = vrot.lane.b32.xlu0 %v6412_v38, %s5761_s25  ;;  %1107 = vrot.lane.b32.xlu1 %v6414_v39, %s5761_s25 }
 0x21d   :  { %1109 = vrot.lane.b32.xlu0 %v6427_v50, %s5761_s25  ;;  %1171 = vrot.lane.b32.xlu1 %v6407_v24, %s5762_s26 }
 0x221   :  { %1173 = vrot.lane.b32.xlu0 %v6412_v38, %s5762_s26  ;;  %1187 = vrot.lane.b32.xlu1 %v6414_v39, %s5762_s26 }
 0x225   :  { %1189 = vrot.lane.b32.xlu0 %v6427_v50, %s5762_s26  ;;  %1267 = vrot.lane.b32.xlu1 %v6407_v24, %s5763_s27 }
 0x229   :  { %1269 = vrot.lane.b32.xlu0 %v6412_v38, %s5763_s27  ;;  %1283 = vrot.lane.b32.xlu1 %v6414_v39, %s5763_s27 }
 0x22d   :  { %1285 = vrot.lane.b32.xlu0 %v6427_v50, %s5763_s27  ;;  %1347 = vrot.lane.b32.xlu1 %v6407_v24, %s5764_s28 }
 0x231   :  { %1349 = vrot.lane.b32.xlu0 %v6412_v38, %s5764_s28  ;;  %1363 = vrot.lane.b32.xlu1 %v6414_v39, %s5764_s28 }
 0x235   :  { %1365 = vrot.lane.b32.xlu0 %v6427_v50, %s5764_s28  ;;  %1427 = vrot.lane.b32.xlu1 %v6407_v24, %s5765_s29 }
 0x239   :  { %1429 = vrot.lane.b32.xlu0 %v6412_v38, %s5765_s29  ;;  %1443 = vrot.lane.b32.xlu1 %v6414_v39, %s5765_s29 }
 0x23d   :  { %1445 = vrot.lane.b32.xlu0 %v6427_v50, %s5765_s29  ;;  %1507 = vrot.lane.b32.xlu1 %v6407_v24, %s5766_s6 }
 0x241   :  { %1509 = vrot.lane.b32.xlu0 %v6412_v38, %s5766_s6  ;;  %1523 = vrot.lane.b32.xlu1 %v6414_v39, %s5766_s6 }
 0x245   :  { %1525 = vrot.lane.b32.xlu0 %v6427_v50, %s5766_s6  ;;  %939 = vrot.lane.b32.xlu1 %v6499_v13, %s5759_s30 }
 0x249   :  { %941 = vrot.lane.b32.xlu0 %v6506_v0, %s5759_s30  ;;  %955 = vrot.lane.b32.xlu1 %v6508_v27, %s5759_s30 }
 0x24d   :  { %957 = vrot.lane.b32.xlu0 %v6515_v31, %s5759_s30  ;;  %1019 = vrot.lane.b32.xlu1 %v6499_v13, %s5760_s24 }
 0x251   :  { %1021 = vrot.lane.b32.xlu0 %v6506_v0, %s5760_s24  ;;  %1035 = vrot.lane.b32.xlu1 %v6508_v27, %s5760_s24 }
 0x255   :  { %1037 = vrot.lane.b32.xlu0 %v6515_v31, %s5760_s24  ;;  %1099 = vrot.lane.b32.xlu1 %v6499_v13, %s5761_s25 }
 0x259   :  { %1101 = vrot.lane.b32.xlu0 %v6506_v0, %s5761_s25  ;;  %1115 = vrot.lane.b32.xlu1 %v6508_v27, %s5761_s25 }
 0x25d   :  { %1117 = vrot.lane.b32.xlu0 %v6515_v31, %s5761_s25  ;;  %1179 = vrot.lane.b32.xlu1 %v6499_v13, %s5762_s26 }
 0x261   :  { %1181 = vrot.lane.b32.xlu0 %v6506_v0, %s5762_s26  ;;  %1195 = vrot.lane.b32.xlu1 %v6508_v27, %s5762_s26 }
 0x265   :  { %1197 = vrot.lane.b32.xlu0 %v6515_v31, %s5762_s26  ;;  %1275 = vrot.lane.b32.xlu1 %v6499_v13, %s5763_s27 }
 0x269   :  { %1277 = vrot.lane.b32.xlu0 %v6506_v0, %s5763_s27  ;;  %1291 = vrot.lane.b32.xlu1 %v6508_v27, %s5763_s27 }
 0x26d   :  { %1293 = vrot.lane.b32.xlu0 %v6515_v31, %s5763_s27  ;;  %1355 = vrot.lane.b32.xlu1 %v6499_v13, %s5764_s28 }
 0x271   :  { %1357 = vrot.lane.b32.xlu0 %v6506_v0, %s5764_s28  ;;  %1371 = vrot.lane.b32.xlu1 %v6508_v27, %s5764_s28 }
 0x275   :  { %1373 = vrot.lane.b32.xlu0 %v6515_v31, %s5764_s28  ;;  %1435 = vrot.lane.b32.xlu1 %v6499_v13, %s5765_s29 }
 0x277   :  { %v6565_v5 = vpop.permute.xlu1 %931 }
 0x279   :  { %1437 = vrot.lane.b32.xlu0 %v6506_v0, %s5765_s29  ;;  %1451 = vrot.lane.b32.xlu1 %v6508_v27, %s5765_s29 }
 0x27b   :  { %v6571_v36 = vpop.permute.xlu0 %933  ;;  %v6573_v37 = vpop.permute.xlu1 %947 }
 0x27d   :  { %1453 = vrot.lane.b32.xlu0 %v6515_v31, %s5765_s29  ;;  %1515 = vrot.lane.b32.xlu1 %v6499_v13, %s5766_s6 }
 0x27f   :  { %v6581_v20 = vpop.permute.xlu0 %949  ;;  %v6583_v25 = vpop.permute.xlu1 %1011 }
 0x281   :  { %1517 = vrot.lane.b32.xlu0 %v6506_v0, %s5766_s6  ;;  %1531 = vrot.lane.b32.xlu1 %v6508_v27, %s5766_s6 }
 0x283   :  { %v6595_v2 = vpop.permute.xlu0 %1013  ;;  %v6597_v44 = vpop.permute.xlu1 %1027 }
 0x285   :  { %1533 = vrot.lane.b32.xlu0 %v6515_v31, %s5766_s6  ;;  %935 = vrot.lane.b32.xlu1 %v6589_v12, %s5759_s30 }
 0x287   :  { %v6609_v56 = vpop.permute.xlu0 %1029  ;;  %v6611_v54 = vpop.permute.xlu1 %1091 }
 0x289   :  { %937 = vrot.lane.b32.xlu0 %v6603_v55, %s5759_s30  ;;  %951 = vrot.lane.b32.xlu1 %v6605_v45, %s5759_s30 }
 0x28b   :  { %v6619_v1 = vpop.permute.xlu0 %1093  ;;  %v6621_v22 = vpop.permute.xlu1 %1107 }
 0x28d   :  { %953 = vrot.lane.b32.xlu0 %v6617_v47, %s5759_s30  ;;  %1015 = vrot.lane.b32.xlu1 %v6589_v12, %s5760_s24 }
 0x28f   :  { %v6627_v62 = vpop.permute.xlu0 %1109  ;;  %v6629_v23 = vpop.permute.xlu1 %1171 }
 0x291   :  { %1017 = vrot.lane.b32.xlu0 %v6603_v55, %s5760_s24  ;;  %1031 = vrot.lane.b32.xlu1 %v6605_v45, %s5760_s24 }
 0x293   :  { %v6635_v53 = vpop.permute.xlu0 %1173  ;;  %v6637_v11 = vpop.permute.xlu1 %1187 }
 0x294   :  { %10387 = vst [vmem:[#allocation46_spill] sm:$0xff] %v6635_v53 }
 0x295   :  { %1033 = vrot.lane.b32.xlu0 %v6617_v47, %s5760_s24  ;;  %1095 = vrot.lane.b32.xlu1 %v6589_v12, %s5761_s25 }
 0x297   :  { %v6643_v21 = vpop.permute.xlu0 %1189  ;;  %v6645_v63 = vpop.permute.xlu1 %1267 }
 0x298   :  { %10388 = vst [vmem:[#allocation47_spill] sm:$0xff] %v6643_v21  ;;  %10389 = vst [vmem:[#allocation48_spill] sm:$0xff] %v6645_v63 }
 0x299   :  { %1097 = vrot.lane.b32.xlu0 %v6603_v55, %s5761_s25  ;;  %1111 = vrot.lane.b32.xlu1 %v6605_v45, %s5761_s25 }
 0x29b   :  { %v6651_v7 = vpop.permute.xlu0 %1269  ;;  %v6653_v6 = vpop.permute.xlu1 %1283 }
 0x29c   :  { %10390 = vst [vmem:[#allocation49_spill] sm:$0xff] %v6651_v7  ;;  %10391 = vst [vmem:[#allocation50_spill] sm:$0xff] %v6653_v6  ;;  %v930_v6 = vld [vmem:[%s10123_s5 + $0x8] sm:$0xff] }
 0x29d   :  { %1113 = vrot.lane.b32.xlu0 %v6617_v47, %s5761_s25  ;;  %1175 = vrot.lane.b32.xlu1 %v6589_v12, %s5762_s26 }
 0x29f   :  { %v6659_v15 = vpop.permute.xlu0 %1285  ;;  %v6661_v39 = vpop.permute.xlu1 %1347 }
 0x2a0   :  { %10392 = vst [vmem:[#allocation51_spill] sm:$0xff] %v6659_v15  ;;  %10393 = vst [vmem:[#allocation52_spill] sm:$0xff] %v6661_v39 }
 0x2a1   :  { %1177 = vrot.lane.b32.xlu0 %v6603_v55, %s5762_s26  ;;  %1191 = vrot.lane.b32.xlu1 %v6605_v45, %s5762_s26 }
 0x2a3   :  { %v6667_v50 = vpop.permute.xlu0 %1349  ;;  %v6669_v8 = vpop.permute.xlu1 %1363 }
 0x2a4   :  { %10394 = vst [vmem:[#allocation53_spill] sm:$0xff] %v6667_v50  ;;  %10395 = vst [vmem:[#allocation54_spill] sm:$0xff] %v6669_v8 }
 0x2a5   :  { %1193 = vrot.lane.b32.xlu0 %v6617_v47, %s5762_s26  ;;  %1271 = vrot.lane.b32.xlu1 %v6589_v12, %s5763_s27 }
 0x2a7   :  { %v6675_v4 = vpop.permute.xlu0 %1365  ;;  %v6677_v24 = vpop.permute.xlu1 %1427 }
 0x2a8   :  { %10396 = vst [vmem:[#allocation55_spill] sm:$0xff] %v6675_v4  ;;  %10397 = vst [vmem:[#allocation56_spill] sm:$0xff] %v6677_v24 }
 0x2a9   :  { %1273 = vrot.lane.b32.xlu0 %v6603_v55, %s5763_s27  ;;  %1287 = vrot.lane.b32.xlu1 %v6605_v45, %s5763_s27 }
 0x2ab   :  { %v6683_v38 = vpop.permute.xlu0 %1429  ;;  %v6685_v3 = vpop.permute.xlu1 %1443 }
 0x2ac   :  { %10398 = vst [vmem:[#allocation57_spill] sm:$0xff] %v6683_v38  ;;  %10399 = vst [vmem:[#allocation58_spill] sm:$0xff] %v6685_v3 }
 0x2ad   :  { %1289 = vrot.lane.b32.xlu0 %v6617_v47, %s5763_s27  ;;  %1351 = vrot.lane.b32.xlu1 %v6589_v12, %s5764_s28 }
 0x2af   :  { %v6691_v26 = vpop.permute.xlu0 %1445  ;;  %v6693_v19 = vpop.permute.xlu1 %1507 }
 0x2b0   :  { %10400 = vst [vmem:[#allocation59_spill] sm:$0xff] %v6691_v26  ;;  %10401 = vst [vmem:[#allocation60_spill] sm:$0xff] %v6693_v19  ;;  %v810_v19 = vadd.f32 %v6419_v46, %v6557_v14  ;;  %v899_v46 = vadd.f32 %v6435_v60, %v6557_v14 }
 0x2b1   :  { %1353 = vrot.lane.b32.xlu0 %v6603_v55, %s5764_s28  ;;  %1367 = vrot.lane.b32.xlu1 %v6605_v45, %s5764_s28 }
 0x2b2   :  { %v6748_v7 = vmax.f32 %v899_v46, 0.0 }
 0x2b3   :  { %v6699_v24 = vpop.permute.xlu0 %1509  ;;  %v6701_v38 = vpop.permute.xlu1 %1523 }
 0x2b4   :  { %10402 = vst [vmem:[#allocation61_spill] sm:$0xff] %v6699_v24  ;;  %10403 = vst [vmem:[#allocation62_spill] sm:$0xff] %v6701_v38  ;;  %v816_v38 = vadd.f32 %v6433_v61, %v6563_v28 }
 0x2b5   :  { %1369 = vrot.lane.b32.xlu0 %v6617_v47, %s5764_s28  ;;  %1431 = vrot.lane.b32.xlu1 %v6589_v12, %s5765_s29 }
 0x2b6   :  { %v6739_v60 = vmax.f32 %v816_v38, 0.0 }
 0x2b7   :  { %v6707_v3 = vpop.permute.xlu0 %1525  ;;  %v940_v26 = vpop.permute.xlu1 %939 }
 0x2b8   :  { %10404 = vst [vmem:[#allocation63_spill] sm:$0xff] %v6707_v3  ;;  %v971_v24 = vsel %vm136_vm1, %v6565_v5, %v940_v26  ;;  %v6720_v3 = vmax.f32 %v810_v19, 0.0 }
 0x2b9   :  { %1433 = vrot.lane.b32.xlu0 %v6603_v55, %s5765_s29  ;;  %1447 = vrot.lane.b32.xlu1 %v6605_v45, %s5765_s29  ;;  %v980_v4 = vmul.f32 %v971_v24, %v6048_v16  ;;  %v905_v24 = vadd.f32 %v6445_v57, %v6563_v28 }
 0x2bb   :  { %v942_v39 = vpop.permute.xlu0 %941  ;;  %v956_v8 = vpop.permute.xlu1 %955 }
 0x2bc   :  { %v972_v50 = vsel %vm136_vm1, %v6571_v36, %v942_v39  ;;  %v963_v61 = vsel %vm136_vm1, %v6573_v37, %v956_v8  ;;  %v975_v19 = vsel %vm136_vm1, %v956_v8, %v6565_v5  ;;  %v967_v8 = vsel %vm136_vm1, %v940_v26, %v6573_v37 }
 0x2bd   :  { %v984_v41 = vmul.f32 %v972_v50, %v6048_v16  ;;  %1449 = vrot.lane.b32.xlu0 %v6617_v47, %s5765_s29  ;;  %943 = vrot.lane.b32.xlu1 %v6720_v3, %s5759_s30  ;;  %v968_v50 = vsel %vm136_vm1, %v942_v39, %v6581_v20  ;;  %v979_v39 = vmul.f32 %v975_v19, %v6078_v32  ;;  %v6768_v5 = vmax.f32 %v905_v24, 0.0 }
 0x2be   :  { %v982_v28 = vmul.f32 %v963_v61, %v6081_v33  ;;  %v985_v26 = vmul.f32 %v968_v50, %v6067_v29  ;;  %v981_v61 = vmul.f32 %v967_v8, %v6067_v29 }
 0x2bf   :  { %v958_v14 = vpop.permute.xlu0 %957  ;;  %v6746_v40 = vpop.permute.xlu1 %1019  ;;  %v5121_v35 = vpack.c.bf16 %v984_v41, %v980_v4 }
 0x2c0   :  { %v964_v38 = vsel %vm136_vm1, %v6581_v20, %v958_v14  ;;  %v976_v57 = vsel %vm136_vm1, %v958_v14, %v6571_v36  ;;  %v5195_v19 = vpack.c.bf16 %v985_v26, %v981_v61 }
 0x2c1   :  { %v983_v41 = vmul.f32 %v976_v57, %v6078_v32  ;;  %v986_v4 = vmul.f32 %v964_v38, %v6081_v33  ;;  %945 = vrot.lane.b32.xlu0 %v6739_v60, %s5759_s30  ;;  %959 = vrot.lane.b32.xlu1 %v6748_v7, %s5759_s30 }
 0x2c2   :  { %5122 = vmatprep.subr.bf16.mxu0 %v5121_v35 }
 0x2c3   :  { %v5123_v36 = vpack.c.bf16 %v983_v41, %v979_v39  ;;  %v6770_v37 = vpop.permute.xlu0 %1021  ;;  %v6772_v20 = vpop.permute.xlu1 %1035  ;;  %v5193_v46 = vpack.c.bf16 %v986_v4, %v982_v28 }
 0x2c5   :  { %961 = vrot.lane.b32.xlu0 %v6768_v5, %s5759_s30  ;;  %1023 = vrot.lane.b32.xlu1 %v6720_v3, %s5760_s24 }
 0x2c6   :  { %5124 = vmatpush1.bf16.msra.mxu0 %v5123_v36  ;;  %5194 = vmatprep.subr.bf16.mxu1 %v5193_v46 }
 0x2c7   :  { %v6779_v35 = vpop.permute.xlu0 %1037  ;;  %v6781_v24 = vpop.permute.xlu1 %1099  ;;  %5196 = vmatpush1.bf16.msra.mxu1 %v5195_v19 }
 0x2c9   :  { %1025 = vrot.lane.b32.xlu0 %v6739_v60, %s5760_s24  ;;  %1039 = vrot.lane.b32.xlu1 %v6748_v7, %s5760_s24 }
 0x2cb   :  { %v6787_v50 = vpop.permute.xlu0 %1101  ;;  %v6789_v14 = vpop.permute.xlu1 %1115 }
 0x2cd   :  { %1041 = vrot.lane.b32.xlu0 %v6768_v5, %s5760_s24  ;;  %1103 = vrot.lane.b32.xlu1 %v6720_v3, %s5761_s25 }
 0x2cf   :  { %v6795_v8 = vpop.permute.xlu0 %1117  ;;  %v6797_v38 = vpop.permute.xlu1 %1179 }
 0x2d1   :  { %1105 = vrot.lane.b32.xlu0 %v6739_v60, %s5761_s25  ;;  %1119 = vrot.lane.b32.xlu1 %v6748_v7, %s5761_s25 }
 0x2d3   :  { %v6803_v57 = vpop.permute.xlu0 %1181  ;;  %v6805_v39 = vpop.permute.xlu1 %1195 }
 0x2d4   :  { %10405 = vst [vmem:[#allocation64_spill] sm:$0xff] %v6803_v57  ;;  %10406 = vst [vmem:[#allocation65_spill] sm:$0xff] %v6805_v39 }
 0x2d5   :  { %1121 = vrot.lane.b32.xlu0 %v6768_v5, %s5761_s25  ;;  %1183 = vrot.lane.b32.xlu1 %v6720_v3, %s5762_s26 }
 0x2d7   :  { %v6811_v28 = vpop.permute.xlu0 %1197  ;;  %v6813_v41 = vpop.permute.xlu1 %1275 }
 0x2d8   :  { %10407 = vst [vmem:[#allocation66_spill] sm:$0xff] %v6811_v28  ;;  %10408 = vst [vmem:[#allocation67_spill] sm:$0xff] %v6813_v41 }
 0x2d9   :  { %1185 = vrot.lane.b32.xlu0 %v6739_v60, %s5762_s26  ;;  %1199 = vrot.lane.b32.xlu1 %v6748_v7, %s5762_s26 }
 0x2db   :  { %v6819_v4 = vpop.permute.xlu0 %1277  ;;  %v6821_v26 = vpop.permute.xlu1 %1291 }
 0x2dc   :  { %10409 = vst [vmem:[#allocation68_spill] sm:$0xff] %v6819_v4  ;;  %10410 = vst [vmem:[#allocation69_spill] sm:$0xff] %v6821_v26 }
 0x2dd   :  { %1201 = vrot.lane.b32.xlu0 %v6768_v5, %s5762_s26  ;;  %1511 = vrot.lane.b32.xlu1 %v6589_v12, %s5766_s6 }
 0x2df   :  { %v6827_v36 = vpop.permute.xlu0 %1293  ;;  %v6829_v46 = vpop.permute.xlu1 %1355 }
 0x2e0   :  { %10411 = vst [vmem:[#allocation70_spill] sm:$0xff] %v6827_v36  ;;  %10412 = vst [vmem:[#allocation71_spill] sm:$0xff] %v6829_v46 }
 0x2e1   :  { %1513 = vrot.lane.b32.xlu0 %v6603_v55, %s5766_s6  ;;  %1279 = vrot.lane.b32.xlu1 %v6720_v3, %s5763_s27 }
 0x2e3   :  { %v6835_v61 = vpop.permute.xlu0 %1357  ;;  %v6837_v19 = vpop.permute.xlu1 %1371 }
 0x2e4   :  { %10413 = vst [vmem:[#allocation72_spill] sm:$0xff] %v6835_v61  ;;  %10414 = vst [vmem:[#allocation73_spill] sm:$0xff] %v6837_v19 }
 0x2e5   :  { %1529 = vrot.lane.b32.xlu0 %v6617_v47, %s5766_s6  ;;  %1295 = vrot.lane.b32.xlu1 %v6748_v7, %s5763_s27 }
 0x2e7   :  { %v6843_v26 = vpop.permute.xlu0 %1373  ;;  %v6845_v36 = vpop.permute.xlu1 %1435 }
 0x2e8   :  { %10415 = vst [vmem:[#allocation74_spill] sm:$0xff] %v6843_v26  ;;  %10416 = vst [vmem:[#allocation75_spill] sm:$0xff] %v6845_v36 }
 0x2e9   :  { %1281 = vrot.lane.b32.xlu0 %v6739_v60, %s5763_s27  ;;  %1359 = vrot.lane.b32.xlu1 %v6720_v3, %s5764_s28 }
 0x2eb   :  { %v6851_v46 = vpop.permute.xlu0 %1437  ;;  %v6853_v61 = vpop.permute.xlu1 %1451 }
 0x2ec   :  { %10417 = vst [vmem:[#allocation76_spill] sm:$0xff] %v6851_v46  ;;  %10418 = vst [vmem:[#allocation77_spill] sm:$0xff] %v6853_v61 }
 0x2ed   :  { %1297 = vrot.lane.b32.xlu0 %v6768_v5, %s5763_s27  ;;  %1375 = vrot.lane.b32.xlu1 %v6748_v7, %s5764_s28 }
 0x2ef   :  { %v6859_v19 = vpop.permute.xlu0 %1453  ;;  %v6861_v26 = vpop.permute.xlu1 %1515 }
 0x2f0   :  { %10419 = vst [vmem:[#allocation78_spill] sm:$0xff] %v6859_v19  ;;  %10420 = vst [vmem:[#allocation79_spill] sm:$0xff] %v6861_v26  ;;  %v924_v26 = vld [vmem:[#allocation6 + $0x8] sm:$0xff] }
 0x2f1   :  { %1361 = vrot.lane.b32.xlu0 %v6739_v60, %s5764_s28  ;;  %1439 = vrot.lane.b32.xlu1 %v6720_v3, %s5765_s29 }
 0x2f2   :  { %1812 = vmatprep.mubr.f32.mxu0 %v924_v26  ;;  %1966 = vmatprep.mubr.f32.mxu1 %v924_v26 }
 0x2f3   :  { %v6867_v36 = vpop.permute.xlu0 %1517  ;;  %v6869_v46 = vpop.permute.xlu1 %1531 }
 0x2f4   :  { %10421 = vst [vmem:[#allocation80_spill] sm:$0xff] %v6867_v36  ;;  %10422 = vst [vmem:[#allocation81_spill] sm:$0xff] %v6869_v46 }
 0x2f5   :  { %1377 = vrot.lane.b32.xlu0 %v6768_v5, %s5764_s28  ;;  %1455 = vrot.lane.b32.xlu1 %v6748_v7, %s5765_s29 }
 0x2f7   :  { %v6875_v61 = vpop.permute.xlu0 %1533  ;;  %v6877_v19 = vpop.permute.xlu1 %935 }
 0x2f8   :  { %10423 = vst [vmem:[#allocation82_spill] sm:$0xff] %v6875_v61 }
 0x2f9   :  { %1441 = vrot.lane.b32.xlu0 %v6739_v60, %s5765_s29  ;;  %1519 = vrot.lane.b32.xlu1 %v6720_v3, %s5766_s6 }
 0x2fb   :  { %v6883_v46 = vpop.permute.xlu0 %937  ;;  %v6885_v36 = vpop.permute.xlu1 %951 }
 0x2fd   :  { %1457 = vrot.lane.b32.xlu0 %v6768_v5, %s5765_s29  ;;  %1527 = vrot.lane.b32.xlu1 %v6605_v45, %s5766_s6 }
 0x2ff   :  { %v6891_v61 = vpop.permute.xlu0 %953  ;;  %v6893_v4 = vpop.permute.xlu1 %1015 }
 0x301   :  { %1521 = vrot.lane.b32.xlu0 %v6739_v60, %s5766_s6  ;;  %1535 = vrot.lane.b32.xlu1 %v6748_v7, %s5766_s6 }
 0x303   :  { %v6899_v26 = vpop.permute.xlu0 %1017  ;;  %v6901_v15 = vpop.permute.xlu1 %1031 }
 0x304   :  { %10424 = vst [vmem:[#allocation83_spill] sm:$0xff] %v6901_v15 }
 0x305   :  { %1537 = vrot.lane.b32.xlu0 %v6768_v5, %s5766_s6  ;;  %1733 = vperm.xlu1 %5615, %v929_v30  }
 0x307   :  { %v6911_v63 = vpop.permute.xlu0 %1033  ;;  %v6913_v41 = vpop.permute.xlu1 %1095 }
 0x308   :  { %10425 = vst [vmem:[#allocation84_spill] sm:$0xff] %v6913_v41 }
 0x309   :  { %1738 = vperm.xlu0 %5614, %v930_v6  }
 0x30b   :  { %v6915_v49 = vpop.permute.xlu0 %1097  ;;  %v6917_v48 = vpop.permute.xlu1 %1111 }
 0x30c   :  { %10426 = vst [vmem:[#allocation85_spill] sm:$0xff] %v6915_v49  ;;  %10427 = vst [vmem:[#allocation86_spill] sm:$0xff] %v6917_v48 }
 0x30f   :  { %v6919_v28 = vpop.permute.xlu0 %1113  ;;  %v6921_v39 = vpop.permute.xlu1 %1175 }
 0x310   :  { %10428 = vst [vmem:[#allocation87_spill] sm:$0xff] %v6919_v28  ;;  %10429 = vst [vmem:[#allocation88_spill] sm:$0xff] %v6921_v39 }
 0x313   :  { %v6923_v53 = vpop.permute.xlu0 %1177  ;;  %v6925_v30 = vpop.permute.xlu1 %1191 }
 0x314   :  { %10430 = vst [vmem:[#allocation89_spill] sm:$0xff] %v6923_v53 }
 0x317   :  { %v6927_v57 = vpop.permute.xlu0 %1193  ;;  %v6929_v21 = vpop.permute.xlu1 %1271 }
 0x318   :  { %10431 = vst [vmem:[#allocation90_spill] sm:$0xff] %v6929_v21  ;;  %v1048_v21 = vsel %vm198_vm2, %v6770_v37, %v6609_v56 }
 0x31b   :  { %v6931_v15 = vpop.permute.xlu0 %1273  ;;  %v6933_v41 = vpop.permute.xlu1 %1287 }
 0x31c   :  { %10432 = vst [vmem:[#allocation91_spill] sm:$0xff] %v6931_v15  ;;  %10433 = vst [vmem:[#allocation92_spill] sm:$0xff] %v6933_v41  ;;  %v1052_v15 = vsel %vm198_vm2, %v6595_v2, %v6770_v37  ;;  %v1056_v37 = vsel %vm198_vm2, %v6779_v35, %v6595_v2  ;;  %v1055_v2 = vsel %vm198_vm2, %v6772_v20, %v6583_v25 }
 0x31f   :  { %v6935_v6 = vpop.permute.xlu0 %1289  ;;  %v6937_v49 = vpop.permute.xlu1 %1351 }
 0x320   :  { %10434 = vst [vmem:[#allocation93_spill] sm:$0xff] %v6935_v6  ;;  %10435 = vst [vmem:[#allocation94_spill] sm:$0xff] %v6937_v49 }
 0x323   :  { %v6939_v48 = vpop.permute.xlu0 %1353  ;;  %v6941_v28 = vpop.permute.xlu1 %1367 }
 0x324   :  { %10436 = vst [vmem:[#allocation95_spill] sm:$0xff] %v6939_v48  ;;  %10437 = vst [vmem:[#allocation96_spill] sm:$0xff] %v6941_v28  ;;  %v1047_v48 = vsel %vm198_vm2, %v6746_v40, %v6597_v44  ;;  %v6980_v28 = vmul.f32 %v1052_v15, %v6099_v52 }
 0x327   :  { %v6943_v39 = vpop.permute.xlu0 %1369  ;;  %v6945_v53 = vpop.permute.xlu1 %1431 }
 0x328   :  { %10438 = vst [vmem:[#allocation97_spill] sm:$0xff] %v6943_v39  ;;  %10439 = vst [vmem:[#allocation98_spill] sm:$0xff] %v6945_v53  ;;  %v1051_v53 = vsel %vm198_vm2, %v6583_v25, %v6746_v40  ;;  %v1044_v39 = vsel %vm198_vm2, %v6609_v56, %v6779_v35  ;;  %v6983_v40 = vmul.f32 %v1048_v21, %v6122_v9 }
 0x329   :  { %v1043_v56 = vsel %vm198_vm2, %v6597_v44, %v6772_v20  ;;  %v6994_v35 = vmul.f32 %v1051_v53, %v6099_v52  ;;  %v7006_v44 = vmul.f32 %v1056_v37, %v6129_v17  ;;  %v7009_v41 = vmul.f32 %v1044_v39, %v6132_v18 }
 0x32a   :  { %v1131_v25 = vsel %vm260_vm3, %v6611_v54, %v6781_v24  ;;  %v7020_v20 = vmul.f32 %v1055_v2, %v6129_v17  ;;  %v7023_v37 = vmul.f32 %v1043_v56, %v6132_v18  ;;  %v1128_v21 = vsel %vm260_vm3, %v6787_v50, %v6627_v62 }
 0x32b   :  { %v6955_v6 = vpop.permute.xlu0 %1433  ;;  %v6957_v49 = vpop.permute.xlu1 %1447  ;;  %v5129_v56 = vpack.c.bf16 %v6980_v28, %v6994_v35  ;;  %v7041_v39 = vmul.f32 %v1131_v25, %v6150_v43  ;;  %v1123_v35 = vsel %vm260_vm3, %v6621_v22, %v6789_v14 }
 0x32c   :  { %10440 = vst [vmem:[#allocation99_spill] sm:$0xff] %v6955_v6  ;;  %10441 = vst [vmem:[#allocation100_spill] sm:$0xff] %v6957_v49  ;;  %v6997_v49 = vmul.f32 %v1047_v48, %v6122_v9  ;;  %v1127_v48 = vsel %vm260_vm3, %v6781_v24, %v6621_v22  ;;  %v1132_v24 = vsel %vm260_vm3, %v6619_v1, %v6787_v50 }
 0x32d   :  { %v7044_v6 = vmul.f32 %v1127_v48, %v6159_v51  ;;  %v5201_v50 = vpack.c.bf16 %v7009_v41, %v7023_v37  ;;  %v7066_v47 = vmul.f32 %v1132_v24, %v6150_v43  ;;  %v7074_v22 = vmul.f32 %v1128_v21, %v6159_v51 }
 0x32e   :  { %v1136_v21 = vsel %vm260_vm3, %v6795_v8, %v6619_v1 }
 0x32f   :  { %v6999_v15 = vpop.permute.xlu0 %1449  ;;  %v944_v53 = vpop.permute.xlu1 %943 }
 0x330   :  { %10442 = vst [vmem:[#allocation101_spill] sm:$0xff] %v6999_v15  ;;  %v973_v2 = vsel %vm136_vm1, %v6877_v19, %v944_v53  ;;  %v1135_v15 = vsel %vm260_vm3, %v6789_v14, %v6611_v54 }
 0x331   :  { %v988_v54 = vmul.f32 %v973_v2, %v6048_v16  ;;  %v7077_v14 = vmul.f32 %v1135_v15, %v6166_v58  ;;  %v1211_v15 = vsel %vm322_vm4, %v6629_v23, %v6797_v38 }
 0x333   :  { %v946_v45 = vpop.permute.xlu0 %945  ;;  %v960_v25 = vpop.permute.xlu1 %959 }
 0x334   :  { %v974_v48 = vsel %vm136_vm1, %v6883_v46, %v946_v45  ;;  %v970_v28 = vsel %vm136_vm1, %v946_v45, %v6891_v61  ;;  %v965_v41 = vsel %vm136_vm1, %v6885_v36, %v960_v25  ;;  %v977_v37 = vsel %vm136_vm1, %v960_v25, %v6877_v19 }
 0x335   :  { %v992_v12 = vmul.f32 %v974_v48, %v6048_v16  ;;  %v1124_v45 = vsel %vm260_vm3, %v6627_v62, %v6795_v8  ;;  %v969_v19 = vsel %vm136_vm1, %v944_v53, %v6885_v36  ;;  %v993_v48 = vmul.f32 %v970_v28, %v6067_v29 }
 0x336   :  { %v987_v25 = vmul.f32 %v977_v37, %v6078_v32  ;;  %v990_v16 = vmul.f32 %v965_v41, %v6081_v33  ;;  %v7114_v53 = vmul.f32 %v1123_v35, %v6169_v59  ;;  %v7124_v28 = vmul.f32 %v1136_v21, %v6166_v58 }
 0x337   :  { %v962_v24 = vpop.permute.xlu0 %961  ;;  %v5125_v2 = vpack.c.bf16 %v992_v12, %v988_v54  ;;  %v1024_v8 = vpop.permute.xlu1 %1023  ;;  %v989_v41 = vmul.f32 %v969_v19, %v6067_v29  ;;  %v7128_v35 = vmul.f32 %v1124_v45, %v6169_v59  ;;  %v5137_v21 = vpack.c.bf16 %v7066_v47, %v7041_v39 }
 0x338   :  { %v966_v62 = vsel %vm136_vm1, %v6891_v61, %v962_v24  ;;  %v978_v1 = vsel %vm136_vm1, %v962_v24, %v6883_v46  ;;  %v1207_v46 = vsel %vm322_vm4, %v6797_v38, %v6637_v11  ;;  %v1053_v61 = vsel %vm198_vm2, %v6893_v4, %v1024_v8 }
 0x339   :  { %v991_v12 = vmul.f32 %v978_v1, %v6078_v32  ;;  %v994_v54 = vmul.f32 %v966_v62, %v6081_v33  ;;  %5126 = vmatprep.subr.bf16.mxu0 %v5125_v2  ;;  %v7131_v62 = vmul.f32 %v1211_v15, %v6187_v34  ;;  %v5199_v36 = vpack.c.bf16 %v993_v48, %v989_v41  ;;  %v10444_v48 = vld [vmem:[#allocation47_spill] sm:$0xff] }
 0x33a   :  { %v1068_v19 = vmul.f32 %v1053_v61, %v6099_v52  ;;  %v7144_v15 = vmul.f32 %v1207_v46, %v6196_v42  ;;  %v5139_v39 = vpack.c.bf16 %v7124_v28, %v7077_v14  ;;  %v10446_v46 = vld [vmem:[#allocation46_spill] sm:$0xff] }
 0x33b   :  { %v5127_v37 = vpack.c.bf16 %v991_v12, %v987_v25  ;;  %v1026_v24 = vpop.permute.xlu0 %1025  ;;  %v5197_v2 = vpack.c.bf16 %v994_v54, %v990_v16  ;;  %v1040_v1 = vpop.permute.xlu1 %1039  ;;  %v10443_v25 = vld [vmem:[#allocation83_spill] sm:$0xff]  ;;  %v10445_v54 = vld [vmem:[#allocation64_spill] sm:$0xff] }
 0x33c   :  { %v1054_v38 = vsel %vm198_vm2, %v6899_v26, %v1026_v24  ;;  %v1050_v16 = vsel %vm198_vm2, %v1026_v24, %v6911_v63  ;;  %v1045_v12 = vsel %vm198_vm2, %v10443_v25, %v1040_v1  ;;  %v1057_v47 = vsel %vm198_vm2, %v1040_v1, %v6893_v4 }
 0x33d   :  { %v1072_v45 = vmul.f32 %v1054_v38, %v6099_v52  ;;  %5128 = vmatpush1.bf16.msra.mxu0 %v5127_v37  ;;  %5198 = vmatprep.subr.bf16.mxu1 %v5197_v2  ;;  %v1208_v61 = vsel %vm322_vm4, %v10445_v54, %v10444_v48  ;;  %v1212_v41 = vsel %vm322_vm4, %v10446_v46, %v10445_v54 }
 0x33e   :  { %5130 = vmatprep.subr.bf16.mxu0 %v5129_v56  ;;  %5200 = vmatpush1.bf16.msra.mxu1 %v5199_v36  ;;  %v1049_v4 = vsel %vm198_vm2, %v1024_v8, %v10443_v25  ;;  %v1073_v56 = vmul.f32 %v1050_v16, %v6122_v9  ;;  %v1067_v36 = vmul.f32 %v1057_v47, %v6129_v17  ;;  %v10448_v16 = vld [vmem:[#allocation65_spill] sm:$0xff] }
 0x33f   :  { %v1042_v37 = vpop.permute.xlu0 %1041  ;;  %v5133_v24 = vpack.c.bf16 %v1072_v45, %v1068_v19  ;;  %5202 = vmatprep.subr.bf16.mxu1 %v5201_v50  ;;  %v1104_v2 = vpop.permute.xlu1 %1103  ;;  %v1070_v38 = vmul.f32 %v1045_v12, %v6132_v18  ;;  %v10447_v19 = vpack.c.bf16 %v7006_v44, %v7020_v20  ;;  %v10449_v50 = vld [vmem:[#allocation84_spill] sm:$0xff]  ;;  %v5209_v25 = vpack.c.bf16 %v7128_v35, %v7114_v53 }
 0x340   :  { %v1046_v14 = vsel %vm198_vm2, %v6911_v63, %v1042_v37  ;;  %v1058_v28 = vsel %vm198_vm2, %v1042_v37, %v6899_v26  ;;  %v1203_v63 = vsel %vm322_vm4, %v6637_v11, %v10448_v16  ;;  %v1215_v26 = vsel %vm322_vm4, %v10448_v16, %v6629_v23  ;;  %v10451_v37 = vld [vmem:[#allocation66_spill] sm:$0xff]  ;;  %v10457_v16 = vld [vmem:[#allocation67_spill] sm:$0xff] }
 0x341   :  { %v1071_v1 = vmul.f32 %v1058_v28, %v6129_v17  ;;  %v1074_v8 = vmul.f32 %v1046_v14, %v6132_v18  ;;  %5132 = vmatpush1.bf16.msra.mxu0 %v10447_v19  ;;  %v1133_v45 = vsel %vm260_vm3, %v10449_v50, %v1104_v2  ;;  %v7193_v44 = vmul.f32 %v1212_v41, %v6187_v34  ;;  %v10452_v41 = vld [vmem:[#allocation85_spill] sm:$0xff] }
 0x342   :  { %5134 = vmatprep.subr.bf16.mxu0 %v5133_v24  ;;  %v1069_v20 = vmul.f32 %v1049_v4, %v6122_v9  ;;  %v10450_v11 = vpack.c.bf16 %v6983_v40, %v6997_v49  ;;  %v7200_v54 = vmul.f32 %v1208_v61, %v6196_v42  ;;  %v1204_v53 = vsel %vm322_vm4, %v10444_v48, %v10451_v37  ;;  %v10453_v61 = vld [vmem:[#allocation87_spill] sm:$0xff]  ;;  %v10454_v48 = vld [vmem:[#allocation21_spill] sm:$0xff] }
 0x343   :  { %v5135_v12 = vpack.c.bf16 %v1071_v1, %v1067_v36  ;;  %v1106_v47 = vpop.permute.xlu0 %1105  ;;  %v5205_v23 = vpack.c.bf16 %v1074_v8, %v1070_v38  ;;  %v1216_v35 = vsel %vm322_vm4, %v10451_v37, %v10446_v46  ;;  %v1120_v40 = vpop.permute.xlu1 %1119  ;;  %v1148_v4 = vmul.f32 %v1133_v45, %v6150_v43  ;;  %v10455_v38 = vld [vmem:[#allocation86_spill] sm:$0xff]  ;;  %v10458_v45 = vld [vmem:[#allocation48_spill] sm:$0xff] }
 0x344   :  { %5204 = vmatpush1.bf16.msra.mxu1 %v10450_v11  ;;  %v1134_v49 = vsel %vm260_vm3, %v10452_v41, %v1106_v47  ;;  %v5207_v24 = vpack.c.bf16 %v1073_v56, %v1069_v20  ;;  %v1130_v14 = vsel %vm260_vm3, %v1106_v47, %v10453_v61  ;;  %v7219_v36 = vmul.f32 %v1215_v26, %v10454_v48  ;;  %v10456_v8 = vld [vmem:[#allocation22_spill] sm:$0xff] }
 0x345   :  { %v1152_v28 = vmul.f32 %v1134_v49, %v6150_v43  ;;  %5136 = vmatpush1.bf16.msra.mxu0 %v5135_v12  ;;  %v1125_v46 = vsel %vm260_vm3, %v10455_v38, %v1120_v40  ;;  %v1137_v56 = vsel %vm260_vm3, %v1120_v40, %v10449_v50  ;;  %5206 = vmatprep.subr.bf16.mxu1 %v5205_v23 }
 0x346   :  { %5138 = vmatprep.subr.bf16.mxu0 %v5137_v21  ;;  %v1223_v1 = vmul.f32 %v1216_v35, %v10454_v48  ;;  %v1226_v19 = vmul.f32 %v1204_v53, %v10456_v8  ;;  %v1307_v26 = vsel %vm392_vm5, %v10458_v45, %v10457_v16  ;;  %v1129_v11 = vsel %vm260_vm3, %v1104_v2, %v10455_v38  ;;  %v10462_v38 = vld [vmem:[#allocation23_spill] sm:$0xff] }
 0x347   :  { %v1122_v20 = vpop.permute.xlu0 %1121  ;;  %v5141_v12 = vpack.c.bf16 %v1152_v28, %v1148_v4  ;;  %v1153_v50 = vmul.f32 %v1130_v14, %v6159_v51  ;;  %v1184_v23 = vpop.permute.xlu1 %1183  ;;  %v1147_v37 = vmul.f32 %v1137_v56, %v6166_v58  ;;  %v1150_v53 = vmul.f32 %v1125_v46, %v6169_v59  ;;  %v10460_v4 = vld [vmem:[#allocation50_spill] sm:$0xff] }
 0x348   :  { %5208 = vmatpush1.bf16.msra.mxu1 %v5207_v24  ;;  %v1126_v21 = vsel %vm260_vm3, %v10453_v61, %v1122_v20  ;;  %v1138_v47 = vsel %vm260_vm3, %v1122_v20, %v10452_v41  ;;  %v5219_v49 = vpack.c.bf16 %v7200_v54, %v7144_v15  ;;  %v1222_v40 = vmul.f32 %v1203_v63, %v10456_v8  ;;  %v10459_v24 = vld [vmem:[#allocation88_spill] sm:$0xff] }
 0x349   :  { %5210 = vmatprep.subr.bf16.mxu1 %v5209_v25  ;;  %v1151_v35 = vmul.f32 %v1138_v47, %v6166_v58  ;;  %v1154_v2 = vmul.f32 %v1126_v21, %v6169_v59  ;;  %5140 = vmatpush1.bf16.msra.mxu0 %v5139_v39  ;;  %v1213_v41 = vsel %vm322_vm4, %v10459_v24, %v1184_v23  ;;  %v10467_v47 = vld [vmem:[#allocation69_spill] sm:$0xff] }
 0x34a   :  { %5142 = vmatprep.subr.bf16.mxu0 %v5141_v12  ;;  %v5145_v25 = vpack.c.bf16 %v7193_v44, %v7131_v62  ;;  %v1303_v61 = vsel %vm392_vm5, %v10457_v16, %v10460_v4  ;;  %v1149_v39 = vmul.f32 %v1129_v11, %v6159_v51  ;;  %v10461_v15 = vpack.c.bf16 %v7074_v22, %v7044_v6  ;;  %v10463_v62 = vld [vmem:[#allocation89_spill] sm:$0xff] }
 0x34b   :  { %v5143_v14 = vpack.c.bf16 %v1151_v35, %v1147_v37  ;;  %v1186_v63 = vpop.permute.xlu0 %1185  ;;  %v5213_v54 = vpack.c.bf16 %v1154_v2, %v1150_v53  ;;  %v5147_v28 = vpack.c.bf16 %v1223_v1, %v7219_v36  ;;  %v7265_v46 = vmul.f32 %v1307_v26, %v10462_v38  ;;  %v1200_v56 = vpop.permute.xlu1 %1199  ;;  %v10464_v36 = vld [vmem:[#allocation51_spill] sm:$0xff]  ;;  %v10465_v1 = vld [vmem:[#allocation68_spill] sm:$0xff] }
 0x34c   :  { %5212 = vmatpush1.bf16.msra.mxu1 %v10461_v15  ;;  %v1214_v44 = vsel %vm322_vm4, %v10463_v62, %v1186_v63  ;;  %v5217_v16 = vpack.c.bf16 %v1226_v19, %v1222_v40  ;;  %v5215_v20 = vpack.c.bf16 %v1153_v50, %v1149_v39  ;;  %v1228_v12 = vmul.f32 %v1213_v41, %v6187_v34  ;;  %v10466_v50 = vld [vmem:[#allocation49_spill] sm:$0xff] }
 0x34d   :  { %v1210_v6 = vsel %vm322_vm4, %v1186_v63, %v6927_v57  ;;  %v1232_v22 = vmul.f32 %v1214_v44, %v6187_v34  ;;  %5144 = vmatpush1.bf16.msra.mxu0 %v5143_v14  ;;  %v1304_v26 = vsel %vm392_vm5, %v10465_v1, %v10464_v36  ;;  %v1205_v11 = vsel %vm322_vm4, %v6925_v30, %v1200_v56 }
 0x34e   :  { %v1217_v19 = vsel %vm322_vm4, %v1200_v56, %v10459_v24  ;;  %5214 = vmatprep.subr.bf16.mxu1 %v5213_v54  ;;  %5146 = vmatprep.subr.bf16.mxu0 %v5145_v25  ;;  %v1308_v21 = vsel %vm392_vm5, %v10466_v50, %v10465_v1  ;;  %v1299_v37 = vsel %vm392_vm5, %v10460_v4, %v10467_v47  ;;  %v10469_v54 = vld [vmem:[#allocation70_spill] sm:$0xff]  ;;  %v10473_v1 = vld [vmem:[#allocation72_spill] sm:$0xff] }
 0x34f   :  { %v1311_v53 = vsel %vm392_vm5, %v10467_v47, %v10458_v45  ;;  %v1202_v35 = vpop.permute.xlu0 %1201  ;;  %v5149_v2 = vpack.c.bf16 %v1232_v22, %v1228_v12  ;;  %v1209_v40 = vsel %vm322_vm4, %v1184_v23, %v6925_v30  ;;  %v1233_v24 = vmul.f32 %v1210_v6, %v6196_v42  ;;  %v7307_v4 = vpop.permute.xlu1 %1511  ;;  %v10468_v23 = vld [vmem:[#allocation24_spill] sm:$0xff]  ;;  %v10471_v6 = vld [vmem:[#allocation26_spill] sm:$0xff] }
 0x350   :  { %5216 = vmatpush1.bf16.msra.mxu1 %v5215_v20  ;;  %v1206_v41 = vsel %vm322_vm4, %v6927_v57, %v1202_v35  ;;  %v1218_v25 = vsel %vm322_vm4, %v1202_v35, %v10463_v62  ;;  %v1227_v45 = vmul.f32 %v1217_v19, %v10454_v48  ;;  %v1230_v39 = vmul.f32 %v1205_v11, %v10456_v8  ;;  %v10470_v20 = vld [vmem:[#allocation25_spill] sm:$0xff] }
 0x351   :  { %5218 = vmatprep.subr.bf16.mxu1 %v5217_v16  ;;  %v1231_v14 = vmul.f32 %v1218_v25, %v10454_v48  ;;  %v1234_v30 = vmul.f32 %v1206_v41, %v10456_v8  ;;  %5148 = vmatpush1.bf16.msra.mxu0 %v5147_v28  ;;  %v7314_v15 = vmul.f32 %v1303_v61, %v10468_v23  ;;  %v10474_v11 = vld [vmem:[#allocation53_spill] sm:$0xff]  ;;  %v10478_v25 = vld [vmem:[#allocation52_spill] sm:$0xff] }
 0x352   :  { %v7317_v57 = vmul.f32 %v1308_v21, %v10462_v38  ;;  %v7320_v63 = vmul.f32 %v1304_v26, %v10468_v23  ;;  %v1300_v62 = vsel %vm392_vm5, %v10464_v36, %v10469_v54  ;;  %5150 = vmatprep.subr.bf16.mxu0 %v5149_v2  ;;  %v1312_v28 = vsel %vm392_vm5, %v10469_v54, %v10466_v50  ;;  %v10472_v36 = vld [vmem:[#allocation55_spill] sm:$0xff]  ;;  %v10475_v21 = vld [vmem:[#allocation74_spill] sm:$0xff] }
 0x353   :  { %v1229_v61 = vmul.f32 %v1209_v40, %v6196_v42  ;;  %v5151_v44 = vpack.c.bf16 %v1231_v14, %v1227_v45  ;;  %v7331_v56 = vpop.permute.xlu0 %1513  ;;  %v5221_v16 = vpack.c.bf16 %v1234_v30, %v1230_v39  ;;  %v7334_v12 = vmul.f32 %v1299_v37, %v10470_v20  ;;  %v10476_v2 = vld [vmem:[#allocation54_spill] sm:$0xff]  ;;  %v10477_v40 = vld [vmem:[#allocation71_spill] sm:$0xff]  ;;  %v10481_v30 = vld [vmem:[#allocation28_spill] sm:$0xff] }
 0x354   :  { %5220 = vmatpush1.bf16.msra.mxu1 %v5219_v49  ;;  %v7337_v22 = vmul.f32 %v1311_v53, %v10471_v6  ;;  %v1384_v26 = vsel %vm454_vm6, %v10473_v1, %v10472_v36  ;;  %v1388_v19 = vsel %vm454_vm6, %v10474_v11, %v10473_v1  ;;  %v1280_v49 = vpop.permute.xlu1 %1279  ;;  %v7348_v50 = vmul.f32 %v1300_v62, %v10470_v20  ;;  %v10480_v39 = vld [vmem:[#allocation27_spill] sm:$0xff]  ;;  %v10482_v62 = vld [vmem:[#allocation73_spill] sm:$0xff]  ;;  %v10485_v1 = vld [vmem:[#allocation56_spill] sm:$0xff] }
 0x355   :  { %v1380_v47 = vsel %vm454_vm6, %v10472_v36, %v10475_v21  ;;  %v5223_v37 = vpack.c.bf16 %v1233_v24, %v1229_v61  ;;  %5152 = vmatpush1.bf16.msra.mxu0 %v5151_v44  ;;  %5222 = vmatprep.subr.bf16.mxu1 %v5221_v16  ;;  %v1322_v35 = vmul.f32 %v1312_v28, %v10471_v6  ;;  %v10484_v36 = vld [vmem:[#allocation75_spill] sm:$0xff] }
 0x356   :  { %v1383_v41 = vsel %vm454_vm6, %v10477_v40, %v10476_v2  ;;  %v1387_v45 = vsel %vm454_vm6, %v10478_v25, %v10477_v40  ;;  %v10479_v24 = vpack.c.bf16 %v6506_v0, %v6499_v13  ;;  %v7369_v14 = vmul.f32 %v1388_v19, %v10480_v39  ;;  %v10483_v0 = vld [vmem:[#allocation29_spill] sm:$0xff]  ;;  %v10487_v40 = vld [vmem:[#allocation58_spill] sm:$0xff] }
 0x357   :  { %v7372_v54 = vmul.f32 %v1384_v26, %v10481_v30  ;;  %v1379_v28 = vsel %vm454_vm6, %v10476_v2, %v10482_v62  ;;  %v1392_v61 = vsel %vm454_vm6, %v10475_v21, %v10474_v11  ;;  %v7382_v44 = vpop.permute.xlu0 %1529  ;;  %v1391_v13 = vsel %vm454_vm6, %v10482_v62, %v10478_v25 }
 0x358   :  { %5154 = vmatprep.subr.bf16.mxu0 %v10479_v24  ;;  %5224 = vmatpush1.bf16.msra.mxu1 %v5223_v37  ;;  %v7389_v16 = vmul.f32 %v1380_v47, %v10483_v0  ;;  %v1467_v26 = vsel %vm516_vm7, %v10485_v1, %v10484_v36  ;;  %v10486_v19 = vpack.c.bf16 %v6515_v31, %v6508_v27  ;;  %v1296_v11 = vpop.permute.xlu1 %1295  ;;  %v10488_v27 = vld [vmem:[#allocation40_spill] sm:$0xff]  ;;  %v10489_v31 = vld [vmem:[#allocation39_spill] sm:$0xff] }
 0x359   :  { %v5161_v21 = vpack.c.bf16 %v7320_v63, %v7314_v15  ;;  %v5235_v37 = vpack.c.bf16 %v7348_v50, %v7334_v12  ;;  %v7403_v2 = vmul.f32 %v1387_v45, %v10480_v39  ;;  %v7406_v47 = vmul.f32 %v1383_v41, %v10481_v30  ;;  %v10491_v63 = vld [vmem:[#allocation30_spill] sm:$0xff]  ;;  %v10492_v50 = vld [vmem:[#allocation92_spill] sm:$0xff] }
 0x35a   :  { %5226 = vmatprep.subr.bf16.mxu1 %v10486_v19  ;;  %v1463_v25 = vsel %vm516_vm7, %v10484_v36, %v10487_v40  ;;  %v10490_v24 = vpack.c.bf16 %v10488_v27, %v10489_v31  ;;  %v7416_v15 = vmul.f32 %v1379_v28, %v10483_v0  ;;  %v7419_v12 = vmul.f32 %v1392_v61, %v10491_v63  ;;  %v10494_v28 = vld [vmem:[#allocation31_spill] sm:$0xff]  ;;  %v10495_v61 = vld [vmem:[#allocation42_spill] sm:$0xff]  ;;  %v10496_v31 = vld [vmem:[#allocation41_spill] sm:$0xff] }
 0x35b   :  { %v1305_v41 = vsel %vm392_vm5, %v1280_v49, %v10492_v50  ;;  %v10493_v45 = vpack.c.bf16 %v6739_v60, %v6720_v3  ;;  %v5233_v62 = vpack.c.bf16 %v1322_v35, %v7337_v22  ;;  %v7431_v19 = vmul.f32 %v1391_v13, %v10491_v63  ;;  %v1282_v53 = vpop.permute.xlu0 %1281  ;;  %v10498_v22 = vld [vmem:[#allocation32_spill] sm:$0xff] }
 0x35c   :  { %5156 = vmatpush1.bf16.msra.mxu0 %v10490_v24  ;;  %v7434_v27 = vmul.f32 %v1467_v26, %v10494_v28  ;;  %v10497_v24 = vpack.c.bf16 %v10495_v61, %v10496_v31  ;;  %v5169_v3 = vpack.c.bf16 %v7372_v54, %v7406_v47  ;;  %v7444_v35 = vmul.f32 %v1463_v25, %v10498_v22  ;;  %v10500_v26 = vld [vmem:[#allocation91_spill] sm:$0xff]  ;;  %v1360_v31 = vpop.permute.xlu1 %1359  ;;  %v10502_v54 = vld [vmem:[#allocation76_spill] sm:$0xff]  ;;  %v10503_v47 = vld [vmem:[#allocation57_spill] sm:$0xff] }
 0x35d   :  { %5158 = vmatprep.subr.bf16.mxu0 %v10493_v45  ;;  %v10499_v45 = vld [vmem:[#allocation93_spill] sm:$0xff]  ;;  %v1310_v36 = vsel %vm392_vm5, %v10500_v26, %v1282_v53  ;;  %v10501_v61 = vpack.c.bf16 %v6768_v5, %v6748_v7  ;;  %v10504_v25 = vld [vmem:[#allocation90_spill] sm:$0xff]  ;;  %v1324_v8 = vmul.f32 %v1305_v41, %v10468_v23  ;;  %v10507_v7 = vld [vmem:[#allocation59_spill] sm:$0xff]  ;;  %v5241_v41 = vpack.c.bf16 %v7419_v12, %v7431_v19 }
 0x35e   :  { %5228 = vmatpush1.bf16.msra.mxu1 %v10497_v24  ;;  %v1306_v13 = vsel %vm392_vm5, %v1282_v53, %v10499_v45  ;;  %v1468_v24 = vsel %vm516_vm7, %v10503_v47, %v10502_v54  ;;  %v1309_v60 = vsel %vm392_vm5, %v10504_v25, %v1280_v49  ;;  %v10505_v53 = vld [vmem:[#allocation43_spill] sm:$0xff]  ;;  %v1464_v5 = vsel %vm516_vm7, %v10502_v54, %v10507_v7  ;;  %v10509_v54 = vld [vmem:[#allocation45_spill] sm:$0xff] }
 0x35f   :  { %5230 = vmatprep.subr.bf16.mxu1 %v10501_v61  ;;  %v1328_v48 = vmul.f32 %v1306_v13, %v10468_v23  ;;  %v10506_v42 = vpack.c.bf16 %v6603_v55, %v10505_v53  ;;  %v1301_v61 = vsel %vm392_vm5, %v10492_v50, %v1296_v11  ;;  %v1313_v49 = vsel %vm392_vm5, %v1296_v11, %v10504_v25  ;;  %v10508_v13 = vld [vmem:[#allocation77_spill] sm:$0xff]  ;;  %v10510_v53 = vld [vmem:[#allocation44_spill] sm:$0xff]  ;;  %v1298_v11 = vpop.permute.xlu0 %1297 }
 0x360   :  { %v1459_v55 = vsel %vm516_vm7, %v10487_v40, %v10508_v13  ;;  %v1327_v50 = vmul.f32 %v1310_v36, %v10462_v38  ;;  %v10511_v23 = vpack.c.bf16 %v10509_v54, %v10510_v53  ;;  %v7492_v12 = vmul.f32 %v1468_v24, %v10494_v28  ;;  %v1376_v36 = vpop.permute.xlu1 %1375  ;;  %v10513_v24 = vld [vmem:[#allocation33_spill] sm:$0xff]  ;;  %v10516_v54 = vld [vmem:[#allocation78_spill] sm:$0xff] }
 0x361   :  { %5160 = vmatpush1.bf16.msra.mxu0 %v10506_v42  ;;  %v1471_v42 = vsel %vm516_vm7, %v10508_v13, %v10485_v1  ;;  %v1323_v19 = vmul.f32 %v1309_v60, %v10462_v38  ;;  %v1302_v40 = vsel %vm392_vm5, %v10499_v45, %v1298_v11  ;;  %v1314_v1 = vsel %vm392_vm5, %v1298_v11, %v10500_v26 }
 0x362   :  { %5162 = vmatprep.subr.bf16.mxu0 %v5161_v21  ;;  %5232 = vmatpush1.bf16.msra.mxu1 %v10511_v23  ;;  %v5165_v21 = vpack.c.bf16 %v1328_v48, %v1324_v8  ;;  %v1325_v25 = vmul.f32 %v1301_v61, %v10470_v20  ;;  %v1326_v23 = vmul.f32 %v1313_v49, %v10471_v6  ;;  %v10515_v61 = vld [vmem:[#allocation96_spill] sm:$0xff] }
 0x363   :  { %5234 = vmatprep.subr.bf16.mxu1 %v5233_v62  ;;  %v1329_v48 = vmul.f32 %v1302_v40, %v10470_v20  ;;  %v1330_v8 = vmul.f32 %v1314_v1, %v10471_v6  ;;  %v10512_v60 = vpack.c.bf16 %v7317_v57, %v7265_v46  ;;  %v7509_v45 = vmul.f32 %v1464_v5, %v10498_v22  ;;  %v10514_v62 = vld [vmem:[#allocation34_spill] sm:$0xff]  ;;  %v1362_v5 = vpop.permute.xlu0 %1361  ;;  %v10517_v40 = vld [vmem:[#allocation97_spill] sm:$0xff]  ;;  %v10518_v1 = vld [vmem:[#allocation95_spill] sm:$0xff] }
 0x364   :  { %v7512_v13 = vmul.f32 %v1459_v55, %v10513_v24  ;;  %v7515_v26 = vmul.f32 %v1471_v42, %v10514_v62  ;;  %v1385_v49 = vsel %vm454_vm6, %v1360_v31, %v10515_v61  ;;  %v1460_v46 = vsel %vm516_vm7, %v10507_v7, %v10516_v54 }
 0x365   :  { %5164 = vmatpush1.bf16.msra.mxu0 %v10512_v60  ;;  %v5167_v57 = vpack.c.bf16 %v1327_v50, %v1323_v19  ;;  %v5239_v53 = vpack.c.bf16 %v1329_v48, %v1325_v25  ;;  %v5237_v11 = vpack.c.bf16 %v1330_v8, %v1326_v23  ;;  %v1472_v42 = vsel %vm516_vm7, %v10516_v54, %v10503_v47  ;;  %v1440_v50 = vpop.permute.xlu1 %1439  ;;  %v10520_v19 = vld [vmem:[#allocation79_spill] sm:$0xff]  ;;  %v10521_v23 = vld [vmem:[#allocation94_spill] sm:$0xff] }
 0x366   :  { %5166 = vmatprep.subr.bf16.mxu0 %v5165_v21  ;;  %5236 = vmatpush1.bf16.msra.mxu1 %v5235_v37  ;;  %v1386_v21 = vsel %vm454_vm6, %v1362_v5, %v10517_v40  ;;  %v1390_v7 = vsel %vm454_vm6, %v10518_v1, %v1362_v5  ;;  %v10519_v37 = vld [vmem:[#allocation62_spill] sm:$0xff]  ;;  %v1389_v48 = vsel %vm454_vm6, %v10521_v23, %v1360_v31 }
 0x367   :  { %v1543_v25 = vsel %vm578_vm8, %v10520_v19, %v10519_v37  ;;  %v1404_v47 = vmul.f32 %v1385_v49, %v10481_v30  ;;  %v1408_v8 = vmul.f32 %v1386_v21, %v10481_v30  ;;  %v7546_v60 = vmul.f32 %v1460_v46, %v10513_v24  ;;  %5238 = vmatprep.subr.bf16.mxu1 %v5237_v11  ;;  %v10522_v49 = vld [vmem:[#allocation60_spill] sm:$0xff]  ;;  %v1378_v21 = vpop.permute.xlu0 %1377 }
 0x368   :  { %v1381_v54 = vsel %vm454_vm6, %v10515_v61, %v1376_v36  ;;  %v1393_v5 = vsel %vm454_vm6, %v1376_v36, %v10521_v23  ;;  %v1482_v31 = vmul.f32 %v1472_v42, %v10514_v62  ;;  %v1407_v46 = vmul.f32 %v1390_v7, %v10480_v39 }
 0x369   :  { %5168 = vmatpush1.bf16.msra.mxu0 %v5167_v57  ;;  %v1547_v57 = vsel %vm578_vm8, %v10522_v49, %v10520_v19  ;;  %v5173_v55 = vpack.c.bf16 %v1408_v8, %v1404_v47  ;;  %v1403_v61 = vmul.f32 %v1389_v48, %v10480_v39  ;;  %v1382_v36 = vsel %vm454_vm6, %v10517_v40, %v1378_v21  ;;  %v1456_v11 = vpop.permute.xlu1 %1455  ;;  %v10525_v47 = vld [vmem:[#allocation36_spill] sm:$0xff] }
 0x36a   :  { %5170 = vmatprep.subr.bf16.mxu0 %v5169_v3  ;;  %5240 = vmatpush1.bf16.msra.mxu1 %v5239_v53  ;;  %v1394_v3 = vsel %vm454_vm6, %v1378_v21, %v10518_v1  ;;  %v5177_v42 = vpack.c.bf16 %v7509_v45, %v7444_v35  ;;  %v1405_v7 = vmul.f32 %v1381_v54, %v10483_v0  ;;  %v10526_v45 = vld [vmem:[#allocation100_spill] sm:$0xff] }
 0x36b   :  { %5242 = vmatprep.subr.bf16.mxu1 %v5241_v41  ;;  %v1406_v53 = vmul.f32 %v1393_v5, %v10491_v63  ;;  %v1409_v19 = vmul.f32 %v1382_v36, %v10483_v0  ;;  %v1410_v23 = vmul.f32 %v1394_v3, %v10491_v63  ;;  %v10523_v40 = vpack.c.bf16 %v7369_v14, %v7403_v2  ;;  %v10524_v41 = vld [vmem:[#allocation35_spill] sm:$0xff]  ;;  %v1442_v2 = vpop.permute.xlu0 %1441  ;;  %v10530_v36 = vld [vmem:[#allocation61_spill] sm:$0xff] }
 0x36c   :  { %v5251_v1 = vpack.c.bf16 %v7546_v60, %v7512_v13  ;;  %v7579_v48 = vmul.f32 %v1547_v57, %v10524_v41  ;;  %v7582_v35 = vmul.f32 %v1543_v25, %v10525_v47  ;;  %v1465_v8 = vsel %vm516_vm7, %v1440_v50, %v10526_v45  ;;  %v10528_v60 = vld [vmem:[#allocation63_spill] sm:$0xff]  ;;  %v10529_v57 = vld [vmem:[#allocation80_spill] sm:$0xff] }
 0x36d   :  { %5172 = vmatpush1.bf16.msra.mxu0 %v10523_v40  ;;  %v5175_v54 = vpack.c.bf16 %v1407_v46, %v1403_v61  ;;  %v5247_v5 = vpack.c.bf16 %v1409_v19, %v1405_v7  ;;  %v10527_v14 = vpack.c.bf16 %v7389_v16, %v7416_v15  ;;  %v5245_v21 = vpack.c.bf16 %v1410_v23, %v1406_v53  ;;  %v10531_v46 = vld [vmem:[#allocation101_spill] sm:$0xff]  ;;  %v10532_v16 = vld [vmem:[#allocation99_spill] sm:$0xff]  ;;  %v1520_v3 = vpop.permute.xlu1 %1519 }
 0x36e   :  { %5174 = vmatprep.subr.bf16.mxu0 %v5173_v55  ;;  %v5249_v13 = vpack.c.bf16 %v1482_v31, %v7515_v26  ;;  %v1544_v25 = vsel %vm578_vm8, %v10529_v57, %v10528_v60  ;;  %v1548_v55 = vsel %vm578_vm8, %v10530_v36, %v10529_v57  ;;  %v1466_v61 = vsel %vm516_vm7, %v1442_v2, %v10531_v46  ;;  %v10533_v26 = vld [vmem:[#allocation98_spill] sm:$0xff]  ;;  %v10534_v19 = vld [vmem:[#allocation81_spill] sm:$0xff] }
 0x36f   :  { %5244 = vmatpush1.bf16.msra.mxu1 %v10527_v14  ;;  %v1470_v15 = vsel %vm516_vm7, %v10532_v16, %v1442_v2  ;;  %v1469_v31 = vsel %vm516_vm7, %v10533_v26, %v1440_v50  ;;  %v1484_v7 = vmul.f32 %v1465_v8, %v10498_v22  ;;  %v1488_v53 = vmul.f32 %v1466_v61, %v10498_v22  ;;  %v10535_v14 = vld [vmem:[#allocation82_spill] sm:$0xff] }
 0x370   :  { %5246 = vmatprep.subr.bf16.mxu1 %v5245_v21  ;;  %v1539_v23 = vsel %vm578_vm8, %v10519_v37, %v10534_v19  ;;  %v1551_v40 = vsel %vm578_vm8, %v10534_v19, %v10522_v49  ;;  %v1461_v50 = vsel %vm516_vm7, %v10526_v45, %v1456_v11  ;;  %v1473_v8 = vsel %vm516_vm7, %v1456_v11, %v10533_v26  ;;  %v1458_v49 = vpop.permute.xlu0 %1457  ;;  %v10537_v26 = vld [vmem:[#allocation38_spill] sm:$0xff] }
 0x371   :  { %5176 = vmatpush1.bf16.msra.mxu0 %v5175_v54  ;;  %v1560_v54 = vmul.f32 %v1544_v25, %v10525_v47  ;;  %v1552_v37 = vsel %vm578_vm8, %v10535_v14, %v10530_v36  ;;  %v1487_v2 = vmul.f32 %v1470_v15, %v10494_v28  ;;  %v5181_v21 = vpack.c.bf16 %v1488_v53, %v1484_v7  ;;  %v1528_v25 = vpop.permute.xlu1 %1527  ;;  %v10538_v7 = vld [vmem:[#allocation37_spill] sm:$0xff] }
 0x372   :  { %5178 = vmatprep.subr.bf16.mxu0 %v5177_v42  ;;  %v1540_v45 = vsel %vm578_vm8, %v10528_v60, %v10535_v14  ;;  %v1483_v11 = vmul.f32 %v1469_v31, %v10494_v28  ;;  %v1462_v42 = vsel %vm516_vm7, %v10531_v46, %v1458_v49  ;;  %v1474_v57 = vsel %vm516_vm7, %v1458_v49, %v10532_v16 }
 0x373   :  { %5248 = vmatpush1.bf16.msra.mxu1 %v5247_v5  ;;  %v1485_v5 = vmul.f32 %v1461_v50, %v10513_v24  ;;  %v1486_v36 = vmul.f32 %v1473_v8, %v10514_v62  ;;  %v1489_v61 = vmul.f32 %v1462_v42, %v10513_v24  ;;  %v1490_v60 = vmul.f32 %v1474_v57, %v10514_v62 }
 0x374   :  { %5250 = vmatprep.subr.bf16.mxu1 %v5249_v13  ;;  %v10536_v15 = vpack.c.bf16 %v7492_v12, %v7434_v27  ;;  %v1559_v46 = vmul.f32 %v1548_v55, %v10524_v41  ;;  %v1558_v31 = vmul.f32 %v1551_v40, %v10537_v26  ;;  %v1562_v16 = vmul.f32 %v1552_v37, %v10537_v26  ;;  %v1522_v8 = vpop.permute.xlu0 %1521 }
 0x375   :  { %v1545_v13 = vsel %vm578_vm8, %v1520_v3, %v1528_v25  ;;  %v1561_v53 = vmul.f32 %v1540_v45, %v10538_v7  ;;  %v5183_v19 = vpack.c.bf16 %v1487_v2, %v1483_v11  ;;  %v5255_v50 = vpack.c.bf16 %v1489_v61, %v1485_v5  ;;  %v1536_v40 = vpop.permute.xlu1 %1535 }
 0x376   :  { %5180 = vmatpush1.bf16.msra.mxu0 %v10536_v15  ;;  %v5253_v14 = vpack.c.bf16 %v1490_v60, %v1486_v36  ;;  %v1549_v27 = vsel %vm578_vm8, %v7307_v4, %v1520_v3  ;;  %v1546_v12 = vsel %vm578_vm8, %v1522_v8, %v7382_v44  ;;  %v1550_v55 = vsel %vm578_vm8, %v7331_v56, %v1522_v8 }
 0x377   :  { %5182 = vmatprep.subr.bf16.mxu0 %v5181_v21  ;;  %5252 = vmatpush1.bf16.msra.mxu1 %v5251_v1  ;;  %v5185_v37 = vpack.c.bf16 %v1560_v54, %v7582_v35  ;;  %v1557_v2 = vmul.f32 %v1539_v23, %v10538_v7  ;;  %v1564_v1 = vmul.f32 %v1545_v13, %v10525_v47  ;;  %v923_v21 = vld [vmem:[#allocation6] sm:$0xff]  ;;  %v10242_v13 = vmov 0.0  }
 0x378   :  { %v1568_v49 = vmul.f32 %v1546_v12, %v10525_v47  ;;  %v1541_v3 = vsel %vm578_vm8, %v1528_v25, %v1536_v40  ;;  %v5187_v45 = vpack.c.bf16 %v1559_v46, %v7579_v48  ;;  %v1553_v11 = vsel %vm578_vm8, %v1536_v40, %v7307_v4  ;;  %5254 = vmatprep.subr.bf16.mxu1 %v5253_v14  ;;  %v927_v54 = vld [vmem:[#allocation6 + $0x20] sm:$0xff]  ;;  %v1538_v5 = vpop.permute.xlu0 %1537  ;;  %v926_v46 = vld [vmem:[#allocation6 + $0x18] sm:$0xff] }
 0x379   :  { %v5257_v35 = vpack.c.bf16 %v1562_v16, %v1558_v31  ;;  %v5259_v23 = vpack.c.bf16 %v1561_v53, %v1557_v2  ;;  %v1563_v42 = vmul.f32 %v1549_v27, %v10524_v41  ;;  %v1567_v57 = vmul.f32 %v1550_v55, %v10524_v41  ;;  %v928_v53 = vld [vmem:[#allocation6 + $0x28] sm:$0xff] }
 0x37a   :  { %5184 = vmatpush1.bf16.msra.mxu0 %v5183_v19  ;;  %v5189_v25 = vpack.c.bf16 %v1568_v49, %v1564_v1  ;;  %v1565_v36 = vmul.f32 %v1541_v3, %v10538_v7  ;;  %v1542_v48 = vsel %vm578_vm8, %v7382_v44, %v1538_v5  ;;  %v1554_v4 = vsel %vm578_vm8, %v1538_v5, %v7331_v56  ;;  %v925_v56 = vld [vmem:[#allocation6 + $0x10] sm:$0xff] }
 0x37b   :  { %5186 = vmatprep.subr.bf16.mxu0 %v5185_v37  ;;  %5256 = vmatpush1.bf16.msra.mxu1 %v5255_v50  ;;  %v1566_v61 = vmul.f32 %v1553_v11, %v10537_v26  ;;  %v1569_v60 = vmul.f32 %v1542_v48, %v10538_v7  ;;  %v1570_v15 = vmul.f32 %v1554_v4, %v10537_v26  ;;  %v10241_v48 = vmov 0.0|0.0   ;;  %v2077_v4 = vld [vmem:[%s10125_s7] sm:$0xf] }
 0x37c   :  { %5258 = vmatprep.subr.bf16.mxu1 %v5257_v35  ;;  %v5191_v31 = vpack.c.bf16 %v1567_v57, %v1563_v42 }
 0x37d   :  { %1813 = vmatmul.mubr.f32.vlgmr.msra.gmra.mrb[8].mxu0 %v923_v21  ;;  %v5263_v16 = vpack.c.bf16 %v1569_v60, %v1565_v36  ;;  %v5261_v44 = vpack.c.bf16 %v1570_v15, %v1566_v61  ;;  %v2160_v36 = vld [vmem:[%s10127_s9 + $0x8] sm:$0xff] }
 0x37e   :  { %5188 = vmatpush1.bf16.msra.mxu0 %v5187_v45  ;;  %1818 = vmatprep.mubr.f32.mxu0 %v927_v54 }
 0x37f   :  { %1967 = vmatmul.mubr.f32.vlgmr.msra.gmra.mrb[8].mxu1 %v923_v21  ;;  %5190 = vmatprep.subr.bf16.mxu0 %v5189_v25  ;;  %v2159_v25 = vld [vmem:[%s10127_s9] sm:$0xff] }
 0x380   :  { %5260 = vmatpush1.bf16.msra.mxu1 %v5259_v23  ;;  %1972 = vmatprep.mubr.f32.mxu1 %v927_v54 }
 0x381   :  { %1819 = vmatmul.mubr.f32.gmra.mrb[10].mxu0 %v926_v46  ;;  %5262 = vmatprep.subr.bf16.mxu1 %v5261_v44 }
 0x382   :  { %5192 = vmatpush1.bf16.msra.mxu0 %v5191_v31  ;;  %1889 = vmatprep.mubr.f32.mxu0 %v10242_v13 }
 0x383   :  { %1973 = vmatmul.mubr.f32.gmra.mrb[10].mxu1 %v926_v46  ;;  %5265 = vmatprep.subr.bf16.mxu0 %v10241_v48 }
 0x384   :  { %5264 = vmatpush1.bf16.msra.mxu1 %v5263_v16  ;;  %2043 = vmatprep.mubr.f32.mxu1 %v10242_v13  ;;  %v1734_v19 = vpop.permute.xlu1 %1733 }
 0x385   :  { %4962 = vmatmul.mubr.msk.f32.vlgmr.msra.gmra.mrb[8].mxu0 %vm1741_vm9, %v925_v56 }
 0x386   :  { %1895 = vmatprep.mubr.f32.mxu0 %v10242_v13 }
 0x387   :  { %4964 = vmatmul.mubr.msk.f32.vlgmr.msra.gmra.mrb[8].mxu1 %vm1741_vm9, %v925_v56 }
 0x388   :  { %2049 = vmatprep.mubr.f32.mxu1 %v10242_v13  ;;  %v1739_v40 = vpop.permute.xlu0 %1738 }
 0x389   :  { %4963 = vmatmul.mubr.msk.f32.gmra.mrb[10].mxu0 %vm1741_vm9, %v928_v53 }
 0x38a   :  { %5029 = vmatprep.mubr.msk.f32.mxu0 %vm5770_vm10, %v10242_v13 }
 0x38b   :  { %4965 = vmatmul.mubr.msk.f32.gmra.mrb[10].mxu1 %vm1741_vm9, %v928_v53 }
 0x458   :  { %v1891_v50 = vpop.f32.mrb[8].mxu0 }
 0x459   :  { %v7693_v8 = vadd.f32 %v1891_v50, %v1734_v19  ;;  %v1893_v14 = vpop.f32.mrb[9].mxu0 }
 0x45a   :  { %v7695_v27 = vadd.f32 %v1893_v14, %v1734_v19  ;;  %v2045_v12 = vpop.f32.mrb[8].mxu1  ;;  %v2076_v14 = vld [vmem:[#allocation8] sm:$0xf] }
 0x45b   :  { %v2047_v55 = vpop.f32.mrb[9].mxu1  ;;  %v7705_v35 = vadd.f32 %v2045_v12, %v1734_v19  ;;  %v2157_v12 = vld [vmem:[%s10126_s8] sm:$0xff] }
 0x45c   :  { %v2056_v37 = vadd.f32 %v7695_v27, %v7693_v8  ;;  %v1897_v2 = vpop.f32.mrb[10].mxu0  ;;  %v7707_v54 = vadd.f32 %v2047_v55, %v1734_v19  ;;  %5034 = vmatprep.mubr.msk.f32.mxu1 %vm2171_vm12, %v2157_v12 }
 0x45d   :  { %v7699_v1 = vadd.f32 %v1897_v2, %v1739_v40  ;;  %v1899_v49 = vpop.f32.mrb[11].mxu0 }
 0x45e   :  { %v7701_v3 = vadd.f32 %v1899_v49, %v1739_v40  ;;  %v2051_v21 = vpop.f32.mrb[10].mxu1  ;;  %2057 = vadd.xlane.f32.xlu1 %v2056_v37  ;;  %v2065_v5 = vadd.f32 %v7707_v54, %v7705_v35 }
 0x45f   :  { %v7703_v45 = vadd.f32 %v2051_v21, %v1739_v40  ;;  %v2053_v11 = vpop.f32.mrb[11].mxu1  ;;  %v2158_v21 = vld [vmem:[%s10126_s8 + $0x8] sm:$0xff] }
 0x460   :  { %v2059_v23 = vadd.f32 %v7701_v3, %v7699_v1  ;;  %v7711_v42 = vadd.f32 %v2053_v11, %v1739_v40 }
 0x462   :  { %v2068_v57 = vadd.f32 %v7711_v42, %v7703_v45  ;;  %2060 = vadd.xlane.f32.xlu0 %v2059_v23 }
 0x464   :  { %2069 = vadd.xlane.f32.xlu1 %v2068_v57 }
 0x466   :  { %2066 = vadd.xlane.f32.xlu0 %v2065_v5 }
 0x475   :  { %2163 = vperm.xlu1 %5615, %v2159_v25  }
 0x479   :  { %2168 = vperm.xlu1 %5615, %v2160_v36  }
 0x47c   :  { %2080 = vperm.xlu0 %5614, %v2077_v4  }
 0x4eb   :  { %v2058_v61 = vpop.xlane.xlu1 %2057 }
 0x4ec   :  { %v2063_v44 = vmul.f32 0.00390625, %v2058_v61 }
 0x4ef   :  { %v2061_v60 = vpop.xlane.xlu0 %2060 }
 0x4f0   :  { %v2064_v46 = vmul.f32 0.00390625, %v2061_v60 }
 0x4f1   :  { %v2070_v15 = vpop.xlane.xlu1 %2069 }
 0x4f2   :  { %v2072_v31 = vmul.f32 0.00390625, %v2070_v15 }
 0x4f3   :  { %v2067_v16 = vpop.xlane.xlu0 %2066 }
 0x4f4   :  { %v2071_v56 = vmul.f32 0.00390625, %v2067_v16  ;;  %v2075_v53 = vsel %vm2073_vm11, %v2064_v46, %v2072_v31 }
 0x4f5   :  { %v2164_v11 = vpop.permute.xlu1 %2163 }
 0x4f6   :  { %v2074_v19 = vsel %vm2073_vm11, %v2063_v44, %v2071_v56 }
 0x4f7   :  { %v5266_v50 = vpack.c.bf16 %v2075_v53, %v2074_v19  ;;  %v10239_v19 = vmov 1  }
 0x4f9   :  { %5267 = vmatpush3.bf16.msra.mxu0 %v5266_v50  ;;  %v2169_v23 = vpop.permute.xlu1 %2168  ;;  %v10539_v50 = vmov 0  }
 0x4fb   :  { %v2081_v55 = vpop.permute.xlu0 %2080 }
 0x4fc   :  { %5030 = vmatmul.mubr.msk.f32.vlgmr.msra.gmra.mrb[12].mxu0 %vm716_vm0, %v2076_v14  ;;  %v5640_v14 = vld [vmem:[%s10118_s0 + $0x20] sm:$0xff] }
 0x4fd   :  { %v2301_v12 = vmul.f32 0.5, %v5640_v14 }
 0x5cf   :  { %v2152_v40 = vpop.f32.mrb[12].mxu0 }
 0x5d0   :  { %v2153_v37 = vadd.f32 %v2152_v40, %v2081_v55  ;;  %v5031_v2 = vpop.f32.mrb[13].mxu0  ;;  %v5641_v40 = vld [vmem:[%s10118_s0] sm:$0xff] }
 0x5d2   :  { %v2156_v49 = vmax.f32 %v2153_v37, 0.0  ;;  %v2297_v37 = vmul.f32 0.5, %v5641_v40 }
 0x5d4   :  { %5032 = vmatprep.subr.msk.mxu1 %vm2178_vm13, %v2156_v49 }
 0x5d5   :  { %5033 = vmatpush3.msk.msra.mxu1 %vm2178_vm13, %v2156_v49 }
 0x5d6   :  { %5035 = vmatmul.mubr.msk.f32.vlgmr.msra.gmra.mrb[12].mxu1 %vm2171_vm12, %v2158_v21 }
 0x6a9   :  { %v5036_v57 = vpop.f32.mrb[12].mxu1 }
 0x6aa   :  { %v2254_v5 = vadd.f32 %v5036_v57, %v2169_v23  ;;  %v2248_v25 = vpop.f32.mrb[13].mxu1 }
 0x6ab   :  { %v2249_v36 = vadd.f32 %v2248_v25, %v2164_v11  ;;  %v5642_v11 = vld [vmem:[%s10118_s0 + $0x28] sm:$0xff] }
 0x6ac   :  { %v4971_v4 = vmul.f32 -2.0, %v2254_v5  ;;  %v2302_v23 = vmul.f32 0.5, %v5642_v11  ;;  %v5643_v25 = vld [vmem:[%s10118_s0 + $0x8] sm:$0xff] }
 0x6ad   :  { %v4970_v61 = vmul.f32 -2.0, %v2249_v36  ;;  %v2298_v36 = vmul.f32 0.5, %v5643_v25 }
 0x6ae   :  { %v2263_v60 = vmul.f32 1.442695, %v4971_v4 }
 0x6af   :  { %v2261_v15 = vmul.f32 1.442695, %v4970_v61 }
 0x6b0   :  { %5624 = vpow2.f32 %v2263_v60  ;;  %v5644_v60 = vld [vmem:[%s10118_s0 + $0x30] sm:$0xff] }
 0x6b1   :  { %5626 = vpow2.f32 %v2261_v15  ;;  %v2303_v15 = vmul.f32 0.5, %v5644_v60 }
 0x6ba   :  { %v5625_v46 = vpop.eup %5624 }
 0x6bb   :  { %v5627_v31 = vpop.eup %5626  ;;  %v2266_v16 = vadd.f32 1.0, %v5625_v46 }
 0x6bc   :  { %v2265_v44 = vadd.f32 1.0, %v5627_v31  ;;  %v5645_v31 = vld [vmem:[%s10118_s0 + $0x10] sm:$0xff] }
 0x6bd   :  { %5628 = vrcp.f32 %v2266_v16  ;;  %v2299_v16 = vmul.f32 0.5, %v5645_v31 }
 0x6be   :  { %5630 = vrcp.f32 %v2265_v44 }
 0x6c7   :  { %v5629_v56 = vpop.eup %5628 }
 0x6c8   :  { %v5631_v53 = vpop.eup %5630  ;;  %2278 = vperm.xlu1 %5615, %v5629_v56  }
 0x6c9   :  { %2273 = vperm.xlu0 %5614, %v5631_v53  }
 0x6cc   :  { %5616 = vset.pattern.permute.xlu1 %v10239_v19 }
 0x6cd   :  { %5617 = vset.pattern.permute.xlu0 %v10239_v19  ;;  %2290 = vperm.xlu1 %5616, %v5629_v56   ;;  %v5646_v56 = vld [vmem:[%s10118_s0 + $0x38] sm:$0xff] }
 0x6ce   :  { %2286 = vperm.xlu0 %5617, %v5631_v53  }
 0x6d1   :  { %5618 = vset.pattern.permute.xlu1 %v10539_v50 }
 0x6d2   :  { %5619 = vset.pattern.permute.xlu0 %v10539_v50 }
 0x747   :  { %v2279_v55 = vpop.permute.xlu1 %2278 }
 0x748   :  { %v2283_v2 = vmul.f32 %v7699_v1, %v2279_v55  ;;  %v2274_v49 = vpop.permute.xlu0 %2273  ;;  %v2284_v57 = vmul.f32 %v7701_v3, %v2279_v55 }
 0x749   :  { %v2281_v21 = vmul.f32 %v7693_v8, %v2274_v49  ;;  %v2282_v4 = vmul.f32 %v7695_v27, %v2274_v49  ;;  %v4973_v49 = vld [vmem:[%s10120_s2 + $0x48] sm:$0xff] }
 0x74a   :  { %v7758_v5 = vadd.f32 %v2301_v12, %v2283_v2  ;;  %v7770_v3 = vadd.f32 %v2302_v23, %v2284_v57  ;;  %v5647_v12 = vld [vmem:[%s10118_s0 + $0x18] sm:$0xff]  ;;  %4984 = vmatprep.mubr.msk.f32.mxu0 %vm716_vm0, %v4973_v49  ;;  %4988 = vmatprep.mubr.msk.f32.mxu1 %vm716_vm0, %v4973_v49  ;;  %v10548_v57 = vld [vmem:[#allocation13_spill] sm:$0xff] }
 0x74b   :  { %v7764_v1 = vadd.f32 %v2297_v37, %v2281_v21  ;;  %v7776_v27 = vadd.f32 %v2298_v36, %v2282_v4 }
 0x74c   :  { %10540 = vst [vmem:[#allocation83_spill] sm:$0xff] %v7758_v5  ;;  %2329 = vrot.lane.b32.xlu0 %v7758_v5, %s5759_s30  ;;  %v2291_v8 = vpop.permute.xlu1 %2290  ;;  %10542 = vst [vmem:[#allocation64_spill] sm:$0xff] %v7770_v3 }
 0x74d   :  { %10541 = vst [vmem:[#allocation47_spill] sm:$0xff] %v7764_v1  ;;  %v2287_v61 = vpop.permute.xlu0 %2286  ;;  %2327 = vrot.lane.b32.xlu1 %v7764_v1, %s5759_s30  ;;  %v2295_v46 = vmul.f32 %v7703_v45, %v2291_v8  ;;  %10543 = vst [vmem:[#allocation46_spill] sm:$0xff] %v7776_v27  ;;  %v2304_v45 = vmul.f32 0.5, %v5646_v56  ;;  %v2296_v53 = vmul.f32 %v7711_v42, %v2291_v8 }
 0x74e   :  { %v2293_v44 = vmul.f32 %v7705_v35, %v2287_v61  ;;  %v2300_v35 = vmul.f32 0.5, %v5647_v12  ;;  %v2294_v55 = vmul.f32 %v7707_v54, %v2287_v61 }
 0x74f   :  { %v7790_v14 = vadd.f32 %v2303_v15, %v2295_v46  ;;  %v7802_v37 = vadd.f32 %v2304_v45, %v2296_v53 }
 0x750   :  { %2333 = vrot.lane.b32.xlu0 %v7770_v3, %s5759_s30  ;;  %v7796_v40 = vadd.f32 %v2299_v16, %v2293_v44  ;;  %v7804_v42 = vadd.f32 %v2300_v35, %v2294_v55 }
 0x751   :  { %2331 = vrot.lane.b32.xlu1 %v7776_v27, %s5759_s30  ;;  %10544 = vst [vmem:[#allocation65_spill] sm:$0xff] %v7790_v14  ;;  %10546 = vst [vmem:[#allocation66_spill] sm:$0xff] %v7802_v37 }
 0x752   :  { %10545 = vst [vmem:[#allocation84_spill] sm:$0xff] %v7796_v40  ;;  %10547 = vst [vmem:[#allocation85_spill] sm:$0xff] %v7804_v42 }
 0x754   :  { %2337 = vrot.lane.b32.xlu0 %v7790_v14, %s5759_s30 }
 0x755   :  { %2335 = vrot.lane.b32.xlu1 %v7796_v40, %s5759_s30 }
 0x758   :  { %2341 = vrot.lane.b32.xlu0 %v7802_v37, %s5759_s30 }
 0x759   :  { %2339 = vrot.lane.b32.xlu1 %v7804_v42, %s5759_s30 }
 0x75c   :  { %2369 = vrot.lane.b32.xlu0 %v7758_v5, %s5760_s24 }
 0x75d   :  { %2367 = vrot.lane.b32.xlu1 %v7764_v1, %s5760_s24 }
 0x760   :  { %2373 = vrot.lane.b32.xlu0 %v7770_v3, %s5760_s24 }
 0x761   :  { %2371 = vrot.lane.b32.xlu1 %v7776_v27, %s5760_s24 }
 0x764   :  { %2377 = vrot.lane.b32.xlu0 %v7790_v14, %s5760_s24 }
 0x765   :  { %2375 = vrot.lane.b32.xlu1 %v7796_v40, %s5760_s24 }
 0x768   :  { %2381 = vrot.lane.b32.xlu0 %v7802_v37, %s5760_s24 }
 0x769   :  { %2379 = vrot.lane.b32.xlu1 %v7804_v42, %s5760_s24 }
 0x76c   :  { %2409 = vrot.lane.b32.xlu0 %v7758_v5, %s5761_s25 }
 0x76d   :  { %2407 = vrot.lane.b32.xlu1 %v7764_v1, %s5761_s25 }
 0x770   :  { %2413 = vrot.lane.b32.xlu0 %v7770_v3, %s5761_s25 }
 0x771   :  { %2411 = vrot.lane.b32.xlu1 %v7776_v27, %s5761_s25 }
 0x774   :  { %2417 = vrot.lane.b32.xlu0 %v7790_v14, %s5761_s25 }
 0x775   :  { %2415 = vrot.lane.b32.xlu1 %v7796_v40, %s5761_s25 }
 0x778   :  { %2421 = vrot.lane.b32.xlu0 %v7802_v37, %s5761_s25 }
 0x779   :  { %2419 = vrot.lane.b32.xlu1 %v7804_v42, %s5761_s25 }
 0x77c   :  { %2449 = vrot.lane.b32.xlu0 %v7758_v5, %s5762_s26 }
 0x77d   :  { %2447 = vrot.lane.b32.xlu1 %v7764_v1, %s5762_s26 }
 0x780   :  { %2453 = vrot.lane.b32.xlu0 %v7770_v3, %s5762_s26 }
 0x781   :  { %2451 = vrot.lane.b32.xlu1 %v7776_v27, %s5762_s26 }
 0x784   :  { %2457 = vrot.lane.b32.xlu0 %v7790_v14, %s5762_s26 }
 0x785   :  { %2455 = vrot.lane.b32.xlu1 %v7796_v40, %s5762_s26 }
 0x788   :  { %2461 = vrot.lane.b32.xlu0 %v7802_v37, %s5762_s26 }
 0x789   :  { %2459 = vrot.lane.b32.xlu1 %v7804_v42, %s5762_s26 }
 0x78c   :  { %2497 = vrot.lane.b32.xlu0 %v7758_v5, %s5763_s27 }
 0x78d   :  { %2495 = vrot.lane.b32.xlu1 %v7764_v1, %s5763_s27 }
 0x790   :  { %2501 = vrot.lane.b32.xlu0 %v7770_v3, %s5763_s27 }
 0x791   :  { %2499 = vrot.lane.b32.xlu1 %v7776_v27, %s5763_s27 }
 0x794   :  { %2505 = vrot.lane.b32.xlu0 %v7790_v14, %s5763_s27 }
 0x795   :  { %2503 = vrot.lane.b32.xlu1 %v7796_v40, %s5763_s27 }
 0x798   :  { %2509 = vrot.lane.b32.xlu0 %v7802_v37, %s5763_s27 }
 0x799   :  { %2507 = vrot.lane.b32.xlu1 %v7804_v42, %s5763_s27 }
 0x79c   :  { %2537 = vrot.lane.b32.xlu0 %v7758_v5, %s5764_s28 }
 0x79d   :  { %2535 = vrot.lane.b32.xlu1 %v7764_v1, %s5764_s28 }
 0x7a0   :  { %2541 = vrot.lane.b32.xlu0 %v7770_v3, %s5764_s28 }
 0x7a1   :  { %2539 = vrot.lane.b32.xlu1 %v7776_v27, %s5764_s28 }
 0x7a4   :  { %2545 = vrot.lane.b32.xlu0 %v7790_v14, %s5764_s28 }
 0x7a5   :  { %2543 = vrot.lane.b32.xlu1 %v7796_v40, %s5764_s28 }
 0x7a8   :  { %2549 = vrot.lane.b32.xlu0 %v7802_v37, %s5764_s28 }
 0x7a9   :  { %2547 = vrot.lane.b32.xlu1 %v7804_v42, %s5764_s28 }
 0x7ac   :  { %2577 = vrot.lane.b32.xlu0 %v7758_v5, %s5765_s29 }
 0x7ad   :  { %2575 = vrot.lane.b32.xlu1 %v7764_v1, %s5765_s29 }
 0x7b0   :  { %2581 = vrot.lane.b32.xlu0 %v7770_v3, %s5765_s29 }
 0x7b1   :  { %2579 = vrot.lane.b32.xlu1 %v7776_v27, %s5765_s29 }
 0x7b4   :  { %2585 = vrot.lane.b32.xlu0 %v7790_v14, %s5765_s29 }
 0x7b5   :  { %2583 = vrot.lane.b32.xlu1 %v7796_v40, %s5765_s29 }
 0x7b8   :  { %2589 = vrot.lane.b32.xlu0 %v7802_v37, %s5765_s29 }
 0x7b9   :  { %2587 = vrot.lane.b32.xlu1 %v7804_v42, %s5765_s29 }
 0x7bc   :  { %2617 = vrot.lane.b32.xlu0 %v7758_v5, %s5766_s6 }
 0x7bd   :  { %2615 = vrot.lane.b32.xlu1 %v7764_v1, %s5766_s6 }
 0x7be   :  { %v2330_v54 = vpop.permute.xlu0 %2329 }
 0x7bf   :  { %v2328_v2 = vpop.permute.xlu1 %2327 }
 0x7c0   :  { %2621 = vrot.lane.b32.xlu0 %v7770_v3, %s5766_s6 }
 0x7c1   :  { %2619 = vrot.lane.b32.xlu1 %v7776_v27, %s5766_s6 }
 0x7c2   :  { %v2334_v21 = vpop.permute.xlu0 %2333 }
 0x7c3   :  { %v2348_v11 = vsel %vm136_vm1, %v2330_v54, %v2334_v21  ;;  %v2332_v23 = vpop.permute.xlu1 %2331 }
 0x7c4   :  { %v2356_v25 = vmul.f32 %v2348_v11, %v10548_v57  ;;  %v2347_v36 = vsel %vm136_vm1, %v2328_v2, %v2332_v23  ;;  %2625 = vrot.lane.b32.xlu0 %v7790_v14, %s5766_s6 }
 0x7c5   :  { %v2352_v4 = vmul.f32 %v2347_v36, %v10548_v57  ;;  %2623 = vrot.lane.b32.xlu1 %v7796_v40, %s5766_s6 }
 0x7c6   :  { %v2338_v8 = vpop.permute.xlu0 %2337 }
 0x7c7   :  { %v2336_v61 = vpop.permute.xlu1 %2335  ;;  %v5268_v60 = vpack.c.bf16 %v2356_v25, %v2352_v4  ;;  %v2346_v15 = vsel %vm136_vm1, %v2334_v21, %v2338_v8 }
 0x7c8   :  { %v2345_v46 = vsel %vm136_vm1, %v2332_v23, %v2336_v61  ;;  %2629 = vrot.lane.b32.xlu0 %v7802_v37, %s5766_s6  ;;  %v2357_v16 = vmul.f32 %v2346_v15, %v6067_v29 }
 0x7c9   :  { %2627 = vrot.lane.b32.xlu1 %v7804_v42, %s5766_s6  ;;  %5269 = vmatprep.subr.bf16.mxu0 %v5268_v60  ;;  %v2353_v44 = vmul.f32 %v2345_v46, %v6067_v29  ;;  %v4982_v46 = vld [vmem:[%s10121_s3 + $0x30] sm:$0xff] }
 0x7ca   :  { %v2342_v31 = vpop.permute.xlu0 %2341 }
 0x7cb   :  { %v2344_v56 = vsel %vm136_vm1, %v2338_v8, %v2342_v31  ;;  %v2350_v45 = vsel %vm136_vm1, %v2342_v31, %v2330_v54  ;;  %v2340_v53 = vpop.permute.xlu1 %2339  ;;  %v5306_v54 = vpack.c.bf16 %v2357_v16, %v2353_v44  ;;  %v4980_v8 = vld [vmem:[%s10121_s3 + $0x20] sm:$0xff] }
 0x7cc   :  { %v2355_v12 = vmul.f32 %v2350_v45, %v6078_v32  ;;  %v2358_v35 = vmul.f32 %v2344_v56, %v6081_v33  ;;  %v2343_v55 = vsel %vm136_vm1, %v2336_v61, %v2340_v53  ;;  %v2349_v49 = vsel %vm136_vm1, %v2340_v53, %v2328_v2  ;;  %v4981_v2 = vld [vmem:[%s10121_s3 + $0x28] sm:$0xff] }
 0x7cd   :  { %v2351_v21 = vmul.f32 %v2349_v49, %v6078_v32  ;;  %v2354_v11 = vmul.f32 %v2343_v55, %v6081_v33  ;;  %2729 = vperm.xlu1 %5618, %v4980_v8   ;;  %2734 = vperm.xlu0 %5619, %v4981_v2  }
 0x7ce   :  { %v2370_v23 = vpop.permute.xlu0 %2369 }
 0x7cf   :  { %v5270_v25 = vpack.c.bf16 %v2355_v12, %v2351_v21  ;;  %v2368_v36 = vpop.permute.xlu1 %2367  ;;  %v5304_v4 = vpack.c.bf16 %v2358_v35, %v2354_v11  ;;  %v4983_v12 = vld [vmem:[%s10121_s3 + $0x38] sm:$0xff] }
 0x7d1   :  { %5271 = vmatpush1.bf16.msra.mxu0 %v5270_v25  ;;  %5305 = vmatprep.subr.bf16.mxu1 %v5304_v4 }
 0x7d2   :  { %v2374_v60 = vpop.permute.xlu0 %2373  ;;  %5307 = vmatpush1.bf16.msra.mxu1 %v5306_v54  ;;  %2739 = vperm.xlu1 %5618, %v4982_v46  }
 0x7d3   :  { %v2388_v61 = vsel %vm198_vm2, %v2370_v23, %v2374_v60  ;;  %v2372_v15 = vpop.permute.xlu1 %2371 }
 0x7d4   :  { %v2396_v31 = vmul.f32 %v2388_v61, %v6099_v52  ;;  %v2387_v16 = vsel %vm198_vm2, %v2368_v36, %v2372_v15 }
 0x7d5   :  { %v2392_v44 = vmul.f32 %v2387_v16, %v6099_v52 }
 0x7d6   :  { %v2378_v56 = vpop.permute.xlu0 %2377  ;;  %2744 = vperm.xlu1 %5618, %v4983_v12  }
 0x7d7   :  { %v2376_v45 = vpop.permute.xlu1 %2375  ;;  %v5272_v53 = vpack.c.bf16 %v2396_v31, %v2392_v44  ;;  %v2386_v35 = vsel %vm198_vm2, %v2374_v60, %v2378_v56 }
 0x7d8   :  { %v2385_v55 = vsel %vm198_vm2, %v2372_v15, %v2376_v45  ;;  %v2397_v21 = vmul.f32 %v2386_v35, %v6122_v9 }
 0x7d9   :  { %5273 = vmatprep.subr.bf16.mxu0 %v5272_v53  ;;  %v2393_v11 = vmul.f32 %v2385_v55, %v6122_v9 }
 0x7da   :  { %v2382_v49 = vpop.permute.xlu0 %2381 }
 0x7db   :  { %v2384_v25 = vsel %vm198_vm2, %v2378_v56, %v2382_v49  ;;  %v2390_v4 = vsel %vm198_vm2, %v2382_v49, %v2370_v23  ;;  %v2380_v54 = vpop.permute.xlu1 %2379  ;;  %v5310_v23 = vpack.c.bf16 %v2397_v21, %v2393_v11 }
 0x7dc   :  { %v2395_v8 = vmul.f32 %v2390_v4, %v6129_v17  ;;  %v2398_v60 = vmul.f32 %v2384_v25, %v6132_v18  ;;  %v2383_v2 = vsel %vm198_vm2, %v2376_v45, %v2380_v54  ;;  %v2389_v61 = vsel %vm198_vm2, %v2380_v54, %v2368_v36 }
 0x7dd   :  { %v2391_v15 = vmul.f32 %v2389_v61, %v6129_v17  ;;  %v2394_v46 = vmul.f32 %v2383_v2, %v6132_v18 }
 0x7de   :  { %v2410_v31 = vpop.permute.xlu0 %2409 }
 0x7df   :  { %v5274_v16 = vpack.c.bf16 %v2395_v8, %v2391_v15  ;;  %v2408_v44 = vpop.permute.xlu1 %2407  ;;  %v5308_v56 = vpack.c.bf16 %v2398_v60, %v2394_v46 }
 0x7e1   :  { %5275 = vmatpush1.bf16.msra.mxu0 %v5274_v16  ;;  %5309 = vmatprep.subr.bf16.mxu1 %v5308_v56 }
 0x7e2   :  { %v2414_v53 = vpop.permute.xlu0 %2413  ;;  %5311 = vmatpush1.bf16.msra.mxu1 %v5310_v23 }
 0x7e3   :  { %v2428_v12 = vsel %vm260_vm3, %v2410_v31, %v2414_v53  ;;  %v2412_v45 = vpop.permute.xlu1 %2411 }
 0x7e4   :  { %v2436_v35 = vmul.f32 %v2428_v12, %v6150_v43  ;;  %v2427_v36 = vsel %vm260_vm3, %v2408_v44, %v2412_v45 }
 0x7e5   :  { %v2432_v55 = vmul.f32 %v2427_v36, %v6150_v43 }
 0x7e6   :  { %v2418_v49 = vpop.permute.xlu0 %2417 }
 0x7e7   :  { %v2416_v25 = vpop.permute.xlu1 %2415  ;;  %v5276_v4 = vpack.c.bf16 %v2436_v35, %v2432_v55  ;;  %v2426_v21 = vsel %vm260_vm3, %v2414_v53, %v2418_v49 }
 0x7e8   :  { %v2425_v11 = vsel %vm260_vm3, %v2412_v45, %v2416_v25  ;;  %v2437_v8 = vmul.f32 %v2426_v21, %v6159_v51 }
 0x7e9   :  { %5277 = vmatprep.subr.bf16.mxu0 %v5276_v4  ;;  %v2433_v60 = vmul.f32 %v2425_v11, %v6159_v51 }
 0x7ea   :  { %v2422_v54 = vpop.permute.xlu0 %2421 }
 0x7eb   :  { %v2424_v2 = vsel %vm260_vm3, %v2418_v49, %v2422_v54  ;;  %v2430_v61 = vsel %vm260_vm3, %v2422_v54, %v2410_v31  ;;  %v2420_v15 = vpop.permute.xlu1 %2419  ;;  %v5314_v31 = vpack.c.bf16 %v2437_v8, %v2433_v60 }
 0x7ec   :  { %v2435_v46 = vmul.f32 %v2430_v61, %v6166_v58  ;;  %v2438_v16 = vmul.f32 %v2424_v2, %v6169_v59  ;;  %v2423_v56 = vsel %vm260_vm3, %v2416_v25, %v2420_v15  ;;  %v2429_v23 = vsel %vm260_vm3, %v2420_v15, %v2408_v44 }
 0x7ed   :  { %v2431_v53 = vmul.f32 %v2429_v23, %v6166_v58  ;;  %v2434_v12 = vmul.f32 %v2423_v56, %v6169_v59 }
 0x7ee   :  { %v2450_v45 = vpop.permute.xlu0 %2449 }
 0x7ef   :  { %v5278_v35 = vpack.c.bf16 %v2435_v46, %v2431_v53  ;;  %v2448_v36 = vpop.permute.xlu1 %2447  ;;  %v5312_v55 = vpack.c.bf16 %v2438_v16, %v2434_v12  ;;  %v10549_v46 = vld [vmem:[#allocation20_spill] sm:$0xff] }
 0x7f1   :  { %5279 = vmatpush1.bf16.msra.mxu0 %v5278_v35  ;;  %5313 = vmatprep.subr.bf16.mxu1 %v5312_v55  ;;  %v10550_v35 = vld [vmem:[#allocation21_spill] sm:$0xff] }
 0x7f2   :  { %v2454_v49 = vpop.permute.xlu0 %2453  ;;  %5315 = vmatpush1.bf16.msra.mxu1 %v5314_v31  ;;  %v10551_v31 = vld [vmem:[#allocation22_spill] sm:$0xff] }
 0x7f3   :  { %v2468_v4 = vsel %vm322_vm4, %v2450_v45, %v2454_v49  ;;  %v2452_v25 = vpop.permute.xlu1 %2451 }
 0x7f4   :  { %v2476_v21 = vmul.f32 %v2468_v4, %v6187_v34  ;;  %v2467_v44 = vsel %vm322_vm4, %v2448_v36, %v2452_v25 }
 0x7f5   :  { %v2472_v11 = vmul.f32 %v2467_v44, %v6187_v34 }
 0x7f6   :  { %v2458_v54 = vpop.permute.xlu0 %2457 }
 0x7f7   :  { %v2456_v2 = vpop.permute.xlu1 %2455  ;;  %v5280_v61 = vpack.c.bf16 %v2476_v21, %v2472_v11  ;;  %v2466_v8 = vsel %vm322_vm4, %v2454_v49, %v2458_v54 }
 0x7f8   :  { %v2465_v60 = vsel %vm322_vm4, %v2452_v25, %v2456_v2  ;;  %v2477_v16 = vmul.f32 %v2466_v8, %v10549_v46 }
 0x7f9   :  { %5281 = vmatprep.subr.bf16.mxu0 %v5280_v61  ;;  %v2473_v56 = vmul.f32 %v2465_v60, %v10549_v46  ;;  %v5284_v60 = vpack.c.bf16 %v7770_v3, %v7776_v27 }
 0x7fa   :  { %v2462_v15 = vpop.permute.xlu0 %2461 }
 0x7fb   :  { %v2464_v23 = vsel %vm322_vm4, %v2458_v54, %v2462_v15  ;;  %v2470_v53 = vsel %vm322_vm4, %v2462_v15, %v2450_v45  ;;  %v2460_v12 = vpop.permute.xlu1 %2459  ;;  %v5318_v45 = vpack.c.bf16 %v2477_v16, %v2473_v56  ;;  %v5322_v56 = vpack.c.bf16 %v7790_v14, %v7796_v40 }
 0x7fc   :  { %v2475_v55 = vmul.f32 %v2470_v53, %v10550_v35  ;;  %v2478_v49 = vmul.f32 %v2464_v23, %v10551_v31  ;;  %v2463_v4 = vsel %vm322_vm4, %v2456_v2, %v2460_v12  ;;  %v2469_v25 = vsel %vm322_vm4, %v2460_v12, %v2448_v36 }
 0x7fd   :  { %v2471_v21 = vmul.f32 %v2469_v25, %v10550_v35  ;;  %v2474_v44 = vmul.f32 %v2463_v4, %v10551_v31  ;;  %v5320_v2 = vpack.c.bf16 %v7802_v37, %v7804_v42  ;;  %v5286_v23 = vpack.c.bf16 %v7758_v5, %v7764_v1 }
 0x7fe   :  { %v2498_v11 = vpop.permute.xlu0 %2497 }
 0x7ff   :  { %v5282_v54 = vpack.c.bf16 %v2475_v55, %v2471_v21  ;;  %v2496_v61 = vpop.permute.xlu1 %2495  ;;  %v5316_v8 = vpack.c.bf16 %v2478_v49, %v2474_v44  ;;  %v10552_v21 = vld [vmem:[#allocation24_spill] sm:$0xff] }
 0x801   :  { %5283 = vmatpush1.bf16.msra.mxu0 %v5282_v54  ;;  %5317 = vmatprep.subr.bf16.mxu1 %v5316_v8 }
 0x802   :  { %v2502_v15 = vpop.permute.xlu0 %2501  ;;  %5285 = vmatprep.subr.bf16.mxu0 %v5284_v60  ;;  %5319 = vmatpush1.bf16.msra.mxu1 %v5318_v45 }
 0x803   :  { %5321 = vmatprep.subr.bf16.mxu1 %v5320_v2  ;;  %v2500_v36 = vpop.permute.xlu1 %2499  ;;  %v2516_v53 = vsel %vm392_vm5, %v2498_v11, %v2502_v15 }
 0x804   :  { %v2515_v16 = vsel %vm392_vm5, %v2496_v61, %v2500_v36  ;;  %v2523_v55 = vmul.f32 %v2516_v53, %v10462_v38 }
 0x805   :  { %5287 = vmatpush1.bf16.msra.mxu0 %v5286_v23  ;;  %v2519_v49 = vmul.f32 %v2515_v16, %v10462_v38 }
 0x806   :  { %v2506_v12 = vpop.permute.xlu0 %2505  ;;  %5323 = vmatpush1.bf16.msra.mxu1 %v5322_v56 }
 0x807   :  { %v2514_v4 = vsel %vm392_vm5, %v2502_v15, %v2506_v12  ;;  %v2504_v25 = vpop.permute.xlu1 %2503  ;;  %v5290_v60 = vpack.c.bf16 %v2523_v55, %v2519_v49 }
 0x808   :  { %v2524_v44 = vmul.f32 %v2514_v4, %v10552_v21  ;;  %v2513_v54 = vsel %vm392_vm5, %v2500_v36, %v2504_v25 }
 0x809   :  { %v2520_v8 = vmul.f32 %v2513_v54, %v10552_v21 }
 0x80a   :  { %v2510_v45 = vpop.permute.xlu0 %2509 }
 0x80b   :  { %v2512_v2 = vsel %vm392_vm5, %v2506_v12, %v2510_v45  ;;  %v2518_v23 = vsel %vm392_vm5, %v2510_v45, %v2498_v11  ;;  %v2508_v53 = vpop.permute.xlu1 %2507  ;;  %v5288_v16 = vpack.c.bf16 %v2524_v44, %v2520_v8 }
 0x80c   :  { %v2525_v15 = vmul.f32 %v2512_v2, %v10470_v20  ;;  %v2526_v56 = vmul.f32 %v2518_v23, %v10471_v6  ;;  %v2511_v4 = vsel %vm392_vm5, %v2504_v25, %v2508_v53  ;;  %v2517_v36 = vsel %vm392_vm5, %v2508_v53, %v2496_v61 }
 0x80d   :  { %v2521_v55 = vmul.f32 %v2511_v4, %v10470_v20  ;;  %v2522_v49 = vmul.f32 %v2517_v36, %v10471_v6  ;;  %5289 = vmatprep.subr.bf16.mxu0 %v5288_v16 }
 0x80e   :  { %v2538_v12 = vpop.permute.xlu0 %2537  ;;  %5291 = vmatpush1.bf16.msra.mxu0 %v5290_v60 }
 0x80f   :  { %v5326_v11 = vpack.c.bf16 %v2525_v15, %v2521_v55  ;;  %v2536_v54 = vpop.permute.xlu1 %2535  ;;  %v5324_v44 = vpack.c.bf16 %v2526_v56, %v2522_v49 }
 0x811   :  { %5325 = vmatprep.subr.bf16.mxu1 %v5324_v44 }
 0x812   :  { %v2542_v8 = vpop.permute.xlu0 %2541  ;;  %5327 = vmatpush1.bf16.msra.mxu1 %v5326_v11 }
 0x813   :  { %v2540_v45 = vpop.permute.xlu1 %2539  ;;  %v2556_v25 = vsel %vm454_vm6, %v2538_v12, %v2542_v8 }
 0x814   :  { %v2555_v61 = vsel %vm454_vm6, %v2536_v54, %v2540_v45  ;;  %v2563_v23 = vmul.f32 %v2556_v25, %v10480_v39 }
 0x815   :  { %v2559_v53 = vmul.f32 %v2555_v61, %v10480_v39 }
 0x816   :  { %v2546_v2 = vpop.permute.xlu0 %2545 }
 0x817   :  { %v2554_v60 = vsel %vm454_vm6, %v2542_v8, %v2546_v2  ;;  %v2544_v16 = vpop.permute.xlu1 %2543  ;;  %v5294_v55 = vpack.c.bf16 %v2563_v23, %v2559_v53 }
 0x818   :  { %v2564_v15 = vmul.f32 %v2554_v60, %v10481_v30  ;;  %v2553_v56 = vsel %vm454_vm6, %v2540_v45, %v2544_v16 }
 0x819   :  { %v2560_v4 = vmul.f32 %v2553_v56, %v10481_v30 }
 0x81a   :  { %v2550_v36 = vpop.permute.xlu0 %2549 }
 0x81b   :  { %v2552_v49 = vsel %vm454_vm6, %v2546_v2, %v2550_v36  ;;  %v2558_v11 = vsel %vm454_vm6, %v2550_v36, %v2538_v12  ;;  %v2548_v44 = vpop.permute.xlu1 %2547  ;;  %v5292_v25 = vpack.c.bf16 %v2564_v15, %v2560_v4 }
 0x81c   :  { %v2565_v8 = vmul.f32 %v2552_v49, %v10483_v0  ;;  %v2566_v61 = vmul.f32 %v2558_v11, %v10491_v63  ;;  %v2551_v60 = vsel %vm454_vm6, %v2544_v16, %v2548_v44  ;;  %v2557_v45 = vsel %vm454_vm6, %v2548_v44, %v2536_v54 }
 0x81d   :  { %v2561_v23 = vmul.f32 %v2551_v60, %v10483_v0  ;;  %v2562_v53 = vmul.f32 %v2557_v45, %v10491_v63  ;;  %5293 = vmatprep.subr.bf16.mxu0 %v5292_v25 }
 0x81e   :  { %v2578_v2 = vpop.permute.xlu0 %2577  ;;  %5295 = vmatpush1.bf16.msra.mxu0 %v5294_v55 }
 0x81f   :  { %v5330_v12 = vpack.c.bf16 %v2565_v8, %v2561_v23  ;;  %v2576_v56 = vpop.permute.xlu1 %2575  ;;  %v5328_v15 = vpack.c.bf16 %v2566_v61, %v2562_v53 }
 0x821   :  { %5329 = vmatprep.subr.bf16.mxu1 %v5328_v15 }
 0x822   :  { %v2582_v4 = vpop.permute.xlu0 %2581  ;;  %5331 = vmatpush1.bf16.msra.mxu1 %v5330_v12 }
 0x823   :  { %v2580_v36 = vpop.permute.xlu1 %2579  ;;  %v2596_v16 = vsel %vm516_vm7, %v2578_v2, %v2582_v4 }
 0x824   :  { %v2595_v54 = vsel %vm516_vm7, %v2576_v56, %v2580_v36  ;;  %v2603_v11 = vmul.f32 %v2596_v16, %v10494_v28 }
 0x825   :  { %v2599_v44 = vmul.f32 %v2595_v54, %v10494_v28 }
 0x826   :  { %v2586_v49 = vpop.permute.xlu0 %2585 }
 0x827   :  { %v2594_v55 = vsel %vm516_vm7, %v2582_v4, %v2586_v49  ;;  %v2584_v25 = vpop.permute.xlu1 %2583  ;;  %v5298_v23 = vpack.c.bf16 %v2603_v11, %v2599_v44 }
 0x828   :  { %v2604_v8 = vmul.f32 %v2594_v55, %v10498_v22  ;;  %v2593_v61 = vsel %vm516_vm7, %v2580_v36, %v2584_v25 }
 0x829   :  { %v2600_v60 = vmul.f32 %v2593_v61, %v10498_v22 }
 0x82a   :  { %v2590_v45 = vpop.permute.xlu0 %2589 }
 0x82b   :  { %v2592_v53 = vsel %vm516_vm7, %v2586_v49, %v2590_v45  ;;  %v2598_v12 = vsel %vm516_vm7, %v2590_v45, %v2578_v2  ;;  %v2588_v15 = vpop.permute.xlu1 %2587  ;;  %v5296_v16 = vpack.c.bf16 %v2604_v8, %v2600_v60 }
 0x82c   :  { %v2605_v4 = vmul.f32 %v2592_v53, %v10513_v24  ;;  %v2606_v54 = vmul.f32 %v2598_v12, %v10514_v62  ;;  %v2591_v55 = vsel %vm516_vm7, %v2584_v25, %v2588_v15  ;;  %v2597_v36 = vsel %vm516_vm7, %v2588_v15, %v2576_v56 }
 0x82d   :  { %v2601_v11 = vmul.f32 %v2591_v55, %v10513_v24  ;;  %v2602_v44 = vmul.f32 %v2597_v36, %v10514_v62  ;;  %5297 = vmatprep.subr.bf16.mxu0 %v5296_v16 }
 0x82e   :  { %v2618_v49 = vpop.permute.xlu0 %2617  ;;  %5299 = vmatpush1.bf16.msra.mxu0 %v5298_v23 }
 0x82f   :  { %v5334_v2 = vpack.c.bf16 %v2605_v4, %v2601_v11  ;;  %v2616_v61 = vpop.permute.xlu1 %2615  ;;  %v5332_v8 = vpack.c.bf16 %v2606_v54, %v2602_v44 }
 0x831   :  { %5333 = vmatprep.subr.bf16.mxu1 %v5332_v8 }
 0x832   :  { %v2622_v60 = vpop.permute.xlu0 %2621  ;;  %5335 = vmatpush1.bf16.msra.mxu1 %v5334_v2 }
 0x833   :  { %v2620_v45 = vpop.permute.xlu1 %2619  ;;  %v2636_v25 = vsel %vm578_vm8, %v2618_v49, %v2622_v60 }
 0x834   :  { %v2635_v56 = vsel %vm578_vm8, %v2616_v61, %v2620_v45  ;;  %v2643_v12 = vmul.f32 %v2636_v25, %v10524_v41 }
 0x835   :  { %v2639_v15 = vmul.f32 %v2635_v56, %v10524_v41 }
 0x836   :  { %v2626_v53 = vpop.permute.xlu0 %2625 }
 0x837   :  { %v2634_v23 = vsel %vm578_vm8, %v2622_v60, %v2626_v53  ;;  %v2624_v16 = vpop.permute.xlu1 %2623  ;;  %v5302_v11 = vpack.c.bf16 %v2643_v12, %v2639_v15 }
 0x838   :  { %v2644_v4 = vmul.f32 %v2634_v23, %v10525_v47  ;;  %v2633_v54 = vsel %vm578_vm8, %v2620_v45, %v2624_v16 }
 0x839   :  { %v2640_v55 = vmul.f32 %v2633_v54, %v10525_v47  ;;  %v4975_v54 = vld [vmem:[%s10120_s2 + $0x58] sm:$0xff] }
 0x83a   :  { %v2630_v36 = vpop.permute.xlu0 %2629 }
 0x83b   :  { %v2632_v44 = vsel %vm578_vm8, %v2626_v53, %v2630_v36  ;;  %v2638_v2 = vsel %vm578_vm8, %v2630_v36, %v2618_v49  ;;  %v2628_v8 = vpop.permute.xlu1 %2627  ;;  %v5300_v25 = vpack.c.bf16 %v2644_v4, %v2640_v55  ;;  %v4972_v49 = vld [vmem:[%s10120_s2 + $0x40] sm:$0xff]  ;;  %v4979_v36 = vld [vmem:[%s10120_s2 + $0x78] sm:$0xff] }
 0x83c   :  { %v2645_v60 = vmul.f32 %v2632_v44, %v10538_v7  ;;  %v2646_v56 = vmul.f32 %v2638_v2, %v10537_v26  ;;  %v2631_v23 = vsel %vm578_vm8, %v2624_v16, %v2628_v8  ;;  %v2637_v45 = vsel %vm578_vm8, %v2628_v8, %v2616_v61  ;;  %v4974_v61 = vld [vmem:[%s10120_s2 + $0x50] sm:$0xff]  ;;  %v4977_v16 = vld [vmem:[%s10120_s2 + $0x68] sm:$0xff]  ;;  %v4976_v55 = vld [vmem:[%s10120_s2 + $0x60] sm:$0xff] }
 0x83d   :  { %v2641_v12 = vmul.f32 %v2631_v23, %v10538_v7  ;;  %v2642_v15 = vmul.f32 %v2637_v45, %v10537_v26  ;;  %5301 = vmatprep.subr.bf16.mxu0 %v5300_v25 }
 0x83e   :  { %5303 = vmatpush1.bf16.msra.mxu0 %v5302_v11  ;;  %v4978_v11 = vld [vmem:[%s10120_s2 + $0x70] sm:$0xff] }
 0x83f   :  { %v5338_v53 = vpack.c.bf16 %v2645_v60, %v2641_v12  ;;  %v5336_v4 = vpack.c.bf16 %v2646_v56, %v2642_v15 }
 0x841   :  { %2824 = vmatmul.mubr.f32.vlgmr.msra.gmra.mrb[14].mxu0 %v4972_v49  ;;  %5337 = vmatprep.subr.bf16.mxu1 %v5336_v4 }
 0x842   :  { %5339 = vmatpush1.bf16.msra.mxu1 %v5338_v53  ;;  %4985 = vmatprep.mubr.msk.f32.mxu0 %vm716_vm0, %v4975_v54 }
 0x845   :  { %2830 = vmatmul.mubr.f32.gmra.mrb[16].mxu0 %v4974_v61  ;;  %2913 = vmatmul.mubr.f32.vlgmr.msra.gmra.mrb[14].mxu1 %v4972_v49 }
 0x846   :  { %4986 = vmatprep.mubr.msk.f32.mxu0 %vm716_vm0, %v4977_v16  ;;  %4989 = vmatprep.mubr.msk.f32.mxu1 %vm716_vm0, %v4975_v54 }
 0x849   :  { %2836 = vmatmul.mubr.f32.gmra.mrb[18].mxu0 %v4976_v55  ;;  %2919 = vmatmul.mubr.f32.gmra.mrb[16].mxu1 %v4974_v61 }
 0x84a   :  { %4987 = vmatprep.mubr.msk.f32.mxu0 %vm716_vm0, %v4979_v36  ;;  %4990 = vmatprep.mubr.msk.f32.mxu1 %vm716_vm0, %v4977_v16 }
 0x84c   :  { %v2730_v44 = vpop.permute.xlu1 %2729  ;;  %v8166_v60 = vpop.permute.xlu0 %2734 }
 0x84d   :  { %2842 = vmatmul.mubr.f32.gmra.mrb[20].mxu0 %v4978_v11  ;;  %2925 = vmatmul.mubr.f32.gmra.mrb[18].mxu1 %v4976_v55 }
 0x84e   :  { %4991 = vmatprep.mubr.msk.f32.mxu1 %vm716_vm0, %v4979_v36 }
 0x851   :  { %2931 = vmatmul.mubr.f32.gmra.mrb[20].mxu1 %v4978_v11 }
 0x914   :  { %v2825_v2 = vpop.f32.mrb[14].mxu0 }
 0x915   :  { %v2826_v8 = vadd.f32 %v2825_v2, %v2730_v44  ;;  %v2827_v25 = vpop.f32.mrb[15].mxu0 }
 0x916   :  { %v2828_v48 = vadd.f32 %v2827_v25, %v2730_v44 }
 0x917   :  { %v8168_v56 = vmax.f32 %v2826_v8, 0.0 }
 0x918   :  { %v2831_v23 = vpop.f32.mrb[16].mxu0  ;;  %v2914_v45 = vpop.f32.mrb[14].mxu1  ;;  %v8260_v13 = vmax.f32 %v2828_v48, 0.0 }
 0x919   :  { %10553 = vst [vmem:[#allocation87_spill] sm:$0xff] %v8168_v56  ;;  %v2832_v12 = vadd.f32 %v2831_v23, %v8166_v60  ;;  %v2915_v15 = vadd.f32 %v2914_v45, %v2730_v44  ;;  %v2833_v49 = vpop.f32.mrb[17].mxu0  ;;  %v2916_v53 = vpop.f32.mrb[15].mxu1  ;;  %2963 = vrot.lane.b32.xlu0 %v8168_v56, %s5759_s30 }
 0x91a   :  { %v2917_v2 = vadd.f32 %v2916_v53, %v2730_v44 }
 0x91b   :  { %v8173_v4 = vmax.f32 %v2832_v12, 0.0  ;;  %v8175_v54 = vmax.f32 %v2915_v15, 0.0 }
 0x91c   :  { %v8177_v61 = vpop.f32.mrb[18].mxu0  ;;  %v2920_v16 = vpop.f32.mrb[16].mxu1  ;;  %v8269_v25 = vmax.f32 %v2917_v2, 0.0 }
 0x91d   :  { %10554 = vst [vmem:[#allocation86_spill] sm:$0xff] %v8173_v4  ;;  %10555 = vst [vmem:[#allocation67_spill] sm:$0xff] %v8175_v54  ;;  %v2921_v55 = vadd.f32 %v2920_v16, %v8166_v60  ;;  %v8180_v36 = vpop.f32.mrb[19].mxu0  ;;  %2965 = vrot.lane.b32.xlu1 %v8173_v4, %s5759_s30  ;;  %v2922_v11 = vpop.f32.mrb[17].mxu1  ;;  %2979 = vrot.lane.b32.xlu0 %v8175_v54, %s5759_s30  ;;  %v2834_v16 = vadd.f32 %v2833_v49, %v8166_v60 }
 0x91e   :  { %v2923_v37 = vadd.f32 %v2922_v11, %v8166_v60 }
 0x91f   :  { %v8188_v8 = vmax.f32 %v2921_v55, 0.0  ;;  %v8267_v1 = vmax.f32 %v2834_v16, 0.0 }
 0x920   :  { %v8190_v23 = vpop.f32.mrb[20].mxu0  ;;  %v8192_v45 = vpop.f32.mrb[18].mxu1  ;;  %v8276_v48 = vmax.f32 %v2923_v37, 0.0 }
 0x921   :  { %10556 = vst [vmem:[#allocation48_spill] sm:$0xff] %v8188_v8  ;;  %v8194_v12 = vpop.f32.mrb[21].mxu0  ;;  %v8196_v15 = vpop.f32.mrb[19].mxu1  ;;  %2981 = vrot.lane.b32.xlu1 %v8188_v8, %s5759_s30  ;;  %3043 = vrot.lane.b32.xlu0 %v8168_v56, %s5760_s24 }
 0x922   :  { %v8314_v37 = vpop.permute.xlu1 %2739 }
 0x923   :  { %v2838_v11 = vadd.f32 %v8177_v61, %v8314_v37  ;;  %v2927_v40 = vadd.f32 %v8192_v45, %v8314_v37 }
 0x924   :  { %v8204_v19 = vpop.f32.mrb[20].mxu1 }
 0x925   :  { %v8206_v55 = vpop.f32.mrb[21].mxu1  ;;  %3045 = vrot.lane.b32.xlu1 %v8173_v4, %s5760_s24  ;;  %3059 = vrot.lane.b32.xlu0 %v8175_v54, %s5760_s24  ;;  %v8350_v42 = vmax.f32 %v2838_v11, 0.0  ;;  %v8366_v11 = vmax.f32 %v2927_v40, 0.0 }
 0x926   :  { %v8324_v44 = vpop.permute.xlu1 %2744 }
 0x927   :  { %10557 = vst [vmem:[#allocation88_spill] sm:$0xff] %v8350_v42  ;;  %v2844_v14 = vadd.f32 %v8190_v23, %v8324_v44  ;;  %10559 = vst [vmem:[#allocation89_spill] sm:$0xff] %v8366_v11  ;;  %v2933_v23 = vadd.f32 %v8204_v19, %v8324_v44 }
 0x929   :  { %3061 = vrot.lane.b32.xlu1 %v8188_v8, %s5760_s24  ;;  %3123 = vrot.lane.b32.xlu0 %v8168_v56, %s5761_s25  ;;  %v8364_v27 = vmax.f32 %v2844_v14, 0.0  ;;  %v8378_v50 = vmax.f32 %v2933_v23, 0.0 }
 0x92b   :  { %10558 = vst [vmem:[#allocation50_spill] sm:$0xff] %v8364_v27  ;;  %10560 = vst [vmem:[#allocation51_spill] sm:$0xff] %v8378_v50 }
 0x92d   :  { %3125 = vrot.lane.b32.xlu1 %v8173_v4, %s5761_s25  ;;  %3139 = vrot.lane.b32.xlu0 %v8175_v54, %s5761_s25 }
 0x931   :  { %3141 = vrot.lane.b32.xlu1 %v8188_v8, %s5761_s25  ;;  %3203 = vrot.lane.b32.xlu0 %v8168_v56, %s5762_s26 }
 0x935   :  { %3205 = vrot.lane.b32.xlu1 %v8173_v4, %s5762_s26  ;;  %3219 = vrot.lane.b32.xlu0 %v8175_v54, %s5762_s26 }
 0x939   :  { %3221 = vrot.lane.b32.xlu1 %v8188_v8, %s5762_s26  ;;  %3299 = vrot.lane.b32.xlu0 %v8168_v56, %s5763_s27 }
 0x93d   :  { %3301 = vrot.lane.b32.xlu1 %v8173_v4, %s5763_s27  ;;  %3315 = vrot.lane.b32.xlu0 %v8175_v54, %s5763_s27 }
 0x941   :  { %3317 = vrot.lane.b32.xlu1 %v8188_v8, %s5763_s27  ;;  %3379 = vrot.lane.b32.xlu0 %v8168_v56, %s5764_s28 }
 0x945   :  { %3381 = vrot.lane.b32.xlu1 %v8173_v4, %s5764_s28  ;;  %3395 = vrot.lane.b32.xlu0 %v8175_v54, %s5764_s28 }
 0x949   :  { %3397 = vrot.lane.b32.xlu1 %v8188_v8, %s5764_s28  ;;  %3459 = vrot.lane.b32.xlu0 %v8168_v56, %s5765_s29 }
 0x94d   :  { %3461 = vrot.lane.b32.xlu1 %v8173_v4, %s5765_s29  ;;  %3475 = vrot.lane.b32.xlu0 %v8175_v54, %s5765_s29 }
 0x951   :  { %3477 = vrot.lane.b32.xlu1 %v8188_v8, %s5765_s29  ;;  %3539 = vrot.lane.b32.xlu0 %v8168_v56, %s5766_s6 }
 0x955   :  { %3541 = vrot.lane.b32.xlu1 %v8173_v4, %s5766_s6  ;;  %3555 = vrot.lane.b32.xlu0 %v8175_v54, %s5766_s6 }
 0x959   :  { %3557 = vrot.lane.b32.xlu1 %v8188_v8, %s5766_s6  ;;  %2971 = vrot.lane.b32.xlu0 %v8260_v13, %s5759_s30 }
 0x95d   :  { %2973 = vrot.lane.b32.xlu1 %v8267_v1, %s5759_s30  ;;  %2987 = vrot.lane.b32.xlu0 %v8269_v25, %s5759_s30 }
 0x961   :  { %2989 = vrot.lane.b32.xlu1 %v8276_v48, %s5759_s30  ;;  %3051 = vrot.lane.b32.xlu0 %v8260_v13, %s5760_s24 }
 0x965   :  { %3053 = vrot.lane.b32.xlu1 %v8267_v1, %s5760_s24  ;;  %3067 = vrot.lane.b32.xlu0 %v8269_v25, %s5760_s24 }
 0x969   :  { %3069 = vrot.lane.b32.xlu1 %v8276_v48, %s5760_s24  ;;  %3131 = vrot.lane.b32.xlu0 %v8260_v13, %s5761_s25 }
 0x96d   :  { %3133 = vrot.lane.b32.xlu1 %v8267_v1, %s5761_s25  ;;  %3147 = vrot.lane.b32.xlu0 %v8269_v25, %s5761_s25 }
 0x971   :  { %3149 = vrot.lane.b32.xlu1 %v8276_v48, %s5761_s25  ;;  %3211 = vrot.lane.b32.xlu0 %v8260_v13, %s5762_s26 }
 0x975   :  { %3213 = vrot.lane.b32.xlu1 %v8267_v1, %s5762_s26  ;;  %3227 = vrot.lane.b32.xlu0 %v8269_v25, %s5762_s26 }
 0x979   :  { %3229 = vrot.lane.b32.xlu1 %v8276_v48, %s5762_s26  ;;  %3307 = vrot.lane.b32.xlu0 %v8260_v13, %s5763_s27 }
 0x97d   :  { %3309 = vrot.lane.b32.xlu1 %v8267_v1, %s5763_s27  ;;  %3323 = vrot.lane.b32.xlu0 %v8269_v25, %s5763_s27 }
 0x981   :  { %3325 = vrot.lane.b32.xlu1 %v8276_v48, %s5763_s27  ;;  %3387 = vrot.lane.b32.xlu0 %v8260_v13, %s5764_s28 }
 0x985   :  { %3389 = vrot.lane.b32.xlu1 %v8267_v1, %s5764_s28  ;;  %3403 = vrot.lane.b32.xlu0 %v8269_v25, %s5764_s28 }
 0x989   :  { %3405 = vrot.lane.b32.xlu1 %v8276_v48, %s5764_s28  ;;  %3467 = vrot.lane.b32.xlu0 %v8260_v13, %s5765_s29 }
 0x98b   :  { %v8326_v60 = vpop.permute.xlu0 %2963 }
 0x98d   :  { %3469 = vrot.lane.b32.xlu1 %v8267_v1, %s5765_s29  ;;  %3483 = vrot.lane.b32.xlu0 %v8269_v25, %s5765_s29 }
 0x98f   :  { %v8332_v49 = vpop.permute.xlu0 %2979  ;;  %v8334_v53 = vpop.permute.xlu1 %2965 }
 0x991   :  { %3485 = vrot.lane.b32.xlu1 %v8276_v48, %s5765_s29  ;;  %3547 = vrot.lane.b32.xlu0 %v8260_v13, %s5766_s6 }
 0x993   :  { %v8342_v2 = vpop.permute.xlu0 %3043  ;;  %v8344_v16 = vpop.permute.xlu1 %2981 }
 0x995   :  { %3549 = vrot.lane.b32.xlu1 %v8267_v1, %s5766_s6  ;;  %3563 = vrot.lane.b32.xlu0 %v8269_v25, %s5766_s6 }
 0x997   :  { %v8356_v3 = vpop.permute.xlu0 %3059  ;;  %v8358_v61 = vpop.permute.xlu1 %3045 }
 0x999   :  { %3565 = vrot.lane.b32.xlu1 %v8276_v48, %s5766_s6  ;;  %2967 = vrot.lane.b32.xlu0 %v8350_v42, %s5759_s30 }
 0x99b   :  { %v8370_v5 = vpop.permute.xlu0 %3123  ;;  %v8372_v45 = vpop.permute.xlu1 %3061 }
 0x99d   :  { %2983 = vrot.lane.b32.xlu0 %v8366_v11, %s5759_s30  ;;  %2969 = vrot.lane.b32.xlu1 %v8364_v27, %s5759_s30 }
 0x99f   :  { %v8380_v26 = vpop.permute.xlu0 %3139  ;;  %v8382_v14 = vpop.permute.xlu1 %3125 }
 0x9a1   :  { %3047 = vrot.lane.b32.xlu0 %v8350_v42, %s5760_s24  ;;  %2985 = vrot.lane.b32.xlu1 %v8378_v50, %s5759_s30 }
 0x9a3   :  { %v8388_v19 = vpop.permute.xlu0 %3203  ;;  %v8390_v40 = vpop.permute.xlu1 %3141 }
 0x9a5   :  { %3063 = vrot.lane.b32.xlu0 %v8366_v11, %s5760_s24  ;;  %3049 = vrot.lane.b32.xlu1 %v8364_v27, %s5760_s24 }
 0x9a7   :  { %v8396_v23 = vpop.permute.xlu0 %3219  ;;  %v8398_v7 = vpop.permute.xlu1 %3205 }
 0x9a9   :  { %3127 = vrot.lane.b32.xlu0 %v8350_v42, %s5761_s25  ;;  %3065 = vrot.lane.b32.xlu1 %v8378_v50, %s5760_s24 }
 0x9ab   :  { %v8404_v47 = vpop.permute.xlu0 %3299  ;;  %v8406_v41 = vpop.permute.xlu1 %3221 }
 0x9ac   :  { %10561 = vst [vmem:[#allocation68_spill] sm:$0xff] %v8404_v47 }
 0x9ad   :  { %3143 = vrot.lane.b32.xlu0 %v8366_v11, %s5761_s25  ;;  %3129 = vrot.lane.b32.xlu1 %v8364_v27, %s5761_s25 }
 0x9af   :  { %v8412_v62 = vpop.permute.xlu0 %3315  ;;  %v8414_v24 = vpop.permute.xlu1 %3301 }
 0x9b0   :  { %10562 = vst [vmem:[#allocation49_spill] sm:$0xff] %v8412_v62  ;;  %10563 = vst [vmem:[#allocation69_spill] sm:$0xff] %v8414_v24  ;;  %v2935_v24 = vadd.f32 %v8206_v55, %v8324_v44  ;;  %v4993_v62 = vld [vmem:[%s10123_s5 + $0x18] sm:$0xff] }
 0x9b1   :  { %3207 = vrot.lane.b32.xlu0 %v8350_v42, %s5762_s26  ;;  %3145 = vrot.lane.b32.xlu1 %v8378_v50, %s5761_s25 }
 0x9b3   :  { %v8420_v22 = vpop.permute.xlu0 %3379  ;;  %v8422_v54 = vpop.permute.xlu1 %3317 }
 0x9b4   :  { %10564 = vst [vmem:[#allocation70_spill] sm:$0xff] %v8420_v22  ;;  %10565 = vst [vmem:[#allocation55_spill] sm:$0xff] %v8422_v54  ;;  %v2846_v22 = vadd.f32 %v8194_v12, %v8324_v44 }
 0x9b5   :  { %3223 = vrot.lane.b32.xlu0 %v8366_v11, %s5762_s26  ;;  %3209 = vrot.lane.b32.xlu1 %v8364_v27, %s5762_s26 }
 0x9b7   :  { %v8428_v8 = vpop.permute.xlu0 %3395  ;;  %v8430_v28 = vpop.permute.xlu1 %3381 }
 0x9b8   :  { %10566 = vst [vmem:[#allocation72_spill] sm:$0xff] %v8428_v8  ;;  %10567 = vst [vmem:[#allocation53_spill] sm:$0xff] %v8430_v28 }
 0x9b9   :  { %3303 = vrot.lane.b32.xlu0 %v8350_v42, %s5763_s27  ;;  %3225 = vrot.lane.b32.xlu1 %v8378_v50, %s5762_s26 }
 0x9bb   :  { %v8436_v56 = vpop.permute.xlu0 %3459  ;;  %v8438_v4 = vpop.permute.xlu1 %3397 }
 0x9bc   :  { %10568 = vst [vmem:[#allocation74_spill] sm:$0xff] %v8436_v56  ;;  %10569 = vst [vmem:[#allocation54_spill] sm:$0xff] %v8438_v4 }
 0x9bd   :  { %3319 = vrot.lane.b32.xlu0 %v8366_v11, %s5763_s27  ;;  %3305 = vrot.lane.b32.xlu1 %v8364_v27, %s5763_s27 }
 0x9bf   :  { %v8444_v63 = vpop.permute.xlu0 %3475  ;;  %v8446_v0 = vpop.permute.xlu1 %3461 }
 0x9c0   :  { %10570 = vst [vmem:[#allocation71_spill] sm:$0xff] %v8444_v63  ;;  %10571 = vst [vmem:[#allocation52_spill] sm:$0xff] %v8446_v0 }
 0x9c1   :  { %3383 = vrot.lane.b32.xlu0 %v8350_v42, %s5764_s28  ;;  %3321 = vrot.lane.b32.xlu1 %v8378_v50, %s5763_s27 }
 0x9c3   :  { %v8452_v30 = vpop.permute.xlu0 %3539  ;;  %v8454_v56 = vpop.permute.xlu1 %3477 }
 0x9c4   :  { %10572 = vst [vmem:[#allocation73_spill] sm:$0xff] %v8452_v30  ;;  %10573 = vst [vmem:[#allocation75_spill] sm:$0xff] %v8454_v56  ;;  %v2840_v30 = vadd.f32 %v8180_v36, %v8314_v37  ;;  %v2929_v36 = vadd.f32 %v8196_v15, %v8314_v37  ;;  %v8500_v15 = vmax.f32 %v2846_v22, 0.0 }
 0x9c5   :  { %3399 = vrot.lane.b32.xlu0 %v8366_v11, %s5764_s28  ;;  %3385 = vrot.lane.b32.xlu1 %v8364_v27, %s5764_s28 }
 0x9c6   :  { %v8502_v37 = vmax.f32 %v2929_v36, 0.0 }
 0x9c7   :  { %v8460_v39 = vpop.permute.xlu0 %3555  ;;  %v8462_v63 = vpop.permute.xlu1 %3541 }
 0x9c8   :  { %10574 = vst [vmem:[#allocation56_spill] sm:$0xff] %v8460_v39  ;;  %10575 = vst [vmem:[#allocation58_spill] sm:$0xff] %v8462_v63  ;;  %v8479_v39 = vmax.f32 %v2840_v30, 0.0 }
 0x9c9   :  { %3463 = vrot.lane.b32.xlu0 %v8350_v42, %s5765_s29  ;;  %3401 = vrot.lane.b32.xlu1 %v8378_v50, %s5764_s28  ;;  %10578 = vst [vmem:[#allocation92_spill] sm:$0xff] %v8502_v37 }
 0x9ca   :  { %10577 = vst [vmem:[#allocation39_spill] sm:$0xff] %v8479_v39 }
 0x9cb   :  { %v2972_v56 = vpop.permute.xlu0 %2971  ;;  %v8470_v0 = vpop.permute.xlu1 %3557 }
 0x9cc   :  { %10576 = vst [vmem:[#allocation40_spill] sm:$0xff] %v8470_v0  ;;  %v3003_v63 = vsel %vm136_vm1, %v8326_v60, %v2972_v56 }
 0x9cd   :  { %3479 = vrot.lane.b32.xlu0 %v8366_v11, %s5765_s29  ;;  %3465 = vrot.lane.b32.xlu1 %v8364_v27, %s5765_s29  ;;  %v3012_v8 = vmul.f32 %v3003_v63, %v10548_v57 }
 0x9cf   :  { %v2988_v28 = vpop.permute.xlu0 %2987  ;;  %v2974_v0 = vpop.permute.xlu1 %2973 }
 0x9d0   :  { %v3004_v4 = vsel %vm136_vm1, %v8334_v53, %v2974_v0  ;;  %v2995_v30 = vsel %vm136_vm1, %v8332_v49, %v2988_v28  ;;  %v3007_v12 = vsel %vm136_vm1, %v2988_v28, %v8326_v60  ;;  %v3000_v63 = vsel %vm136_vm1, %v2974_v0, %v8344_v16 }
 0x9d1   :  { %v3016_v6 = vmul.f32 %v3004_v4, %v10548_v57  ;;  %2975 = vrot.lane.b32.xlu0 %v8479_v39, %s5759_s30  ;;  %3481 = vrot.lane.b32.xlu1 %v8378_v50, %s5765_s29  ;;  %v2999_v28 = vsel %vm136_vm1, %v2972_v56, %v8332_v49  ;;  %v3011_v0 = vmul.f32 %v3007_v12, %v6078_v32 }
 0x9d2   :  { %v3014_v36 = vmul.f32 %v2995_v30, %v6081_v33  ;;  %v3017_v56 = vmul.f32 %v3000_v63, %v6067_v29 }
 0x9d3   :  { %v8507_v4 = vpop.permute.xlu0 %3051  ;;  %v2990_v20 = vpop.permute.xlu1 %2989  ;;  %v5340_v54 = vpack.c.bf16 %v3016_v6, %v3012_v8 }
 0x9d4   :  { %v2996_v22 = vsel %vm136_vm1, %v8344_v16, %v2990_v20  ;;  %v3008_v60 = vsel %vm136_vm1, %v2990_v20, %v8334_v53  ;;  %v8533_v53 = vmax.f32 %v2935_v24, 0.0  ;;  %v3013_v16 = vmul.f32 %v2999_v28, %v6067_v29 }
 0x9d5   :  { %v3015_v6 = vmul.f32 %v3008_v60, %v6078_v32  ;;  %v3018_v8 = vmul.f32 %v2996_v22, %v6081_v33  ;;  %2991 = vrot.lane.b32.xlu0 %v8502_v37, %s5759_s30  ;;  %2977 = vrot.lane.b32.xlu1 %v8500_v15, %s5759_s30 }
 0x9d6   :  { %5341 = vmatprep.subr.bf16.mxu0 %v5340_v54  ;;  %10579 = vst [vmem:[#allocation42_spill] sm:$0xff] %v8533_v53  ;;  %v5414_v30 = vpack.c.bf16 %v3017_v56, %v3013_v16 }
 0x9d7   :  { %v5342_v55 = vpack.c.bf16 %v3015_v6, %v3011_v0  ;;  %v8529_v44 = vpop.permute.xlu0 %3067  ;;  %v8531_v20 = vpop.permute.xlu1 %3053  ;;  %v5412_v49 = vpack.c.bf16 %v3018_v8, %v3014_v36 }
 0x9d9   :  { %3055 = vrot.lane.b32.xlu0 %v8479_v39, %s5760_s24  ;;  %2993 = vrot.lane.b32.xlu1 %v8533_v53, %s5759_s30 }
 0x9da   :  { %5343 = vmatpush1.bf16.msra.mxu0 %v5342_v55  ;;  %5413 = vmatprep.subr.bf16.mxu1 %v5412_v49 }
 0x9db   :  { %v8540_v54 = vpop.permute.xlu0 %3131  ;;  %v8542_v12 = vpop.permute.xlu1 %3069  ;;  %5415 = vmatpush1.bf16.msra.mxu1 %v5414_v30 }
 0x9dd   :  { %3071 = vrot.lane.b32.xlu0 %v8502_v37, %s5760_s24  ;;  %3057 = vrot.lane.b32.xlu1 %v8500_v15, %s5760_s24 }
 0x9df   :  { %v8548_v24 = vpop.permute.xlu0 %3147  ;;  %v8550_v63 = vpop.permute.xlu1 %3133 }
 0x9e1   :  { %3135 = vrot.lane.b32.xlu0 %v8479_v39, %s5761_s25  ;;  %3073 = vrot.lane.b32.xlu1 %v8533_v53, %s5760_s24 }
 0x9e3   :  { %v8556_v28 = vpop.permute.xlu0 %3211  ;;  %v8558_v22 = vpop.permute.xlu1 %3149 }
 0x9e5   :  { %3151 = vrot.lane.b32.xlu0 %v8502_v37, %s5761_s25  ;;  %3137 = vrot.lane.b32.xlu1 %v8500_v15, %s5761_s25 }
 0x9e7   :  { %v8564_v60 = vpop.permute.xlu0 %3227  ;;  %v8566_v0 = vpop.permute.xlu1 %3213 }
 0x9e9   :  { %3215 = vrot.lane.b32.xlu0 %v8479_v39, %s5762_s26  ;;  %3153 = vrot.lane.b32.xlu1 %v8533_v53, %s5761_s25 }
 0x9eb   :  { %v8572_v36 = vpop.permute.xlu0 %3307  ;;  %v8574_v6 = vpop.permute.xlu1 %3229 }
 0x9ec   :  { %10580 = vst [vmem:[#allocation41_spill] sm:$0xff] %v8572_v36  ;;  %10581 = vst [vmem:[#allocation93_spill] sm:$0xff] %v8574_v6 }
 0x9ed   :  { %3231 = vrot.lane.b32.xlu0 %v8502_v37, %s5762_s26  ;;  %3217 = vrot.lane.b32.xlu1 %v8500_v15, %s5762_s26 }
 0x9ef   :  { %v8580_v8 = vpop.permute.xlu0 %3323  ;;  %v8582_v56 = vpop.permute.xlu1 %3309 }
 0x9f0   :  { %10582 = vst [vmem:[#allocation91_spill] sm:$0xff] %v8580_v8  ;;  %10583 = vst [vmem:[#allocation76_spill] sm:$0xff] %v8582_v56 }
 0x9f1   :  { %3543 = vrot.lane.b32.xlu0 %v8350_v42, %s5766_s6  ;;  %3233 = vrot.lane.b32.xlu1 %v8533_v53, %s5762_s26 }
 0x9f3   :  { %v8588_v55 = vpop.permute.xlu0 %3387  ;;  %v8590_v49 = vpop.permute.xlu1 %3325 }
 0x9f4   :  { %10584 = vst [vmem:[#allocation57_spill] sm:$0xff] %v8588_v55  ;;  %10585 = vst [vmem:[#allocation90_spill] sm:$0xff] %v8590_v49 }
 0x9f5   :  { %3311 = vrot.lane.b32.xlu0 %v8479_v39, %s5763_s27  ;;  %3545 = vrot.lane.b32.xlu1 %v8364_v27, %s5766_s6  ;;  %v3247_v27 = vsel %vm322_vm4, %v8564_v60, %v8388_v19 }
 0x9f7   :  { %v8596_v16 = vpop.permute.xlu0 %3403  ;;  %v8598_v30 = vpop.permute.xlu1 %3389 }
 0x9f8   :  { %10586 = vst [vmem:[#allocation43_spill] sm:$0xff] %v8596_v16  ;;  %10587 = vst [vmem:[#allocation59_spill] sm:$0xff] %v8598_v30 }
 0x9f9   :  { %3327 = vrot.lane.b32.xlu0 %v8502_v37, %s5763_s27  ;;  %3561 = vrot.lane.b32.xlu1 %v8378_v50, %s5766_s6 }
 0x9fb   :  { %v8604_v8 = vpop.permute.xlu0 %3467  ;;  %v8606_v55 = vpop.permute.xlu1 %3405 }
 0x9fc   :  { %10588 = vst [vmem:[#allocation77_spill] sm:$0xff] %v8604_v8  ;;  %10589 = vst [vmem:[#allocation45_spill] sm:$0xff] %v8606_v55 }
 0x9fd   :  { %3391 = vrot.lane.b32.xlu0 %v8479_v39, %s5764_s28  ;;  %3313 = vrot.lane.b32.xlu1 %v8500_v15, %s5763_s27 }
 0x9ff   :  { %v8612_v49 = vpop.permute.xlu0 %3483  ;;  %v8614_v16 = vpop.permute.xlu1 %3469 }
 0xa00   :  { %10590 = vst [vmem:[#allocation44_spill] sm:$0xff] %v8612_v49  ;;  %10591 = vst [vmem:[#allocation96_spill] sm:$0xff] %v8614_v16 }
 0xa01   :  { %3407 = vrot.lane.b32.xlu0 %v8502_v37, %s5764_s28  ;;  %3329 = vrot.lane.b32.xlu1 %v8533_v53, %s5763_s27 }
 0xa03   :  { %v8620_v30 = vpop.permute.xlu0 %3547  ;;  %v8622_v8 = vpop.permute.xlu1 %3485 }
 0xa04   :  { %10592 = vst [vmem:[#allocation78_spill] sm:$0xff] %v8620_v30  ;;  %10593 = vst [vmem:[#allocation97_spill] sm:$0xff] %v8622_v8  ;;  %v2955_v8 = vld [vmem:[#allocation6 + $0x38] sm:$0xff] }
 0xa05   :  { %3471 = vrot.lane.b32.xlu0 %v8479_v39, %s5765_s29  ;;  %3393 = vrot.lane.b32.xlu1 %v8500_v15, %s5764_s28 }
 0xa06   :  { %3843 = vmatprep.mubr.f32.mxu0 %v2955_v8  ;;  %3997 = vmatprep.mubr.f32.mxu1 %v2955_v8  ;;  %v4992_v8 = vld [vmem:[%s10123_s5 + $0x10] sm:$0xff] }
 0xa07   :  { %v8628_v55 = vpop.permute.xlu0 %3563  ;;  %v8630_v49 = vpop.permute.xlu1 %3549 }
 0xa08   :  { %10594 = vst [vmem:[#allocation95_spill] sm:$0xff] %v8628_v55  ;;  %10595 = vst [vmem:[#allocation62_spill] sm:$0xff] %v8630_v49 }
 0xa09   :  { %3487 = vrot.lane.b32.xlu0 %v8502_v37, %s5765_s29  ;;  %3409 = vrot.lane.b32.xlu1 %v8533_v53, %s5764_s28 }
 0xa0b   :  { %v8636_v16 = vpop.permute.xlu0 %2967  ;;  %v8638_v30 = vpop.permute.xlu1 %3565 }
 0xa0c   :  { %10596 = vst [vmem:[#allocation79_spill] sm:$0xff] %v8638_v30 }
 0xa0d   :  { %3551 = vrot.lane.b32.xlu0 %v8479_v39, %s5766_s6  ;;  %3473 = vrot.lane.b32.xlu1 %v8500_v15, %s5765_s29 }
 0xa0f   :  { %v8644_v49 = vpop.permute.xlu0 %2983  ;;  %v8646_v55 = vpop.permute.xlu1 %2969 }
 0xa11   :  { %3559 = vrot.lane.b32.xlu0 %v8366_v11, %s5766_s6  ;;  %3489 = vrot.lane.b32.xlu1 %v8533_v53, %s5765_s29 }
 0xa13   :  { %v8652_v30 = vpop.permute.xlu0 %3047  ;;  %v8654_v56 = vpop.permute.xlu1 %2985 }
 0xa14   :  { %10597 = vst [vmem:[#allocation94_spill] sm:$0xff] %v8652_v30 }
 0xa15   :  { %3567 = vrot.lane.b32.xlu0 %v8502_v37, %s5766_s6  ;;  %3553 = vrot.lane.b32.xlu1 %v8500_v15, %s5766_s6 }
 0xa17   :  { %v8663_v21 = vpop.permute.xlu0 %3063  ;;  %v8665_v38 = vpop.permute.xlu1 %3049 }
 0xa18   :  { %10598 = vst [vmem:[#allocation60_spill] sm:$0xff] %v8663_v21  ;;  %10599 = vst [vmem:[#allocation100_spill] sm:$0xff] %v8665_v38 }
 0xa19   :  { %3765 = vperm.xlu0 %5619, %v4992_v8   ;;  %3569 = vrot.lane.b32.xlu1 %v8533_v53, %s5766_s6 }
 0xa1b   :  { %v8669_v47 = vpop.permute.xlu0 %3127  ;;  %v8671_v36 = vpop.permute.xlu1 %3065 }
 0xa1c   :  { %10600 = vst [vmem:[#allocation63_spill] sm:$0xff] %v8669_v47  ;;  %10601 = vst [vmem:[#allocation80_spill] sm:$0xff] %v8671_v36 }
 0xa1d   :  { %3770 = vperm.xlu1 %5618, %v4993_v62  }
 0xa1f   :  { %v8676_v6 = vpop.permute.xlu0 %3143  ;;  %v8678_v30 = vpop.permute.xlu1 %3129 }
 0xa20   :  { %10602 = vst [vmem:[#allocation61_spill] sm:$0xff] %v8676_v6  ;;  %10603 = vst [vmem:[#allocation101_spill] sm:$0xff] %v8678_v30 }
 0xa23   :  { %v8680_v21 = vpop.permute.xlu0 %3207  ;;  %v8682_v38 = vpop.permute.xlu1 %3145 }
 0xa24   :  { %10604 = vst [vmem:[#allocation99_spill] sm:$0xff] %v8680_v21  ;;  %10605 = vst [vmem:[#allocation98_spill] sm:$0xff] %v8682_v38 }
 0xa27   :  { %v8684_v8 = vpop.permute.xlu0 %3223  ;;  %v8686_v31 = vpop.permute.xlu1 %3209 }
 0xa28   :  { %10606 = vst [vmem:[#allocation81_spill] sm:$0xff] %v8684_v8 }
 0xa2b   :  { %v8688_v47 = vpop.permute.xlu0 %3303  ;;  %v8690_v36 = vpop.permute.xlu1 %3225 }
 0xa2c   :  { %10607 = vst [vmem:[#allocation82_spill] sm:$0xff] %v8688_v47  ;;  %v3080_v47 = vsel %vm198_vm2, %v8531_v20, %v8372_v45 }
 0xa2f   :  { %v8692_v35 = vpop.permute.xlu0 %3319  ;;  %v8694_v33 = vpop.permute.xlu1 %3305 }
 0xa30   :  { %10608 = vst [vmem:[#allocation102_spill] sm:$0xff] %v8694_v33  ;;  %v8741_v33 = vmul.f32 %v3080_v47, %v6122_v9  ;;  %v3167_v47 = vsel %vm260_vm3, %v8548_v24, %v8370_v5 }
 0xa31   :  { %v8844_v11 = vmul.f32 %v3167_v47, %v6166_v58 }
 0xa33   :  { %v8696_v62 = vpop.permute.xlu0 %3383  ;;  %v8698_v6 = vpop.permute.xlu1 %3321 }
 0xa34   :  { %10609 = vst [vmem:[#allocation103_spill] sm:$0xff] %v8696_v62  ;;  %10610 = vst [vmem:[#allocation104_spill] sm:$0xff] %v8698_v6  ;;  %v3083_v62 = vsel %vm198_vm2, %v8342_v2, %v8507_v4 }
 0xa35   :  { %v8752_v42 = vmul.f32 %v3083_v62, %v6099_v52  ;;  %v3160_v62 = vsel %vm260_vm3, %v8550_v63, %v8390_v40 }
 0xa37   :  { %v8700_v30 = vpop.permute.xlu0 %3399  ;;  %v8702_v21 = vpop.permute.xlu1 %3385 }
 0xa38   :  { %10611 = vst [vmem:[#allocation105_spill] sm:$0xff] %v8700_v30  ;;  %10612 = vst [vmem:[#allocation106_spill] sm:$0xff] %v8702_v21  ;;  %v3075_v21 = vsel %vm198_vm2, %v8356_v3, %v8529_v44 }
 0xa3b   :  { %v8704_v38 = vpop.permute.xlu0 %3463  ;;  %v8706_v8 = vpop.permute.xlu1 %3401 }
 0xa3c   :  { %10613 = vst [vmem:[#allocation107_spill] sm:$0xff] %v8704_v38  ;;  %10614 = vst [vmem:[#allocation108_spill] sm:$0xff] %v8706_v8  ;;  %v3079_v38 = vsel %vm198_vm2, %v8507_v4, %v8356_v3  ;;  %v3084_v8 = vsel %vm198_vm2, %v8358_v61, %v8531_v20  ;;  %v3087_v4 = vsel %vm198_vm2, %v8529_v44, %v8342_v2 }
 0xa3d   :  { %v3088_v20 = vsel %vm198_vm2, %v8542_v12, %v8358_v61  ;;  %v3076_v3 = vsel %vm198_vm2, %v8372_v45, %v8542_v12  ;;  %v8763_v61 = vmul.f32 %v3079_v38, %v6122_v9  ;;  %v8766_v44 = vmul.f32 %v3084_v8, %v6099_v52 }
 0xa3e   :  { %v3164_v45 = vsel %vm260_vm3, %v8382_v14, %v8550_v63  ;;  %v8777_v12 = vmul.f32 %v3087_v4, %v6129_v17  ;;  %v8780_v2 = vmul.f32 %v3075_v21, %v6132_v18  ;;  %v3163_v38 = vsel %vm260_vm3, %v8370_v5, %v8540_v54 }
 0xa3f   :  { %v8747_v30 = vpop.permute.xlu0 %3479  ;;  %v8749_v6 = vpop.permute.xlu1 %3465  ;;  %v8787_v8 = vmul.f32 %v3088_v20, %v6129_v17  ;;  %v3159_v63 = vsel %vm260_vm3, %v8540_v54, %v8380_v26  ;;  %v8796_v4 = vmul.f32 %v3076_v3, %v6132_v18  ;;  %v3168_v21 = vsel %vm260_vm3, %v8558_v22, %v8382_v14 }
 0xa40   :  { %10615 = vst [vmem:[#allocation109_spill] sm:$0xff] %v8747_v30  ;;  %10616 = vst [vmem:[#allocation110_spill] sm:$0xff] %v8749_v6  ;;  %v3155_v20 = vsel %vm260_vm3, %v8380_v26, %v8548_v24  ;;  %v8811_v54 = vmul.f32 %v3164_v45, %v6150_v43  ;;  %v8814_v3 = vmul.f32 %v3160_v62, %v6159_v51 }
 0xa41   :  { %v8819_v14 = vmul.f32 %v3163_v38, %v6150_v43  ;;  %v3239_v26 = vsel %vm322_vm4, %v8556_v28, %v8396_v23  ;;  %v3243_v5 = vsel %vm322_vm4, %v8388_v19, %v8556_v28  ;;  %v8832_v62 = vmul.f32 %v3159_v63, %v6159_v51 }
 0xa42   :  { %v3156_v38 = vsel %vm260_vm3, %v8390_v40, %v8558_v22  ;;  %v8847_v28 = vmul.f32 %v3155_v20, %v6169_v59  ;;  %v5420_v45 = vpack.c.bf16 %v8796_v4, %v8780_v2  ;;  %v8857_v22 = vmul.f32 %v3243_v5, %v6187_v34 }
 0xa43   :  { %v2976_v6 = vpop.permute.xlu0 %2975  ;;  %v8816_v30 = vpop.permute.xlu1 %3481  ;;  %v8860_v47 = vmul.f32 %v3239_v26, %v10549_v46  ;;  %v8865_v50 = vmul.f32 %v3156_v38, %v6169_v59  ;;  %v3240_v2 = vsel %vm322_vm4, %v8566_v0, %v8406_v41  ;;  %v3244_v4 = vsel %vm322_vm4, %v8398_v7, %v8566_v0 }
 0xa44   :  { %10617 = vst [vmem:[#allocation111_spill] sm:$0xff] %v8816_v30  ;;  %v8841_v30 = vmul.f32 %v3168_v21, %v6166_v58  ;;  %v3005_v63 = vsel %vm136_vm1, %v8636_v16, %v2976_v6  ;;  %v3235_v0 = vsel %vm322_vm4, %v8396_v23, %v8564_v60  ;;  %v3001_v23 = vsel %vm136_vm1, %v2976_v6, %v8644_v49 }
 0xa45   :  { %v3020_v38 = vmul.f32 %v3005_v63, %v10548_v57 }
 0xa47   :  { %v2992_v24 = vpop.permute.xlu0 %2991  ;;  %v2978_v21 = vpop.permute.xlu1 %2977 }
 0xa48   :  { %v3006_v26 = vsel %vm136_vm1, %v8646_v55, %v2978_v21  ;;  %v3002_v40 = vsel %vm136_vm1, %v2978_v21, %v8654_v56  ;;  %v2997_v63 = vsel %vm136_vm1, %v8644_v49, %v2992_v24  ;;  %v3009_v21 = vsel %vm136_vm1, %v2992_v24, %v8636_v16 }
 0xa49   :  { %v3024_v20 = vmul.f32 %v3006_v26, %v10548_v57  ;;  %v8900_v26 = vmul.f32 %v3244_v4, %v6187_v34  ;;  %v8903_v57 = vmul.f32 %v3240_v2, %v10549_v46  ;;  %v3025_v37 = vmul.f32 %v3002_v40, %v6067_v29  ;;  %v10618_v4 = vld [vmem:[#allocation16_spill] sm:$0xff]  ;;  %v10619_v40 = vld [vmem:[#allocation21_spill] sm:$0xff] }
 0xa4a   :  { %v3019_v2 = vmul.f32 %v3009_v21, %v6078_v32  ;;  %v3022_v39 = vmul.f32 %v2997_v63, %v10618_v4 }
 0xa4b   :  { %v3056_v5 = vpop.permute.xlu0 %3055  ;;  %v2994_v19 = vpop.permute.xlu1 %2993  ;;  %v5344_v60 = vpack.c.bf16 %v3024_v20, %v3020_v38  ;;  %v8922_v20 = vmul.f32 %v3247_v27, %v10619_v40  ;;  %v10626_v27 = vld [vmem:[#allocation41_spill] sm:$0xff] }
 0xa4c   :  { %v2998_v53 = vsel %vm136_vm1, %v8654_v56, %v2994_v19  ;;  %v3010_v16 = vsel %vm136_vm1, %v2994_v19, %v8646_v55  ;;  %v10620_v56 = vld [vmem:[#allocation22_spill] sm:$0xff]  ;;  %v3021_v55 = vmul.f32 %v3001_v23, %v6067_v29  ;;  %v10623_v29 = vld [vmem:[#allocation100_spill] sm:$0xff] }
 0xa4d   :  { %v3023_v6 = vmul.f32 %v3010_v16, %v6078_v32  ;;  %v3026_v49 = vmul.f32 %v2998_v53, %v10618_v4  ;;  %5345 = vmatprep.subr.bf16.mxu0 %v5344_v60  ;;  %v8925_v38 = vmul.f32 %v3235_v0, %v10620_v56  ;;  %v10621_v19 = vld [vmem:[#allocation94_spill] sm:$0xff]  ;;  %v10622_v60 = vld [vmem:[#allocation93_spill] sm:$0xff] }
 0xa4e   :  { %v3085_v24 = vsel %vm198_vm2, %v10621_v19, %v3056_v5  ;;  %v3236_v0 = vsel %vm322_vm4, %v8406_v41, %v10622_v60  ;;  %v3248_v23 = vsel %vm322_vm4, %v10622_v60, %v8398_v7  ;;  %v5418_v4 = vpack.c.bf16 %v3025_v37, %v3021_v55  ;;  %v10625_v41 = vld [vmem:[#allocation49_spill] sm:$0xff]  ;;  %v10627_v37 = vld [vmem:[#allocation60_spill] sm:$0xff] }
 0xa4f   :  { %v3072_v21 = vpop.permute.xlu0 %3071  ;;  %v5346_v16 = vpack.c.bf16 %v3023_v6, %v3019_v2  ;;  %v3058_v32 = vpop.permute.xlu1 %3057  ;;  %v5416_v53 = vpack.c.bf16 %v3026_v49, %v3022_v39  ;;  %v3100_v39 = vmul.f32 %v3085_v24, %v6099_v52  ;;  %v10624_v6 = vld [vmem:[#allocation80_spill] sm:$0xff]  ;;  %v3335_v7 = vsel %vm392_vm5, %v10626_v27, %v10625_v41 }
 0xa50   :  { %v3086_v2 = vsel %vm198_vm2, %v10623_v29, %v3058_v32  ;;  %v3082_v49 = vsel %vm198_vm2, %v3058_v32, %v10624_v6  ;;  %v3077_v55 = vsel %vm198_vm2, %v10627_v37, %v3072_v21  ;;  %v3089_v24 = vsel %vm198_vm2, %v3072_v21, %v10621_v19 }
 0xa51   :  { %v3104_v63 = vmul.f32 %v3086_v2, %v6099_v52  ;;  %5347 = vmatpush1.bf16.msra.mxu0 %v5346_v16  ;;  %5417 = vmatprep.subr.bf16.mxu1 %v5416_v53  ;;  %v10628_v32 = vpack.c.bf16 %v8766_v44, %v8752_v42  ;;  %v10629_v53 = vld [vmem:[#allocation68_spill] sm:$0xff]  ;;  %v8969_v2 = vmul.f32 %v3248_v23, %v10619_v40 }
 0xa52   :  { %5419 = vmatpush1.bf16.msra.mxu1 %v5418_v4  ;;  %v3339_v60 = vsel %vm392_vm5, %v10629_v53, %v10626_v27  ;;  %v3081_v52 = vsel %vm198_vm2, %v3056_v5, %v10627_v37  ;;  %v8975_v42 = vmul.f32 %v3236_v0, %v10620_v56  ;;  %v3105_v44 = vmul.f32 %v3082_v49, %v6122_v9  ;;  %v10632_v37 = vld [vmem:[#allocation63_spill] sm:$0xff] }
 0xa53   :  { %5349 = vmatprep.subr.bf16.mxu0 %v10628_v32  ;;  %v3136_v16 = vpop.permute.xlu0 %3135  ;;  %5421 = vmatprep.subr.bf16.mxu1 %v5420_v45  ;;  %v3074_v19 = vpop.permute.xlu1 %3073  ;;  %v5352_v21 = vpack.c.bf16 %v3104_v63, %v3100_v39  ;;  %v3099_v23 = vmul.f32 %v3089_v24, %v6129_v17  ;;  %v3102_v5 = vmul.f32 %v3077_v55, %v6132_v18  ;;  %v10631_v39 = vld [vmem:[#allocation23_spill] sm:$0xff]  ;;  %v10634_v32 = vld [vmem:[#allocation24_spill] sm:$0xff] }
 0xa54   :  { %v3078_v4 = vsel %vm198_vm2, %v10624_v6, %v3074_v19  ;;  %v3090_v27 = vsel %vm198_vm2, %v3074_v19, %v10623_v29  ;;  %v10630_v0 = vpack.c.bf16 %v8787_v8, %v8777_v12  ;;  %v8992_v49 = vmul.f32 %v3339_v60, %v10631_v39 }
 0xa55   :  { %v3103_v45 = vmul.f32 %v3090_v27, %v6129_v17  ;;  %v3106_v63 = vmul.f32 %v3078_v4, %v6132_v18  ;;  %v3101_v6 = vmul.f32 %v3081_v52, %v6122_v9  ;;  %v3165_v29 = vsel %vm260_vm3, %v10632_v37, %v3136_v16  ;;  %v10635_v52 = vld [vmem:[#allocation76_spill] sm:$0xff]  ;;  %v10636_v27 = vld [vmem:[#allocation69_spill] sm:$0xff] }
 0xa56   :  { %5351 = vmatpush1.bf16.msra.mxu0 %v10630_v0  ;;  %v10633_v55 = vpack.c.bf16 %v8741_v33, %v8763_v61  ;;  %v9002_v19 = vmul.f32 %v3335_v7, %v10634_v32  ;;  %v5366_v12 = vpack.c.bf16 %v8969_v2, %v8922_v20  ;;  %v3340_v0 = vsel %vm392_vm5, %v10636_v27, %v10635_v52  ;;  %v10637_v18 = vld [vmem:[#allocation101_spill] sm:$0xff]  ;;  %v10658_v20 = vld [vmem:[#allocation70_spill] sm:$0xff] }
 0xa57   :  { %5353 = vmatprep.subr.bf16.mxu0 %v5352_v21  ;;  %v3152_v24 = vpop.permute.xlu0 %3151  ;;  %v5354_v8 = vpack.c.bf16 %v3103_v45, %v3099_v23  ;;  %v3138_v60 = vpop.permute.xlu1 %3137  ;;  %v5424_v4 = vpack.c.bf16 %v3106_v63, %v3102_v5  ;;  %v5426_v21 = vpack.c.bf16 %v3105_v44, %v3101_v6  ;;  %v5436_v61 = vpack.c.bf16 %v8975_v42, %v8925_v38  ;;  %v10639_v45 = vld [vmem:[#allocation91_spill] sm:$0xff]  ;;  %v10640_v63 = vld [vmem:[#allocation61_spill] sm:$0xff] }
 0xa58   :  { %5423 = vmatpush1.bf16.msra.mxu1 %v10633_v55  ;;  %v3166_v33 = vsel %vm260_vm3, %v10637_v18, %v3138_v60  ;;  %v3180_v7 = vmul.f32 %v3165_v29, %v6150_v43  ;;  %v10638_v55 = vld [vmem:[#allocation98_spill] sm:$0xff]  ;;  %v3331_v44 = vsel %vm392_vm5, %v10625_v41, %v10639_v45  ;;  %v3157_v6 = vsel %vm260_vm3, %v10640_v63, %v3152_v24  ;;  %v10642_v41 = vld [vmem:[#allocation55_spill] sm:$0xff] }
 0xa59   :  { %v3162_v23 = vsel %vm260_vm3, %v3138_v60, %v10638_v55  ;;  %v3184_v5 = vmul.f32 %v3166_v33, %v6150_v43  ;;  %5425 = vmatprep.subr.bf16.mxu1 %v5424_v4  ;;  %v3169_v38 = vsel %vm260_vm3, %v3152_v24, %v10632_v37  ;;  %v10641_v42 = vpack.c.bf16 %v8811_v54, %v8819_v14 }
 0xa5a   :  { %5355 = vmatpush1.bf16.msra.mxu0 %v5354_v8  ;;  %v3343_v8 = vsel %vm392_vm5, %v10639_v45, %v10629_v53  ;;  %v3336_v60 = vsel %vm392_vm5, %v10635_v52, %v10642_v41  ;;  %v3161_v37 = vsel %vm260_vm3, %v3136_v16, %v10640_v63  ;;  %v10643_v54 = vpack.c.bf16 %v8865_v50, %v8847_v28  ;;  %v10647_v63 = vld [vmem:[#allocation25_spill] sm:$0xff] }
 0xa5b   :  { %5357 = vmatprep.subr.bf16.mxu0 %v10641_v42  ;;  %v3216_v29 = vpop.permute.xlu0 %3215  ;;  %v3154_v14 = vpop.permute.xlu1 %3153  ;;  %v5360_v24 = vpack.c.bf16 %v3184_v5, %v3180_v7  ;;  %v9048_v4 = vmul.f32 %v3340_v0, %v10631_v39  ;;  %v3185_v53 = vmul.f32 %v3162_v23, %v6159_v51  ;;  %v3179_v16 = vmul.f32 %v3169_v38, %v6166_v58  ;;  %v10645_v23 = vld [vmem:[#allocation99_spill] sm:$0xff] }
 0xa5c   :  { %5427 = vmatpush1.bf16.msra.mxu1 %v5426_v21  ;;  %v3158_v21 = vsel %vm260_vm3, %v10638_v55, %v3154_v14  ;;  %v3170_v52 = vsel %vm260_vm3, %v3154_v14, %v10637_v18  ;;  %v3182_v50 = vmul.f32 %v3157_v6, %v6169_v59  ;;  %v10644_v0 = vpack.c.bf16 %v8841_v30, %v8844_v11  ;;  %v10648_v11 = vld [vmem:[#allocation26_spill] sm:$0xff] }
 0xa5d   :  { %5429 = vmatprep.subr.bf16.mxu1 %v10643_v54  ;;  %v3183_v28 = vmul.f32 %v3170_v52, %v6166_v58  ;;  %v3186_v33 = vmul.f32 %v3158_v21, %v6169_v59  ;;  %v9065_v7 = vmul.f32 %v3336_v60, %v10634_v32  ;;  %v3181_v55 = vmul.f32 %v3161_v37, %v6159_v51  ;;  %v10649_v54 = vld [vmem:[#allocation90_spill] sm:$0xff]  ;;  %v10650_v21 = vld [vmem:[#allocation81_spill] sm:$0xff]  ;;  %v10685_v37 = vld [vmem:[#allocation92_spill] sm:$0xff] }
 0xa5e   :  { %5359 = vmatpush1.bf16.msra.mxu0 %v10644_v0  ;;  %v3245_v18 = vsel %vm322_vm4, %v10645_v23, %v3216_v29  ;;  %v10646_v5 = vpack.c.bf16 %v8814_v3, %v8832_v62  ;;  %v9075_v6 = vmul.f32 %v3331_v44, %v10647_v63  ;;  %v9078_v30 = vmul.f32 %v3343_v8, %v10648_v11 }
 0xa5f   :  { %5361 = vmatprep.subr.bf16.mxu0 %v5360_v24  ;;  %v3232_v45 = vpop.permute.xlu0 %3231  ;;  %v5362_v38 = vpack.c.bf16 %v3183_v28, %v3179_v16  ;;  %v3218_v42 = vpop.permute.xlu1 %3217  ;;  %v5432_v60 = vpack.c.bf16 %v3186_v33, %v3182_v50  ;;  %v3332_v14 = vsel %vm392_vm5, %v10642_v41, %v10649_v54  ;;  %v5434_v3 = vpack.c.bf16 %v3185_v53, %v3181_v55  ;;  %v10652_v28 = vld [vmem:[#allocation72_spill] sm:$0xff]  ;;  %v10653_v33 = vld [vmem:[#allocation57_spill] sm:$0xff] }
 0xa60   :  { %5431 = vmatpush1.bf16.msra.mxu1 %v10646_v5  ;;  %v3246_v62 = vsel %vm322_vm4, %v8686_v31, %v3218_v42  ;;  %v3260_v44 = vmul.f32 %v3245_v18, %v6187_v34  ;;  %v3242_v8 = vsel %vm322_vm4, %v3218_v42, %v8690_v36  ;;  %v3237_v52 = vsel %vm322_vm4, %v10650_v21, %v3232_v45 }
 0xa61   :  { %v3264_v24 = vmul.f32 %v3246_v62, %v6187_v34  ;;  %5433 = vmatprep.subr.bf16.mxu1 %v5432_v60  ;;  %v3249_v41 = vsel %vm322_vm4, %v3232_v45, %v10645_v23  ;;  %v10651_v53 = vpack.c.bf16 %v8900_v26, %v8857_v22  ;;  %v3415_v0 = vsel %vm454_vm6, %v10653_v33, %v10652_v28  ;;  %v10654_v60 = vld [vmem:[#allocation54_spill] sm:$0xff] }
 0xa62   :  { %5363 = vmatpush1.bf16.msra.mxu0 %v5362_v38  ;;  %v3344_v55 = vsel %vm392_vm5, %v10649_v54, %v10636_v27  ;;  %v3241_v22 = vsel %vm322_vm4, %v3216_v29, %v10650_v21  ;;  %v9119_v18 = vmul.f32 %v3332_v14, %v10647_v63  ;;  %v3265_v5 = vmul.f32 %v3242_v8, %v10549_v46  ;;  %v10655_v54 = vld [vmem:[#allocation59_spill] sm:$0xff]  ;;  %v10656_v14 = vld [vmem:[#allocation53_spill] sm:$0xff] }
 0xa63   :  { %5365 = vmatprep.subr.bf16.mxu0 %v10651_v53  ;;  %v9103_v16 = vpop.permute.xlu0 %3543  ;;  %v3234_v26 = vpop.permute.xlu1 %3233  ;;  %v5368_v23 = vpack.c.bf16 %v3264_v24, %v3260_v44  ;;  %v3259_v38 = vmul.f32 %v3249_v41, %v10619_v40  ;;  %v3262_v29 = vmul.f32 %v3237_v52, %v10620_v56  ;;  %v10657_v62 = vpack.c.bf16 %v8903_v57, %v8860_v47  ;;  %v10659_v52 = vld [vmem:[#allocation43_spill] sm:$0xff]  ;;  %v10660_v57 = vld [vmem:[#allocation45_spill] sm:$0xff] }
 0xa64   :  { %5435 = vmatpush1.bf16.msra.mxu1 %v5434_v3  ;;  %v3238_v45 = vsel %vm322_vm4, %v8690_v36, %v3234_v26  ;;  %v3250_v27 = vsel %vm322_vm4, %v3234_v26, %v8686_v31  ;;  %v3416_v36 = vsel %vm454_vm6, %v10655_v54, %v10654_v60  ;;  %v3420_v31 = vsel %vm454_vm6, %v10656_v14, %v10655_v54 }
 0xa65   :  { %5437 = vmatprep.subr.bf16.mxu1 %v5436_v61  ;;  %v3263_v61 = vmul.f32 %v3250_v27, %v10619_v40  ;;  %v3266_v42 = vmul.f32 %v3238_v45, %v10620_v56  ;;  %v3261_v3 = vmul.f32 %v3241_v22, %v10549_v46  ;;  %v3419_v2 = vsel %vm454_vm6, %v10658_v20, %v10653_v33  ;;  %v10661_v22 = vld [vmem:[#allocation27_spill] sm:$0xff]  ;;  %v10690_v40 = vld [vmem:[#allocation102_spill] sm:$0xff]  ;;  %v10701_v46 = vld [vmem:[#allocation97_spill] sm:$0xff] }
 0xa66   :  { %5367 = vmatpush1.bf16.msra.mxu0 %v5366_v12  ;;  %v9152_v12 = vmul.f32 %v3344_v55, %v10648_v11  ;;  %v3411_v41 = vsel %vm454_vm6, %v10652_v28, %v10659_v52  ;;  %v3412_v47 = vsel %vm454_vm6, %v10654_v60, %v10660_v57  ;;  %v3424_v53 = vsel %vm454_vm6, %v10660_v57, %v10656_v14  ;;  %v10662_v28 = vld [vmem:[#allocation28_spill] sm:$0xff]  ;;  %v10665_v60 = vld [vmem:[#allocation30_spill] sm:$0xff]  ;;  %v10674_v57 = vld [vmem:[#allocation87_spill] sm:$0xff] }
 0xa67   :  { %5369 = vmatprep.subr.bf16.mxu0 %v5368_v23  ;;  %v3312_v44 = vpop.permute.xlu0 %3311  ;;  %v5370_v8 = vpack.c.bf16 %v3263_v61, %v3259_v38  ;;  %v9154_v24 = vpop.permute.xlu1 %3545  ;;  %v5440_v21 = vpack.c.bf16 %v3266_v42, %v3262_v29  ;;  %v5442_v33 = vpack.c.bf16 %v3265_v5, %v3261_v3  ;;  %v3423_v55 = vsel %vm454_vm6, %v10659_v52, %v10658_v20  ;;  %v10664_v61 = vld [vmem:[#allocation29_spill] sm:$0xff]  ;;  %v10667_v14 = vld [vmem:[#allocation52_spill] sm:$0xff]  ;;  %v10669_v20 = vld [vmem:[#allocation71_spill] sm:$0xff] }
 0xa68   :  { %5439 = vmatpush1.bf16.msra.mxu1 %v10657_v62  ;;  %v9173_v26 = vmul.f32 %v3420_v31, %v10661_v22  ;;  %v9176_v23 = vmul.f32 %v3416_v36, %v10662_v28  ;;  %v9179_v45 = vmul.f32 %v3419_v2, %v10661_v22  ;;  %v9182_v27 = vmul.f32 %v3415_v0, %v10662_v28  ;;  %v10666_v36 = vld [vmem:[#allocation96_spill] sm:$0xff]  ;;  %v10670_v2 = vld [vmem:[#allocation77_spill] sm:$0xff]  ;;  %v10684_v5 = vld [vmem:[#allocation42_spill] sm:$0xff] }
 0xa69   :  { %5441 = vmatprep.subr.bf16.mxu1 %v5440_v21  ;;  %v10663_v38 = vpack.c.bf16 %v8267_v1, %v8260_v13  ;;  %v9190_v42 = vmul.f32 %v3412_v47, %v10664_v61  ;;  %v9193_v54 = vmul.f32 %v3424_v53, %v10665_v60  ;;  %v3500_v0 = vsel %vm516_vm7, %v10667_v14, %v10666_v36  ;;  %v10671_v21 = vld [vmem:[#allocation74_spill] sm:$0xff] }
 0xa6a   :  { %5371 = vmatpush1.bf16.msra.mxu0 %v5370_v8  ;;  %v10668_v31 = vpack.c.bf16 %v8276_v48, %v8269_v25  ;;  %v5452_v13 = vpack.c.bf16 %v9152_v12, %v9078_v30  ;;  %v9207_v1 = vmul.f32 %v3411_v41, %v10664_v61  ;;  %v9210_v62 = vmul.f32 %v3423_v55, %v10665_v60  ;;  %v10672_v30 = vld [vmem:[#allocation44_spill] sm:$0xff]  ;;  %v10673_v41 = vld [vmem:[#allocation86_spill] sm:$0xff] }
 0xa6b   :  { %5373 = vmatprep.subr.bf16.mxu0 %v10663_v38  ;;  %v3328_v29 = vpop.permute.xlu0 %3327  ;;  %v9202_v3 = vpop.permute.xlu1 %3561  ;;  %v3495_v8 = vsel %vm516_vm7, %v10670_v2, %v10669_v20  ;;  %v3499_v25 = vsel %vm516_vm7, %v10671_v21, %v10670_v2  ;;  %v3491_v12 = vsel %vm516_vm7, %v10669_v20, %v10672_v30  ;;  %v3503_v52 = vsel %vm516_vm7, %v10672_v30, %v10671_v21  ;;  %v10677_v38 = vld [vmem:[#allocation31_spill] sm:$0xff]  ;;  %v10680_v30 = vld [vmem:[#allocation48_spill] sm:$0xff] }
 0xa6c   :  { %5443 = vmatpush1.bf16.msra.mxu1 %v5442_v33  ;;  %v10675_v47 = vpack.c.bf16 %v10673_v41, %v10674_v57  ;;  %v10676_v33 = vld [vmem:[#allocation75_spill] sm:$0xff]  ;;  %v3337_v20 = vsel %vm392_vm5, %v3312_v44, %v8692_v35  ;;  %v9252_v48 = vmul.f32 %v3499_v25, %v10677_v38  ;;  %v10686_v50 = vpack.c.bf16 %v10684_v5, %v10685_v37 }
 0xa6d   :  { %5445 = vmatprep.subr.bf16.mxu1 %v10668_v31  ;;  %v3496_v55 = vsel %vm516_vm7, %v10666_v36, %v10676_v33  ;;  %v9240_v31 = vmul.f32 %v3500_v0, %v10677_v38  ;;  %v10678_v2 = vld [vmem:[#allocation39_spill] sm:$0xff]  ;;  %v10683_v36 = vld [vmem:[#allocation32_spill] sm:$0xff] }
 0xa6e   :  { %5375 = vmatpush1.bf16.msra.mxu0 %v10675_v47  ;;  %v10679_v21 = vpack.c.bf16 %v8500_v15, %v10678_v2  ;;  %v10681_v41 = vld [vmem:[#allocation67_spill] sm:$0xff]  ;;  %v9255_v53 = vmul.f32 %v3495_v8, %v10683_v36  ;;  %v5460_v2 = vpack.c.bf16 %v9193_v54, %v9210_v62  ;;  %v9277_v37 = vmul.f32 %v3496_v55, %v10683_v36 }
 0xa6f   :  { %v10682_v57 = vpack.c.bf16 %v10680_v30, %v10681_v41  ;;  %v3392_v47 = vpop.permute.xlu0 %3391  ;;  %v3314_v15 = vpop.permute.xlu1 %3313  ;;  %v10688_v41 = vld [vmem:[#allocation34_spill] sm:$0xff]  ;;  %v3356_v54 = vmul.f32 %v3337_v20, %v10634_v32  ;;  %v3333_v55 = vsel %vm392_vm5, %v8692_v35, %v3328_v29  ;;  %v10696_v20 = vld [vmem:[#allocation51_spill] sm:$0xff]  ;;  %v3492_v35 = vsel %vm516_vm7, %v10676_v33, %v10701_v46 }
 0xa70   :  { %5377 = vmatprep.subr.bf16.mxu0 %v10679_v21  ;;  %v10687_v21 = vld [vmem:[#allocation33_spill] sm:$0xff]  ;;  %v9268_v25 = vmul.f32 %v3503_v52, %v10688_v41  ;;  %v3342_v0 = vsel %vm392_vm5, %v10690_v40, %v3314_v15  ;;  %v10693_v52 = vld [vmem:[#allocation88_spill] sm:$0xff] }
 0xa71   :  { %5447 = vmatpush1.bf16.msra.mxu1 %v10682_v57  ;;  %v9265_v30 = vmul.f32 %v3491_v12, %v10687_v21  ;;  %v10689_v57 = vld [vmem:[#allocation104_spill] sm:$0xff]  ;;  %v10692_v12 = vld [vmem:[#allocation50_spill] sm:$0xff] }
 0xa72   :  { %5449 = vmatprep.subr.bf16.mxu1 %v10686_v50  ;;  %v3338_v8 = vsel %vm392_vm5, %v3314_v15, %v10689_v57  ;;  %v10691_v50 = vld [vmem:[#allocation82_spill] sm:$0xff]  ;;  %v10694_v34 = vpack.c.bf16 %v10692_v12, %v10693_v52  ;;  %v10700_v52 = vld [vmem:[#allocation73_spill] sm:$0xff] }
 0xa73   :  { %v3341_v5 = vsel %vm392_vm5, %v10691_v50, %v3312_v44  ;;  %v3360_v62 = vmul.f32 %v3338_v8, %v10634_v32  ;;  %v3345_v15 = vsel %vm392_vm5, %v3328_v29, %v10691_v50  ;;  %v10695_v44 = vpack.c.bf16 %v9065_v7, %v9002_v19  ;;  %v10697_v8 = vld [vmem:[#allocation89_spill] sm:$0xff]  ;;  %v10699_v12 = vld [vmem:[#allocation78_spill] sm:$0xff]  ;;  %v3330_v19 = vpop.permute.xlu1 %3329 }
 0xa74   :  { %5379 = vmatpush1.bf16.msra.mxu0 %v10694_v34  ;;  %v10698_v32 = vpack.c.bf16 %v10696_v20, %v10697_v8  ;;  %v3408_v34 = vpop.permute.xlu0 %3407  ;;  %v3579_v56 = vsel %vm578_vm8, %v10700_v52, %v10699_v12  ;;  %v3359_v29 = vmul.f32 %v3342_v0, %v10631_v39  ;;  %v3355_v50 = vmul.f32 %v3341_v5, %v10631_v39 }
 0xa75   :  { %5381 = vmatprep.subr.bf16.mxu0 %v10695_v44  ;;  %v5384_v7 = vpack.c.bf16 %v3360_v62, %v3356_v54  ;;  %v3334_v44 = vsel %vm392_vm5, %v10689_v57, %v3330_v19  ;;  %v3346_v33 = vsel %vm392_vm5, %v3330_v19, %v10690_v40  ;;  %v3357_v0 = vmul.f32 %v3333_v55, %v10647_v63  ;;  %v10704_v40 = vld [vmem:[#allocation105_spill] sm:$0xff] }
 0xa76   :  { %5451 = vmatpush1.bf16.msra.mxu1 %v10698_v32  ;;  %v3504_v32 = vsel %vm516_vm7, %v10701_v46, %v10667_v14  ;;  %v3361_v54 = vmul.f32 %v3334_v44, %v10647_v63  ;;  %v3362_v62 = vmul.f32 %v3346_v33, %v10648_v11  ;;  %v10702_v46 = vpack.c.bf16 %v9048_v4, %v8992_v49  ;;  %v10703_v14 = vld [vmem:[#allocation56_spill] sm:$0xff]  ;;  %v10706_v44 = vld [vmem:[#allocation35_spill] sm:$0xff] }
 0xa77   :  { %5453 = vmatprep.subr.bf16.mxu1 %v5452_v13  ;;  %v3358_v13 = vmul.f32 %v3345_v15, %v10648_v11  ;;  %v3575_v57 = vsel %vm578_vm8, %v10699_v12, %v10703_v14  ;;  %v9333_v5 = vmul.f32 %v3492_v35, %v10687_v21  ;;  %v3417_v55 = vsel %vm454_vm6, %v3392_v47, %v10704_v40  ;;  %v3394_v19 = vpop.permute.xlu1 %3393  ;;  %v10707_v33 = vld [vmem:[#allocation108_spill] sm:$0xff] }
 0xa78   :  { %5383 = vmatpush1.bf16.msra.mxu0 %v10702_v46  ;;  %v10705_v15 = vpack.c.bf16 %v9119_v18, %v9075_v6  ;;  %v3472_v20 = vpop.permute.xlu0 %3471  ;;  %v9342_v49 = vmul.f32 %v3504_v32, %v10688_v41  ;;  %v5386_v4 = vpack.c.bf16 %v3359_v29, %v3355_v50  ;;  %v5458_v8 = vpack.c.bf16 %v3361_v54, %v3357_v0  ;;  %v10709_v32 = vld [vmem:[#allocation103_spill] sm:$0xff]  ;;  %v10710_v0 = vld [vmem:[#allocation36_spill] sm:$0xff] }
 0xa79   :  { %5385 = vmatprep.subr.bf16.mxu0 %v5384_v7  ;;  %v5456_v12 = vpack.c.bf16 %v3362_v62, %v3358_v13  ;;  %v9345_v35 = vmul.f32 %v3579_v56, %v10706_v44  ;;  %v3418_v46 = vsel %vm454_vm6, %v3394_v19, %v10707_v33  ;;  %v10708_v7 = vld [vmem:[#allocation106_spill] sm:$0xff]  ;;  %v5396_v18 = vpack.c.bf16 %v9277_v37, %v9255_v53 }
 0xa7a   :  { %5455 = vmatpush1.bf16.msra.mxu1 %v10705_v15  ;;  %v3422_v6 = vsel %vm454_vm6, %v10708_v7, %v3394_v19  ;;  %v3421_v29 = vsel %vm454_vm6, %v10709_v32, %v3392_v47  ;;  %v3436_v50 = vmul.f32 %v3417_v55, %v10662_v28  ;;  %v3440_v56 = vmul.f32 %v3418_v46, %v10662_v28  ;;  %v10714_v19 = vld [vmem:[#allocation40_spill] sm:$0xff]  ;;  %v10716_v46 = vld [vmem:[#allocation109_spill] sm:$0xff] }
 0xa7b   :  { %5457 = vmatprep.subr.bf16.mxu1 %v5456_v12  ;;  %v9361_v13 = vmul.f32 %v3575_v57, %v10710_v0  ;;  %v3413_v54 = vsel %vm454_vm6, %v10704_v40, %v3408_v34  ;;  %v3425_v53 = vsel %vm454_vm6, %v3408_v34, %v10709_v32  ;;  %v10711_v47 = vpack.c.bf16 %v9176_v23, %v9182_v27  ;;  %v3410_v55 = vpop.permute.xlu1 %3409  ;;  %v10715_v12 = vld [vmem:[#allocation62_spill] sm:$0xff] }
 0xa7c   :  { %5387 = vmatpush1.bf16.msra.mxu0 %v5386_v4  ;;  %v3488_v37 = vpop.permute.xlu0 %3487  ;;  %v5470_v62 = vpack.c.bf16 %v9333_v5, %v9265_v30  ;;  %v3439_v57 = vmul.f32 %v3422_v6, %v10661_v22  ;;  %v5392_v15 = vpack.c.bf16 %v3440_v56, %v3436_v50  ;;  %v5468_v40 = vpack.c.bf16 %v9342_v49, %v9268_v25  ;;  %v10712_v4 = vld [vmem:[#allocation95_spill] sm:$0xff] }
 0xa7d   :  { %5389 = vmatprep.subr.bf16.mxu0 %v10711_v47  ;;  %v3571_v34 = vsel %vm578_vm8, %v10703_v14, %v10712_v4  ;;  %v3435_v23 = vmul.f32 %v3421_v29, %v10661_v22  ;;  %v3414_v27 = vsel %vm454_vm6, %v10707_v33, %v3410_v55  ;;  %v3437_v30 = vmul.f32 %v3413_v54, %v10664_v61  ;;  %v10719_v54 = vld [vmem:[#allocation37_spill] sm:$0xff]  ;;  %v10720_v47 = vld [vmem:[#allocation79_spill] sm:$0xff] }
 0xa7e   :  { %5459 = vmatpush1.bf16.msra.mxu1 %v5458_v8  ;;  %v3438_v5 = vmul.f32 %v3425_v53, %v10665_v60  ;;  %v3441_v25 = vmul.f32 %v3414_v27, %v10664_v61  ;;  %v10713_v14 = vpack.c.bf16 %v9173_v26, %v9179_v45  ;;  %v3583_v8 = vsel %vm578_vm8, %v10712_v4, %v10700_v52  ;;  %v10718_v45 = vld [vmem:[#allocation58_spill] sm:$0xff] }
 0xa7f   :  { %5461 = vmatprep.subr.bf16.mxu1 %v5460_v2  ;;  %v3426_v2 = vsel %vm454_vm6, %v3410_v55, %v10708_v7  ;;  %v3576_v33 = vsel %vm578_vm8, %v10715_v12, %v10714_v19  ;;  %v3497_v7 = vsel %vm516_vm7, %v3472_v20, %v10716_v46  ;;  %v10717_v6 = vpack.c.bf16 %v9190_v42, %v9207_v1  ;;  %v3474_v50 = vpop.permute.xlu1 %3473  ;;  %v10721_v42 = vld [vmem:[#allocation111_spill] sm:$0xff] }
 0xa80   :  { %v3442_v49 = vmul.f32 %v3426_v2, %v10665_v60  ;;  %5391 = vmatpush1.bf16.msra.mxu0 %v10713_v14  ;;  %v3552_v26 = vpop.permute.xlu0 %3551  ;;  %v3580_v52 = vsel %vm578_vm8, %v10718_v45, %v10715_v12  ;;  %v5394_v32 = vpack.c.bf16 %v3439_v57, %v3435_v23  ;;  %v5466_v29 = vpack.c.bf16 %v3441_v25, %v3437_v30  ;;  %v10723_v57 = vld [vmem:[#allocation107_spill] sm:$0xff] }
 0xa81   :  { %5393 = vmatprep.subr.bf16.mxu0 %v5392_v15  ;;  %v9414_v53 = vmul.f32 %v3571_v34, %v10719_v54  ;;  %v3584_v55 = vsel %vm578_vm8, %v10720_v47, %v10718_v45  ;;  %v3498_v1 = vsel %vm516_vm7, %v3474_v50, %v10721_v42  ;;  %v10722_v15 = vld [vmem:[#allocation110_spill] sm:$0xff]  ;;  %v3501_v23 = vsel %vm516_vm7, %v10723_v57, %v3472_v20 }
 0xa82   :  { %5463 = vmatpush1.bf16.msra.mxu1 %v10717_v6  ;;  %v5464_v56 = vpack.c.bf16 %v3442_v49, %v3438_v5  ;;  %v3502_v4 = vsel %vm516_vm7, %v10722_v15, %v3474_v50  ;;  %v3516_v34 = vmul.f32 %v3497_v7, %v10683_v36  ;;  %v3520_v27 = vmul.f32 %v3498_v1, %v10683_v36  ;;  %v10724_v20 = vld [vmem:[#allocation38_spill] sm:$0xff] }
 0xa83   :  { %v3592_v2 = vmul.f32 %v3576_v33, %v10710_v0  ;;  %v3493_v30 = vsel %vm516_vm7, %v10716_v46, %v3488_v37  ;;  %v3505_v5 = vsel %vm516_vm7, %v3488_v37, %v10723_v57  ;;  %v3590_v49 = vmul.f32 %v3583_v8, %v10724_v20  ;;  %v3490_v33 = vpop.permute.xlu1 %3489 }
 0xa84   :  { %5395 = vmatpush1.bf16.msra.mxu0 %v5394_v32  ;;  %5465 = vmatprep.subr.bf16.mxu1 %v5464_v56  ;;  %v3560_v25 = vpop.permute.xlu0 %3559  ;;  %v3572_v14 = vsel %vm578_vm8, %v10714_v19, %v10720_v47  ;;  %v3519_v12 = vmul.f32 %v3502_v4, %v10677_v38  ;;  %v5400_v7 = vpack.c.bf16 %v3520_v27, %v3516_v34  ;;  %v2954_v34 = vld [vmem:[#allocation6 + $0x30] sm:$0xff] }
 0xa85   :  { %5397 = vmatprep.subr.bf16.mxu0 %v5396_v18  ;;  %v3594_v46 = vmul.f32 %v3584_v55, %v10724_v20  ;;  %v3515_v6 = vmul.f32 %v3501_v23, %v10677_v38  ;;  %v3494_v18 = vsel %vm516_vm7, %v10721_v42, %v3490_v33  ;;  %v3506_v37 = vsel %vm516_vm7, %v3490_v33, %v10722_v15 }
 0xa86   :  { %5467 = vmatpush1.bf16.msra.mxu1 %v5466_v29  ;;  %v3517_v8 = vmul.f32 %v3493_v30, %v10687_v21  ;;  %v3518_v19 = vmul.f32 %v3505_v5, %v10688_v41  ;;  %v3522_v45 = vmul.f32 %v3506_v37, %v10688_v41  ;;  %v10725_v32 = vpack.c.bf16 %v9240_v31, %v9252_v48 }
 0xa87   :  { %5469 = vmatprep.subr.bf16.mxu1 %v5468_v40  ;;  %v3521_v40 = vmul.f32 %v3494_v18, %v10687_v21  ;;  %v3591_v29 = vmul.f32 %v3580_v52, %v10706_v44  ;;  %v3577_v50 = vsel %vm578_vm8, %v3552_v26, %v3560_v25  ;;  %v5404_v47 = vpack.c.bf16 %v3592_v2, %v9361_v13  ;;  %v3554_v15 = vpop.permute.xlu1 %3553 }
 0xa88   :  { %5399 = vmatpush1.bf16.msra.mxu0 %v10725_v32  ;;  %v3568_v56 = vpop.permute.xlu0 %3567  ;;  %v3593_v55 = vmul.f32 %v3572_v14, %v10719_v54  ;;  %v5402_v42 = vpack.c.bf16 %v3519_v12, %v3515_v6  ;;  %v5472_v4 = vpack.c.bf16 %v3522_v45, %v3518_v19  ;;  %v3581_v48 = vsel %vm578_vm8, %v9103_v16, %v3552_v26  ;;  %v2959_v19 = vld [vmem:[#allocation6 + $0x58] sm:$0xff] }
 0xa89   :  { %5401 = vmatprep.subr.bf16.mxu0 %v5400_v7  ;;  %v5474_v1 = vpack.c.bf16 %v3521_v40, %v3517_v8  ;;  %v3578_v31 = vsel %vm578_vm8, %v3554_v15, %v9202_v3  ;;  %v5476_v52 = vpack.c.bf16 %v3594_v46, %v3590_v49  ;;  %v3596_v13 = vmul.f32 %v3577_v50, %v10710_v0  ;;  %v2957_v46 = vld [vmem:[#allocation6 + $0x48] sm:$0xff] }
 0xa8a   :  { %5471 = vmatpush1.bf16.msra.mxu1 %v5470_v62  ;;  %v3582_v62 = vsel %vm578_vm8, %v9154_v24, %v3554_v15  ;;  %v3573_v57 = vsel %vm578_vm8, %v3560_v25, %v3568_v56  ;;  %v3600_v23 = vmul.f32 %v3578_v31, %v10710_v0  ;;  %v3585_v26 = vsel %vm578_vm8, %v3568_v56, %v9103_v16 }
 0xa8b   :  { %5473 = vmatprep.subr.bf16.mxu1 %v5472_v4  ;;  %v5406_v27 = vpack.c.bf16 %v3591_v29, %v9345_v35  ;;  %v5478_v2 = vpack.c.bf16 %v3593_v55, %v9414_v53  ;;  %v3599_v30 = vmul.f32 %v3582_v62, %v10706_v44  ;;  %v3570_v5 = vpop.permute.xlu1 %3569  ;;  %v3595_v49 = vmul.f32 %v3581_v48, %v10706_v44  ;;  %v2958_v35 = vld [vmem:[#allocation6 + $0x50] sm:$0xff] }
 0xa8c   :  { %5403 = vmatpush1.bf16.msra.mxu0 %v5402_v42  ;;  %v5408_v25 = vpack.c.bf16 %v3600_v23, %v3596_v13  ;;  %v3597_v14 = vmul.f32 %v3573_v57, %v10719_v54  ;;  %v3574_v12 = vsel %vm578_vm8, %v9202_v3, %v3570_v5  ;;  %v3586_v16 = vsel %vm578_vm8, %v3570_v5, %v9154_v24  ;;  %v2956_v24 = vld [vmem:[#allocation6 + $0x40] sm:$0xff]  ;;  %v5002_v5 = vld [vmem:[%s10127_s9 + $0x10] sm:$0xff] }
 0xa8d   :  { %5405 = vmatprep.subr.bf16.mxu0 %v5404_v47  ;;  %v3598_v53 = vmul.f32 %v3585_v26, %v10724_v20  ;;  %v3601_v33 = vmul.f32 %v3574_v12, %v10719_v54  ;;  %v3602_v7 = vmul.f32 %v3586_v16, %v10724_v20  ;;  %v5410_v6 = vpack.c.bf16 %v3599_v30, %v3595_v49  ;;  %v5003_v30 = vld [vmem:[%s10127_s9 + $0x18] sm:$0xff] }
 0xa8e   :  { %5475 = vmatpush1.bf16.msra.mxu1 %v5474_v1  ;;  %v10726_v37 = vmov 0.0   ;;  %v10727_v8 = vmov 0.0|0.0  }
 0xa8f   :  { %5477 = vmatprep.subr.bf16.mxu1 %v5476_v52  ;;  %3844 = vmatmul.mubr.f32.vlgmr.msra.gmra.mrb[22].mxu0 %v2954_v34  ;;  %v5482_v18 = vpack.c.bf16 %v3601_v33, %v3597_v14  ;;  %v5480_v3 = vpack.c.bf16 %v3602_v7, %v3598_v53 }
 0xa90   :  { %5407 = vmatpush1.bf16.msra.mxu0 %v5406_v27  ;;  %3849 = vmatprep.mubr.f32.mxu0 %v2958_v35 }
 0xa91   :  { %3998 = vmatmul.mubr.f32.vlgmr.msra.gmra.mrb[22].mxu1 %v2954_v34  ;;  %5409 = vmatprep.subr.bf16.mxu0 %v5408_v25 }
 0xa92   :  { %5479 = vmatpush1.bf16.msra.mxu1 %v5478_v2  ;;  %4003 = vmatprep.mubr.f32.mxu1 %v2958_v35  ;;  %v4998_v2 = vld [vmem:[%s10125_s7 + $0x4] sm:$0xf] }
 0xa93   :  { %3850 = vmatmul.mubr.f32.gmra.mrb[24].mxu0 %v2957_v46  ;;  %5481 = vmatprep.subr.bf16.mxu1 %v5480_v3  ;;  %v5000_v3 = vld [vmem:[%s10126_s8 + $0x10] sm:$0xff] }
 0xa94   :  { %5411 = vmatpush1.bf16.msra.mxu0 %v5410_v6  ;;  %3920 = vmatprep.mubr.f32.mxu0 %v10726_v37 }
 0xa95   :  { %4004 = vmatmul.mubr.f32.gmra.mrb[24].mxu1 %v2957_v46  ;;  %5484 = vmatprep.subr.bf16.mxu0 %v10727_v8 }
 0xa96   :  { %5483 = vmatpush1.bf16.msra.mxu1 %v5482_v18  ;;  %4074 = vmatprep.mubr.f32.mxu1 %v10726_v37  ;;  %v4106_v18 = vld [vmem:[#allocation8 + $0x4] sm:$0xf] }
 0xa97   :  { %4994 = vmatmul.mubr.msk.f32.vlgmr.msra.gmra.mrb[22].mxu0 %vm1741_vm9, %v2956_v24 }
 0xa98   :  { %3926 = vmatprep.mubr.f32.mxu0 %v10726_v37  ;;  %v3766_v40 = vpop.permute.xlu0 %3765 }
 0xa99   :  { %4996 = vmatmul.mubr.msk.f32.vlgmr.msra.gmra.mrb[22].mxu1 %vm1741_vm9, %v2956_v24 }
 0xa9a   :  { %4080 = vmatprep.mubr.f32.mxu1 %v10726_v37 }
 0xa9b   :  { %4995 = vmatmul.mubr.msk.f32.gmra.mrb[24].mxu0 %vm1741_vm9, %v2959_v19 }
 0xa9c   :  { %5041 = vmatprep.mubr.msk.f32.mxu0 %vm5770_vm10, %v10726_v37  ;;  %v3771_v55 = vpop.permute.xlu1 %3770 }
 0xa9d   :  { %4997 = vmatmul.mubr.msk.f32.gmra.mrb[24].mxu1 %vm1741_vm9, %v2959_v19 }
 0xa9e   :  { %5046 = vmatprep.mubr.msk.f32.mxu1 %vm2171_vm12, %v5000_v3 }
 0xb6a   :  { %v3922_v45 = vpop.f32.mrb[22].mxu0 }
 0xb6b   :  { %v9505_v32 = vadd.f32 %v3922_v45, %v3766_v40  ;;  %v3924_v29 = vpop.f32.mrb[23].mxu0  ;;  %v5001_v45 = vld [vmem:[%s10126_s8 + $0x18] sm:$0xff] }
 0xb6c   :  { %v9507_v50 = vadd.f32 %v3924_v29, %v3766_v40  ;;  %v4076_v56 = vpop.f32.mrb[22].mxu1 }
 0xb6d   :  { %v4078_v47 = vpop.f32.mrb[23].mxu1  ;;  %v9511_v1 = vadd.f32 %v4076_v56, %v3766_v40 }
 0xb6e   :  { %v4087_v42 = vadd.f32 %v9507_v50, %v9505_v32  ;;  %v9513_v15 = vadd.f32 %v4078_v47, %v3766_v40  ;;  %v3928_v4 = vpop.f32.mrb[24].mxu0 }
 0xb6f   :  { %v9515_v48 = vadd.f32 %v3928_v4, %v3771_v55  ;;  %v3930_v31 = vpop.f32.mrb[25].mxu0 }
 0xb70   :  { %v9517_v62 = vadd.f32 %v3930_v31, %v3771_v55  ;;  %v4082_v52 = vpop.f32.mrb[24].mxu1  ;;  %4088 = vadd.xlane.f32.xlu0 %v4087_v42  ;;  %v4095_v57 = vadd.f32 %v9513_v15, %v9511_v1 }
 0xb71   :  { %v4084_v13 = vpop.f32.mrb[25].mxu1  ;;  %v9523_v34 = vadd.f32 %v4082_v52, %v3771_v55 }
 0xb72   :  { %v4090_v23 = vadd.f32 %v9517_v62, %v9515_v48  ;;  %v9525_v26 = vadd.f32 %v4084_v13, %v3771_v55 }
 0xb74   :  { %4096 = vadd.xlane.f32.xlu0 %v4095_v57  ;;  %4091 = vadd.xlane.f32.xlu1 %v4090_v23  ;;  %v4098_v27 = vadd.f32 %v9525_v26, %v9523_v34 }
 0xb78   :  { %4099 = vadd.xlane.f32.xlu0 %v4098_v27 }
 0xb85   :  { %4111 = vperm.xlu1 %5618, %v4998_v2  }
 0xb89   :  { %4201 = vperm.xlu1 %5618, %v5003_v30  }
 0xb8e   :  { %4196 = vperm.xlu0 %5619, %v5002_v5  }
 0xbfd   :  { %v4089_v25 = vpop.xlane.xlu0 %4088 }
 0xbfe   :  { %v4093_v35 = vmul.f32 0.00390625, %v4089_v25 }
 0xc01   :  { %v4097_v49 = vpop.xlane.xlu0 %4096  ;;  %v4092_v14 = vpop.xlane.xlu1 %4091 }
 0xc02   :  { %v4101_v12 = vmul.f32 0.00390625, %v4097_v49  ;;  %v4094_v53 = vmul.f32 0.00390625, %v4092_v14  ;;  %v10728_v49 = vmov 1   ;;  %v10729_v14 = vmov 0  }
 0xc04   :  { %v4103_v7 = vsel %vm2073_vm11, %v4093_v35, %v4101_v12 }
 0xc05   :  { %v4100_v16 = vpop.xlane.xlu0 %4099  ;;  %v4112_v24 = vpop.permute.xlu1 %4111 }
 0xc06   :  { %v4102_v33 = vmul.f32 0.00390625, %v4100_v16  ;;  %v10730_v16 = vld [vmem:[#allocation83_spill] sm:$0xff] }
 0xc07   :  { %v4332_v35 = vmul.f32 0.5, %v10730_v16 }
 0xc08   :  { %v4104_v46 = vsel %vm2073_vm11, %v4094_v53, %v4102_v33 }
 0xc09   :  { %v5485_v6 = vpack.c.bf16 %v4104_v46, %v4103_v7  ;;  %v4202_v29 = vpop.permute.xlu1 %4201  ;;  %v10731_v7 = vld [vmem:[#allocation46_spill] sm:$0xff] }
 0xc0a   :  { %v4329_v46 = vmul.f32 0.5, %v10731_v7 }
 0xc0b   :  { %5486 = vmatpush3.bf16.msra.mxu0 %v5485_v6 }
 0xc0d   :  { %v4197_v47 = vpop.permute.xlu0 %4196 }
 0xc0e   :  { %5042 = vmatmul.mubr.msk.f32.vlgmr.msra.gmra.mrb[26].mxu0 %vm716_vm0, %v4106_v18 }
 0xce1   :  { %v4183_v37 = vpop.f32.mrb[26].mxu0 }
 0xce2   :  { %v4184_v8 = vadd.f32 %v4183_v37, %v4112_v24  ;;  %v5043_v19 = vpop.f32.mrb[27].mxu0  ;;  %v10732_v37 = vld [vmem:[#allocation64_spill] sm:$0xff] }
 0xce4   :  { %v4187_v40 = vmax.f32 %v4184_v8, 0.0  ;;  %v4333_v8 = vmul.f32 0.5, %v10732_v37 }
 0xce6   :  { %5044 = vmatprep.subr.msk.mxu1 %vm2178_vm13, %v4187_v40 }
 0xce7   :  { %5045 = vmatpush3.msk.msra.mxu1 %vm2178_vm13, %v4187_v40 }
 0xce8   :  { %5047 = vmatmul.mubr.msk.f32.vlgmr.msra.gmra.mrb[26].mxu1 %vm2171_vm12, %v5001_v45  ;;  %v10733_v45 = vld [vmem:[#allocation84_spill] sm:$0xff] }
 0xdbb   :  { %v5048_v56 = vpop.f32.mrb[26].mxu1 }
 0xdbc   :  { %v4285_v55 = vadd.f32 %v5048_v56, %v4202_v29  ;;  %v4279_v42 = vpop.f32.mrb[27].mxu1  ;;  %v10734_v56 = vld [vmem:[#allocation65_spill] sm:$0xff] }
 0xdbd   :  { %v4280_v4 = vadd.f32 %v4279_v42, %v4197_v47  ;;  %v4334_v47 = vmul.f32 0.5, %v10734_v56 }
 0xdbe   :  { %v5008_v31 = vmul.f32 -2.0, %v4285_v55 }
 0xdbf   :  { %v5007_v52 = vmul.f32 -2.0, %v4280_v4 }
 0xdc0   :  { %v4294_v13 = vmul.f32 1.442695, %v5008_v31 }
 0xdc1   :  { %v4292_v57 = vmul.f32 1.442695, %v5007_v52  ;;  %v10735_v52 = vld [vmem:[#allocation85_spill] sm:$0xff] }
 0xdc2   :  { %5632 = vpow2.f32 %v4294_v13  ;;  %v4331_v13 = vmul.f32 0.5, %v10735_v52 }
 0xdc3   :  { %5634 = vpow2.f32 %v4292_v57 }
 0xdcc   :  { %v5633_v23 = vpop.eup %5632 }
 0xdcd   :  { %v5635_v27 = vpop.eup %5634  ;;  %v4297_v2 = vadd.f32 1.0, %v5633_v23 }
 0xdce   :  { %v4296_v30 = vadd.f32 1.0, %v5635_v27 }
 0xdcf   :  { %5636 = vrcp.f32 %v4297_v2 }
 0xdd0   :  { %5638 = vrcp.f32 %v4296_v30 }
 0xdd9   :  { %v5637_v5 = vpop.eup %5636 }
 0xdda   :  { %v5639_v25 = vpop.eup %5638  ;;  %4309 = vperm.xlu0 %5619, %v5637_v5  }
 0xddb   :  { %4304 = vperm.xlu1 %5618, %v5639_v25  }
 0xdde   :  { %5620 = vset.pattern.permute.xlu0 %v10728_v49 }
 0xddf   :  { %5621 = vset.pattern.permute.xlu1 %v10728_v49  ;;  %4321 = vperm.xlu0 %5620, %v5637_v5  }
 0xde0   :  { %4317 = vperm.xlu1 %5621, %v5639_v25  }
 0xde3   :  { %5622 = vset.pattern.permute.xlu0 %v10729_v14 }
 0xde4   :  { %5623 = vset.pattern.permute.xlu1 %v10729_v14  ;;  %v4345_v14 = vld [vmem:[%s10128_s10 + $0x8] sm:$0xff] }
 0xde5   :  { %5009 = vmatprep.mubr.msk.f32.mxu0 %vm716_vm0, %v4345_v14  ;;  %5011 = vmatprep.mubr.msk.f32.mxu1 %vm716_vm0, %v4345_v14 }
 0xe59   :  { %v4310_v12 = vpop.permute.xlu0 %4309 }
 0xe5a   :  { %v4314_v53 = vmul.f32 %v9515_v48, %v4310_v12  ;;  %v4305_v33 = vpop.permute.xlu1 %4304  ;;  %v4315_v18 = vmul.f32 %v9517_v62, %v4310_v12  ;;  %v4330_v62 = vmul.f32 0.5, %v10733_v45  ;;  %v4348_v45 = vld [vmem:[%s10129_s11] sm:$0xff] }
 0xe5b   :  { %v4313_v6 = vmul.f32 %v9507_v50, %v4305_v33 }
 0xe5c   :  { %v9560_v3 = vadd.f32 %v4332_v35, %v4314_v53  ;;  %v9569_v40 = vadd.f32 %v4333_v8, %v4315_v18  ;;  %v10739_v8 = vld [vmem:[#allocation16_spill] sm:$0xff] }
 0xe5d   :  { %v9562_v24 = vadd.f32 %v4329_v46, %v4313_v6  ;;  %v10738_v46 = vld [vmem:[#allocation14_spill] sm:$0xff] }
 0xe5e   :  { %4352 = vrot.lane.b32.xlu1 %v9560_v3, %s5759_s30  ;;  %v4322_v19 = vpop.permute.xlu0 %4321 }
 0xe5f   :  { %4354 = vrot.lane.b32.xlu0 %v9562_v24, %s5759_s30  ;;  %v4318_v48 = vpop.permute.xlu1 %4317  ;;  %v4326_v50 = vmul.f32 %v9523_v34, %v4322_v19  ;;  %v4327_v4 = vmul.f32 %v9525_v26, %v4322_v19  ;;  %v10736_v34 = vld [vmem:[#allocation66_spill] sm:$0xff] }
 0xe60   :  { %v4324_v29 = vmul.f32 %v9511_v1, %v4318_v48  ;;  %v4325_v55 = vmul.f32 %v9513_v15, %v4318_v48  ;;  %v4312_v1 = vmul.f32 %v9505_v32, %v4305_v33  ;;  %v4335_v57 = vmul.f32 0.5, %v10736_v34  ;;  %v10737_v15 = vld [vmem:[#allocation47_spill] sm:$0xff]  ;;  %v10740_v34 = vld [vmem:[#allocation17_spill] sm:$0xff] }
 0xe61   :  { %v9581_v31 = vadd.f32 %v4334_v47, %v4326_v50  ;;  %v4328_v27 = vmul.f32 0.5, %v10737_v15 }
 0xe62   :  { %v9576_v42 = vadd.f32 %v4330_v62, %v4324_v29  ;;  %4356 = vrot.lane.b32.xlu1 %v9569_v40, %s5759_s30  ;;  %v9588_v23 = vadd.f32 %v4331_v13, %v4325_v55  ;;  %v9593_v2 = vadd.f32 %v4335_v57, %v4327_v4  ;;  %v4349_v29 = vld [vmem:[%s10129_s11 + $0x8] sm:$0xff] }
 0xe63   :  { %v9597_v26 = vadd.f32 %v4328_v27, %v4312_v1 }
 0xe64   :  { %4358 = vrot.lane.b32.xlu0 %v9576_v42, %s5759_s30 }
 0xe66   :  { %4360 = vrot.lane.b32.xlu1 %v9581_v31, %s5759_s30 }
 0xe68   :  { %4362 = vrot.lane.b32.xlu0 %v9588_v23, %s5759_s30 }
 0xe6a   :  { %4364 = vrot.lane.b32.xlu1 %v9593_v2, %s5759_s30 }
 0xe6c   :  { %4390 = vrot.lane.b32.xlu0 %v9597_v26, %s5760_s24 }
 0xe6e   :  { %4392 = vrot.lane.b32.xlu1 %v9560_v3, %s5760_s24 }
 0xe70   :  { %4394 = vrot.lane.b32.xlu0 %v9562_v24, %s5760_s24 }
 0xe72   :  { %4396 = vrot.lane.b32.xlu1 %v9569_v40, %s5760_s24 }
 0xe74   :  { %4398 = vrot.lane.b32.xlu0 %v9576_v42, %s5760_s24 }
 0xe76   :  { %4400 = vrot.lane.b32.xlu1 %v9581_v31, %s5760_s24 }
 0xe78   :  { %4402 = vrot.lane.b32.xlu0 %v9588_v23, %s5760_s24 }
 0xe7a   :  { %4404 = vrot.lane.b32.xlu1 %v9593_v2, %s5760_s24 }
 0xe7c   :  { %4430 = vrot.lane.b32.xlu0 %v9597_v26, %s5761_s25 }
 0xe7e   :  { %4432 = vrot.lane.b32.xlu1 %v9560_v3, %s5761_s25 }
 0xe80   :  { %4434 = vrot.lane.b32.xlu0 %v9562_v24, %s5761_s25 }
 0xe82   :  { %4436 = vrot.lane.b32.xlu1 %v9569_v40, %s5761_s25 }
 0xe84   :  { %4438 = vrot.lane.b32.xlu0 %v9576_v42, %s5761_s25 }
 0xe86   :  { %4440 = vrot.lane.b32.xlu1 %v9581_v31, %s5761_s25 }
 0xe88   :  { %4442 = vrot.lane.b32.xlu0 %v9588_v23, %s5761_s25 }
 0xe8a   :  { %4444 = vrot.lane.b32.xlu1 %v9593_v2, %s5761_s25  ;;  %s5722_s25 = scalar_lea.vmem %s4942_s19, 1024 }
 0xe8b   :  { %p5723_p10 = scmp.ne.s32.totalorder %s4942_s19, %s5722_s25  ;;  %p5728_p12 = scmp.lt.s32.totalorder %s5722_s25, %s5722_s25 }
 0xe8c   :  { %4470 = vrot.lane.b32.xlu0 %v9597_v26, %s5762_s26 }
 0xe8d   :  { %p5729_p13 = por %p5728_p12, %p5727_p11 }
 0xe8e   :  { %4472 = vrot.lane.b32.xlu1 %v9560_v3, %s5762_s26 }
 0xe8f   :  { %p5730_p0 = pnand %p5729_p13, %p5723_p10 }
 0xe90   :  { %4474 = vrot.lane.b32.xlu0 %v9562_v24, %s5762_s26 }
 0xe92   :  { %4476 = vrot.lane.b32.xlu1 %v9569_v40, %s5762_s26 }
 0xe94   :  { %4478 = vrot.lane.b32.xlu0 %v9576_v42, %s5762_s26 }
 0xe96   :  { %4480 = vrot.lane.b32.xlu1 %v9581_v31, %s5762_s26 }
 0xe98   :  { %4482 = vrot.lane.b32.xlu0 %v9588_v23, %s5762_s26 }
 0xe9a   :  { %4484 = vrot.lane.b32.xlu1 %v9593_v2, %s5762_s26 }
 0xe9c   :  { %4518 = vrot.lane.b32.xlu0 %v9597_v26, %s5763_s27 }
 0xe9e   :  { %4520 = vrot.lane.b32.xlu1 %v9560_v3, %s5763_s27 }
 0xea0   :  { %4522 = vrot.lane.b32.xlu0 %v9562_v24, %s5763_s27 }
 0xea2   :  { %4524 = vrot.lane.b32.xlu1 %v9569_v40, %s5763_s27 }
 0xea4   :  { %4526 = vrot.lane.b32.xlu0 %v9576_v42, %s5763_s27 }
 0xea6   :  { %4528 = vrot.lane.b32.xlu1 %v9581_v31, %s5763_s27 }
 0xea8   :  { %4530 = vrot.lane.b32.xlu0 %v9588_v23, %s5763_s27 }
 0xeaa   :  { %4532 = vrot.lane.b32.xlu1 %v9593_v2, %s5763_s27 }
 0xeac   :  { %4558 = vrot.lane.b32.xlu0 %v9597_v26, %s5764_s28 }
 0xeae   :  { %4560 = vrot.lane.b32.xlu1 %v9560_v3, %s5764_s28 }
 0xeb0   :  { %4562 = vrot.lane.b32.xlu0 %v9562_v24, %s5764_s28 }
 0xeb2   :  { %4564 = vrot.lane.b32.xlu1 %v9569_v40, %s5764_s28 }
 0xeb4   :  { %4566 = vrot.lane.b32.xlu0 %v9576_v42, %s5764_s28 }
 0xeb6   :  { %4568 = vrot.lane.b32.xlu1 %v9581_v31, %s5764_s28 }
 0xeb8   :  { %4570 = vrot.lane.b32.xlu0 %v9588_v23, %s5764_s28 }
 0xeba   :  { %4572 = vrot.lane.b32.xlu1 %v9593_v2, %s5764_s28 }
 0xebc   :  { %4598 = vrot.lane.b32.xlu0 %v9597_v26, %s5765_s29 }
 0xebe   :  { %4350 = vrot.lane.b32.xlu1 %v9597_v26, %s5759_s30 }
 0xec0   :  { %4602 = vrot.lane.b32.xlu0 %v9562_v24, %s5765_s29 }
 0xec2   :  { %4600 = vrot.lane.b32.xlu1 %v9560_v3, %s5765_s29 }
 0xec4   :  { %4606 = vrot.lane.b32.xlu0 %v9576_v42, %s5765_s29 }
 0xec6   :  { %4604 = vrot.lane.b32.xlu1 %v9569_v40, %s5765_s29 }
 0xec8   :  { %4610 = vrot.lane.b32.xlu0 %v9588_v23, %s5765_s29 }
 0xeca   :  { %4608 = vrot.lane.b32.xlu1 %v9581_v31, %s5765_s29 }
 0xecc   :  { %4638 = vrot.lane.b32.xlu0 %v9597_v26, %s5766_s6 }
 0xece   :  { %4612 = vrot.lane.b32.xlu1 %v9593_v2, %s5765_s29 }
 0xed0   :  { %4642 = vrot.lane.b32.xlu0 %v9562_v24, %s5766_s6  ;;  %v4353_v32 = vpop.permute.xlu1 %4352 }
 0xed1   :  { %v9703_v30 = vpop.permute.xlu0 %4354 }
 0xed2   :  { %4640 = vrot.lane.b32.xlu1 %v9560_v3, %s5766_s6 }
 0xed4   :  { %4646 = vrot.lane.b32.xlu0 %v9576_v42, %s5766_s6  ;;  %v4357_v5 = vpop.permute.xlu1 %4356 }
 0xed5   :  { %v9711_v25 = vsel %vm136_vm1, %v4353_v32, %v4357_v5 }
 0xed6   :  { %4644 = vrot.lane.b32.xlu1 %v9569_v40, %s5766_s6  ;;  %v4359_v49 = vpop.permute.xlu0 %4358 }
 0xed7   :  { %v4368_v33 = vsel %vm136_vm1, %v9703_v30, %v4359_v49 }
 0xed8   :  { %4650 = vrot.lane.b32.xlu0 %v9588_v23, %s5766_s6  ;;  %v4361_v12 = vpop.permute.xlu1 %4360  ;;  %v4376_v62 = vmul.f32 %v4368_v33, %v10738_v46 }
 0xed9   :  { %v4369_v16 = vsel %vm136_vm1, %v4357_v5, %v4361_v12 }
 0xeda   :  { %4648 = vrot.lane.b32.xlu1 %v9581_v31, %s5766_s6  ;;  %v9726_v35 = vpop.permute.xlu0 %4362  ;;  %v4380_v6 = vmul.f32 %v4369_v16, %v10738_v46 }
 0xedb   :  { %v4366_v53 = vsel %vm136_vm1, %v4359_v49, %v9726_v35 }
 0xedc   :  { %v4365_v7 = vpop.permute.xlu1 %4364  ;;  %v4377_v19 = vmul.f32 %v4366_v53, %v10739_v8  ;;  %4752 = vperm.xlu0 %5622, %v4348_v45   ;;  %v5525_v55 = vpack.c.bf16 %v4380_v6, %v4376_v62 }
 0xedd   :  { %v4367_v18 = vsel %vm136_vm1, %v4361_v12, %v4365_v7  ;;  %v9739_v37 = vsel %vm136_vm1, %v4365_v7, %v4353_v32 }
 0xede   :  { %v4381_v48 = vmul.f32 %v4367_v18, %v10739_v8  ;;  %4652 = vrot.lane.b32.xlu1 %v9593_v2, %s5766_s6  ;;  %v4391_v50 = vpop.permute.xlu0 %4390  ;;  %v10741_v8 = vld [vmem:[#allocation18_spill] sm:$0xff] }
 0xee0   :  { %v4393_v56 = vpop.permute.xlu1 %4392  ;;  %v5523_v47 = vpack.c.bf16 %v4381_v48, %v4377_v19 }
 0xee2   :  { %v4395_v4 = vpop.permute.xlu0 %4394  ;;  %5524 = vmatprep.subr.bf16.mxu1 %v5523_v47  ;;  %4757 = vperm.xlu1 %5623, %v4349_v29   ;;  %v10745_v29 = vld [vmem:[#allocation15_spill] sm:$0xff] }
 0xee3   :  { %v4410_v52 = vsel %vm198_vm2, %v4391_v50, %v4395_v4  ;;  %5526 = vmatpush1.bf16.msra.mxu1 %v5525_v55 }
 0xee4   :  { %v4397_v13 = vpop.permute.xlu1 %4396  ;;  %v9757_v57 = vmul.f32 %v4410_v52, %v10740_v34 }
 0xee5   :  { %v4411_v1 = vsel %vm198_vm2, %v4393_v56, %v4397_v13 }
 0xee6   :  { %v9760_v15 = vmul.f32 %v4411_v1, %v10740_v34  ;;  %v4399_v27 = vpop.permute.xlu0 %4398 }
 0xee7   :  { %v4408_v53 = vsel %vm198_vm2, %v4395_v4, %v4399_v27 }
 0xee8   :  { %v4401_v32 = vpop.permute.xlu1 %4400  ;;  %v5491_v5 = vpack.c.bf16 %v9760_v15, %v9757_v57  ;;  %v4416_v62 = vmul.f32 %v4408_v53, %v6122_v9 }
 0xee9   :  { %v4409_v49 = vsel %vm198_vm2, %v4397_v13, %v4401_v32 }
 0xeea   :  { %v4403_v14 = vpop.permute.xlu0 %4402  ;;  %v4420_v7 = vmul.f32 %v4409_v49, %v6122_v9 }
 0xeeb   :  { %v4406_v12 = vsel %vm198_vm2, %v4399_v27, %v4403_v14  ;;  %v4412_v16 = vsel %vm198_vm2, %v4403_v14, %v4391_v50 }
 0xeec   :  { %v4405_v33 = vpop.permute.xlu1 %4404  ;;  %v9778_v18 = vmul.f32 %v4412_v16, %v6129_v17  ;;  %v4417_v19 = vmul.f32 %v4406_v12, %v10741_v8  ;;  %v5529_v4 = vpack.c.bf16 %v4420_v7, %v4416_v62 }
 0xeed   :  { %v4407_v46 = vsel %vm198_vm2, %v4401_v32, %v4405_v33  ;;  %v4413_v6 = vsel %vm198_vm2, %v4405_v33, %v4393_v56 }
 0xeee   :  { %v9782_v48 = vmul.f32 %v4413_v6, %v6129_v17  ;;  %v4421_v50 = vmul.f32 %v4407_v46, %v10741_v8  ;;  %v4431_v45 = vpop.permute.xlu0 %4430 }
 0xef0   :  { %v4433_v47 = vpop.permute.xlu1 %4432  ;;  %v5527_v55 = vpack.c.bf16 %v4421_v50, %v4417_v19  ;;  %v10747_v15 = vpack.c.bf16 %v9782_v48, %v9778_v18 }
 0xef2   :  { %v4435_v56 = vpop.permute.xlu0 %4434  ;;  %5528 = vmatprep.subr.bf16.mxu1 %v5527_v55 }
 0xef3   :  { %v4450_v52 = vsel %vm260_vm3, %v4431_v45, %v4435_v56  ;;  %5530 = vmatpush1.bf16.msra.mxu1 %v5529_v4 }
 0xef4   :  { %v4437_v13 = vpop.permute.xlu1 %4436  ;;  %v9793_v1 = vmul.f32 %v4450_v52, %v6150_v43 }
 0xef5   :  { %v4451_v17 = vsel %vm260_vm3, %v4433_v47, %v4437_v13 }
 0xef6   :  { %v9796_v9 = vmul.f32 %v4451_v17, %v6150_v43  ;;  %v4439_v34 = vpop.permute.xlu0 %4438 }
 0xef7   :  { %v4448_v53 = vsel %vm260_vm3, %v4435_v56, %v4439_v34 }
 0xef8   :  { %v4441_v27 = vpop.permute.xlu1 %4440  ;;  %v4456_v62 = vmul.f32 %v4448_v53, %v6159_v51  ;;  %v10743_v53 = vld [vmem:[#allocation22_spill] sm:$0xff] }
 0xef9   :  { %v4449_v49 = vsel %vm260_vm3, %v4437_v13, %v4441_v27 }
 0xefa   :  { %v4443_v14 = vpop.permute.xlu0 %4442  ;;  %v4460_v33 = vmul.f32 %v4449_v49, %v6159_v51 }
 0xefb   :  { %v4446_v12 = vsel %vm260_vm3, %v4439_v34, %v4443_v14  ;;  %v4452_v16 = vsel %vm260_vm3, %v4443_v14, %v4431_v45  ;;  %v10742_v14 = vld [vmem:[#allocation20_spill] sm:$0xff] }
 0xefc   :  { %v4445_v43 = vpop.permute.xlu1 %4444  ;;  %v9814_v6 = vmul.f32 %v4452_v16, %v6166_v58  ;;  %v4457_v8 = vmul.f32 %v4446_v12, %v6169_v59  ;;  %v5533_v56 = vpack.c.bf16 %v4460_v33, %v4456_v62 }
 0xefd   :  { %v4447_v7 = vsel %vm260_vm3, %v4441_v27, %v4445_v43  ;;  %v4453_v46 = vsel %vm260_vm3, %v4445_v43, %v4433_v47 }
 0xefe   :  { %v9818_v19 = vmul.f32 %v4453_v46, %v6166_v58  ;;  %v4461_v50 = vmul.f32 %v4447_v7, %v6169_v59  ;;  %v9821_v45 = vpop.permute.xlu0 %4470 }
 0xf00   :  { %v9826_v4 = vpop.permute.xlu1 %4472  ;;  %v5531_v47 = vpack.c.bf16 %v4461_v50, %v4457_v8 }
 0xf02   :  { %v9828_v52 = vpop.permute.xlu0 %4474  ;;  %5532 = vmatprep.subr.bf16.mxu1 %v5531_v47 }
 0xf03   :  { %5534 = vmatpush1.bf16.msra.mxu1 %v5533_v56  ;;  %v5539_v56 = vpack.c.bf16 %v9593_v2, %v9588_v23 }
 0xf04   :  { %v9830_v13 = vpop.permute.xlu1 %4476 }
 0xf06   :  { %v4479_v58 = vpop.permute.xlu0 %4478 }
 0xf07   :  { %v4488_v27 = vsel %vm322_vm4, %v9828_v52, %v4479_v58 }
 0xf08   :  { %v4481_v17 = vpop.permute.xlu1 %4480  ;;  %v4496_v46 = vmul.f32 %v4488_v27, %v10742_v14 }
 0xf09   :  { %v4489_v59 = vsel %vm322_vm4, %v9830_v13, %v4481_v17 }
 0xf0a   :  { %v9835_v51 = vpop.permute.xlu0 %4482  ;;  %v4500_v12 = vmul.f32 %v4489_v59, %v10742_v14 }
 0xf0b   :  { %v4486_v34 = vsel %vm322_vm4, %v4479_v58, %v9835_v51  ;;  %v4492_v57 = vsel %vm322_vm4, %v9835_v51, %v9821_v45 }
 0xf0c   :  { %v9843_v49 = vpop.permute.xlu1 %4484  ;;  %v4497_v43 = vmul.f32 %v4486_v34, %v10743_v53  ;;  %v5537_v62 = vpack.c.bf16 %v4500_v12, %v4496_v46 }
 0xf0d   :  { %v4487_v16 = vsel %vm322_vm4, %v4481_v17, %v9843_v49  ;;  %v5541_v17 = vpack.c.bf16 %v9581_v31, %v9576_v42 }
 0xf0e   :  { %v4501_v33 = vmul.f32 %v4487_v16, %v10743_v53  ;;  %v9851_v7 = vpop.permute.xlu0 %4518 }
 0xf10   :  { %v9854_v8 = vpop.permute.xlu1 %4520  ;;  %v5535_v50 = vpack.c.bf16 %v4501_v33, %v4497_v43 }
 0xf12   :  { %v9856_v47 = vpop.permute.xlu0 %4522  ;;  %5536 = vmatprep.subr.bf16.mxu1 %v5535_v50 }
 0xf13   :  { %5538 = vmatpush1.bf16.msra.mxu1 %v5537_v62 }
 0xf14   :  { %5540 = vmatprep.subr.bf16.mxu1 %v5539_v56  ;;  %v9860_v58 = vpop.permute.xlu1 %4524 }
 0xf16   :  { %v9864_v59 = vpop.permute.xlu0 %4526 }
 0xf17   :  { %5542 = vmatpush1.bf16.msra.mxu1 %v5541_v17 }
 0xf18   :  { %v9866_v34 = vpop.permute.xlu1 %4528 }
 0xf1a   :  { %v4531_v27 = vpop.permute.xlu0 %4530 }
 0xf1b   :  { %v4534_v14 = vsel %vm392_vm5, %v9864_v59, %v4531_v27  ;;  %v4540_v23 = vsel %vm392_vm5, %v4531_v27, %v9851_v7 }
 0xf1c   :  { %v4533_v2 = vpop.permute.xlu1 %4532  ;;  %v4544_v31 = vmul.f32 %v4534_v14, %v10647_v63  ;;  %v4545_v16 = vmul.f32 %v4540_v23, %v10648_v11 }
 0xf1d   :  { %v4535_v12 = vsel %vm392_vm5, %v9866_v34, %v4533_v2  ;;  %v4541_v42 = vsel %vm392_vm5, %v4533_v2, %v9854_v8 }
 0xf1e   :  { %v4548_v53 = vmul.f32 %v4535_v12, %v10647_v63  ;;  %v4549_v43 = vmul.f32 %v4541_v42, %v10648_v11  ;;  %v9884_v33 = vpop.permute.xlu0 %4558 }
 0xf20   :  { %v5545_v46 = vpack.c.bf16 %v4548_v53, %v4544_v31  ;;  %v9886_v50 = vpop.permute.xlu1 %4560  ;;  %v5543_v62 = vpack.c.bf16 %v4549_v43, %v4545_v16 }
 0xf22   :  { %v9888_v56 = vpop.permute.xlu0 %4562  ;;  %5544 = vmatprep.subr.bf16.mxu1 %v5543_v62 }
 0xf23   :  { %5546 = vmatpush1.bf16.msra.mxu1 %v5545_v46 }
 0xf24   :  { %v9890_v17 = vpop.permute.xlu1 %4564 }
 0xf26   :  { %v9892_v27 = vpop.permute.xlu0 %4566 }
 0xf28   :  { %v9894_v14 = vpop.permute.xlu1 %4568 }
 0xf2a   :  { %v4571_v23 = vpop.permute.xlu0 %4570 }
 0xf2b   :  { %v4574_v63 = vsel %vm454_vm6, %v9892_v27, %v4571_v23  ;;  %v4580_v11 = vsel %vm454_vm6, %v4571_v23, %v9884_v33 }
 0xf2c   :  { %v4573_v2 = vpop.permute.xlu1 %4572  ;;  %v4584_v31 = vmul.f32 %v4574_v63, %v10664_v61  ;;  %v4585_v16 = vmul.f32 %v4580_v11, %v10665_v60  ;;  %v10744_v63 = vld [vmem:[#allocation13_spill] sm:$0xff] }
 0xf2d   :  { %v4575_v12 = vsel %vm454_vm6, %v9894_v14, %v4573_v2  ;;  %v4581_v42 = vsel %vm454_vm6, %v4573_v2, %v9886_v50  ;;  %v4379_v11 = vmul.f32 %v9711_v25, %v10744_v63  ;;  %v4491_v25 = vsel %vm322_vm4, %v9826_v4, %v9830_v13 }
 0xf2e   :  { %v4588_v53 = vmul.f32 %v4575_v12, %v10664_v61  ;;  %v4589_v43 = vmul.f32 %v4581_v42, %v10665_v60  ;;  %v9912_v46 = vpop.permute.xlu0 %4598  ;;  %v4378_v61 = vmul.f32 %v9739_v37, %v10745_v29  ;;  %v4490_v37 = vsel %vm322_vm4, %v9821_v45, %v9828_v52  ;;  %v10748_v52 = vld [vmem:[#allocation21_spill] sm:$0xff] }
 0xf2f   :  { %v4537_v45 = vsel %vm392_vm5, %v9860_v58, %v9866_v34  ;;  %v4539_v34 = vsel %vm392_vm5, %v9854_v8, %v9860_v58 }
 0xf30   :  { %v5549_v62 = vpack.c.bf16 %v4588_v53, %v4584_v31  ;;  %v4351_v23 = vpop.permute.xlu1 %4350  ;;  %v5547_v55 = vpack.c.bf16 %v4589_v43, %v4585_v16 }
 0xf31   :  { %v4370_v32 = vsel %vm136_vm1, %v4351_v23, %v9703_v30  ;;  %v4372_v2 = vsel %vm136_vm1, %v9726_v35, %v4351_v23 }
 0xf32   :  { %v4374_v60 = vmul.f32 %v4372_v2, %v10745_v29  ;;  %v4375_v12 = vmul.f32 %v4370_v32, %v10744_v63  ;;  %v9926_v42 = vpop.permute.xlu0 %4602  ;;  %5548 = vmatprep.subr.bf16.mxu1 %v5547_v55  ;;  %v4493_v29 = vsel %vm322_vm4, %v9843_v49, %v9826_v4  ;;  %v10746_v32 = vld [vmem:[#allocation19_spill] sm:$0xff]  ;;  %v4494_v49 = vmul.f32 %v4492_v57, %v10748_v52 }
 0xf33   :  { %5550 = vmatpush1.bf16.msra.mxu1 %v5549_v62  ;;  %v4499_v55 = vmul.f32 %v4491_v25, %v10746_v32  ;;  %v4498_v13 = vmul.f32 %v4493_v29, %v10748_v52  ;;  %v10749_v62 = vpack.c.bf16 %v9796_v9, %v9793_v1  ;;  %v10750_v9 = vpack.c.bf16 %v9818_v19, %v9814_v6 }
 0xf34   :  { %v5489_v31 = vpack.c.bf16 %v4378_v61, %v4374_v60  ;;  %v9928_v30 = vpop.permute.xlu1 %4600  ;;  %v5487_v16 = vpack.c.bf16 %v4379_v11, %v4375_v12  ;;  %v5503_v63 = vpack.c.bf16 %v9569_v40, %v9562_v24  ;;  %v4536_v11 = vsel %vm392_vm5, %v9856_v47, %v9864_v59  ;;  %v10751_v61 = vld [vmem:[#allocation24_spill] sm:$0xff] }
 0xf35   :  { %v5501_v23 = vpack.c.bf16 %v4498_v13, %v4494_v49  ;;  %v4547_v60 = vmul.f32 %v4537_v45, %v10751_v61  ;;  %v4577_v59 = vsel %vm454_vm6, %v9890_v17, %v9894_v14  ;;  %v4576_v29 = vsel %vm454_vm6, %v9888_v56, %v9892_v27 }
 0xf36   :  { %v9930_v53 = vpop.permute.xlu0 %4606  ;;  %5488 = vmatprep.subr.bf16.mxu0 %v5487_v16  ;;  %v4543_v16 = vmul.f32 %v4536_v11, %v10751_v61  ;;  %v5505_v14 = vpack.c.bf16 %v9560_v3, %v9597_v26  ;;  %v4578_v3 = vsel %vm454_vm6, %v9884_v33, %v9888_v56  ;;  %v4583_v26 = vmul.f32 %v4576_v29, %v10662_v28 }
 0xf37   :  { %5490 = vmatpush1.bf16.msra.mxu0 %v5489_v31  ;;  %v4538_v31 = vsel %vm392_vm5, %v9851_v7, %v9856_v47  ;;  %v4579_v7 = vsel %vm454_vm6, %v9886_v50, %v9890_v17  ;;  %v4587_v47 = vmul.f32 %v4577_v59, %v10662_v28  ;;  %v4618_v33 = vsel %vm516_vm7, %v9912_v46, %v9926_v42 }
 0xf38   :  { %5492 = vmatprep.subr.bf16.mxu0 %v5491_v5  ;;  %v4605_v35 = vpop.permute.xlu1 %4604  ;;  %v4495_v5 = vmul.f32 %v4490_v37, %v10746_v32  ;;  %v4586_v27 = vmul.f32 %v4579_v7, %v10661_v22 }
 0xf39   :  { %v5511_v56 = vpack.c.bf16 %v4587_v47, %v4583_v26  ;;  %v5651_v47 = vld [vmem:[%s10118_s0 + $0x18] sm:$0xff] }
 0xf3a   :  { %v4611_v43 = vpop.permute.xlu0 %4610  ;;  %v5499_v18 = vpack.c.bf16 %v4499_v55, %v4495_v5  ;;  %v5507_v55 = vpack.c.bf16 %v4547_v60, %v4543_v16  ;;  %v4582_v5 = vmul.f32 %v4578_v3, %v10661_v22 }
 0xf3b   :  { %5494 = vmatpush1.bf16.msra.mxu0 %v10747_v15  ;;  %v4614_v48 = vsel %vm516_vm7, %v9930_v53, %v4611_v43  ;;  %v4620_v1 = vsel %vm516_vm7, %v4611_v43, %v9912_v46  ;;  %v4542_v43 = vmul.f32 %v4538_v31, %v10631_v39  ;;  %v4619_v15 = vsel %vm516_vm7, %v9928_v30, %v4605_v35 }
 0xf3c   :  { %5496 = vmatprep.subr.bf16.mxu0 %v10749_v62  ;;  %v4609_v4 = vpop.permute.xlu1 %4608  ;;  %v4624_v8 = vmul.f32 %v4614_v48, %v10687_v21  ;;  %v4625_v58 = vmul.f32 %v4620_v1, %v10688_v41 }
 0xf3d   :  { %v4617_v57 = vsel %vm516_vm7, %v4605_v35, %v4609_v4 }
 0xf3e   :  { %v9965_v51 = vpop.permute.xlu0 %4638  ;;  %v4627_v28 = vmul.f32 %v4617_v57, %v10683_v36 }
 0xf3f   :  { %5498 = vmatpush1.bf16.msra.mxu0 %v10750_v9 }
 0xf40   :  { %5500 = vmatprep.subr.bf16.mxu0 %v5499_v18  ;;  %v4613_v2 = vpop.permute.xlu1 %4612 }
 0xf41   :  { %v4615_v6 = vsel %vm516_vm7, %v4609_v4, %v4613_v2  ;;  %v4621_v19 = vsel %vm516_vm7, %v4613_v2, %v9928_v30  ;;  %v5513_v4 = vpack.c.bf16 %v4586_v27, %v4582_v5  ;;  %v4622_v30 = vmul.f32 %v4618_v33, %v10677_v38  ;;  %v5653_v33 = vld [vmem:[%s10118_s0 + $0x30] sm:$0xff] }
 0xf42   :  { %v4628_v24 = vmul.f32 %v4615_v6, %v10687_v21  ;;  %v4629_v40 = vmul.f32 %v4621_v19, %v10688_v41  ;;  %v4643_v12 = vpop.permute.xlu0 %4642  ;;  %v4546_v41 = vmul.f32 %v4539_v34, %v10631_v39  ;;  %v4616_v39 = vsel %vm516_vm7, %v9926_v42, %v9930_v53 }
 0xf43   :  { %5502 = vmatpush1.bf16.msra.mxu0 %v5501_v23  ;;  %v4623_v13 = vmul.f32 %v4616_v39, %v10683_v36  ;;  %v4626_v53 = vmul.f32 %v4619_v15, %v10677_v38  ;;  %v4658_v18 = vsel %vm578_vm8, %v9965_v51, %v4643_v12  ;;  %v5652_v39 = vld [vmem:[%s10118_s0 + $0x20] sm:$0xff] }
 0xf44   :  { %v5553_v25 = vpack.c.bf16 %v4628_v24, %v4624_v8  ;;  %5504 = vmatprep.subr.bf16.mxu0 %v5503_v63  ;;  %v4641_v37 = vpop.permute.xlu1 %4640  ;;  %v5551_v21 = vpack.c.bf16 %v4629_v40, %v4625_v58  ;;  %v5509_v17 = vpack.c.bf16 %v4546_v41, %v4542_v43  ;;  %v5649_v41 = vld [vmem:[%s10118_s0 + $0x10] sm:$0xff] }
 0xf45   :  { %v5515_v49 = vpack.c.bf16 %v4627_v28, %v4623_v13  ;;  %v5517_v38 = vpack.c.bf16 %v4626_v53, %v4622_v30 }
 0xf46   :  { %v4647_v32 = vpop.permute.xlu0 %4646  ;;  %5552 = vmatprep.subr.bf16.mxu1 %v5551_v21 }
 0xf47   :  { %5506 = vmatpush1.bf16.msra.mxu0 %v5505_v14  ;;  %5554 = vmatpush1.bf16.msra.mxu1 %v5553_v25  ;;  %v4656_v35 = vsel %vm578_vm8, %v4643_v12, %v4647_v32  ;;  %v5650_v14 = vld [vmem:[%s10118_s0 + $0x8] sm:$0xff] }
 0xf48   :  { %5508 = vmatprep.subr.bf16.mxu0 %v5507_v55  ;;  %v4645_v50 = vpop.permute.xlu1 %4644  ;;  %v4663_v48 = vmul.f32 %v4656_v35, %v10710_v0 }
 0xf49   :  { %v4659_v22 = vsel %vm578_vm8, %v4641_v37, %v4645_v50 }
 0xf4a   :  { %v4651_v52 = vpop.permute.xlu0 %4650  ;;  %v4666_v9 = vmul.f32 %v4659_v22, %v10706_v44 }
 0xf4b   :  { %5510 = vmatpush1.bf16.msra.mxu0 %v5509_v17  ;;  %v4654_v42 = vsel %vm578_vm8, %v4647_v32, %v4651_v52  ;;  %v4660_v45 = vsel %vm578_vm8, %v4651_v52, %v9965_v51  ;;  %v5655_v52 = vld [vmem:[%s10118_s0 + $0x38] sm:$0xff] }
 0xf4c   :  { %5512 = vmatprep.subr.bf16.mxu0 %v5511_v56  ;;  %v4649_v62 = vpop.permute.xlu1 %4648  ;;  %v4664_v23 = vmul.f32 %v4654_v42, %v10719_v54  ;;  %v4665_v63 = vmul.f32 %v4660_v45, %v10724_v20  ;;  %v5654_v56 = vld [vmem:[%s10118_s0 + $0x28] sm:$0xff] }
 0xf4d   :  { %v4657_v46 = vsel %vm578_vm8, %v4645_v50, %v4649_v62 }
 0xf4e   :  { %v4667_v36 = vmul.f32 %v4657_v46, %v10710_v0  ;;  %v4662_v0 = vmul.f32 %v4658_v18, %v10706_v44  ;;  %v4346_v44 = vld [vmem:[%s10128_s10 + $0x10] sm:$0xff] }
 0xf4f   :  { %5514 = vmatpush1.bf16.msra.mxu0 %v5513_v4 }
 0xf50   :  { %5516 = vmatprep.subr.bf16.mxu0 %v5515_v49  ;;  %v4653_v1 = vpop.permute.xlu1 %4652  ;;  %v5519_v61 = vpack.c.bf16 %v4667_v36, %v4663_v48  ;;  %v5521_v19 = vpack.c.bf16 %v4666_v9, %v4662_v0 }
 0xf51   :  { %v4655_v34 = vsel %vm578_vm8, %v4649_v62, %v4653_v1  ;;  %v4661_v2 = vsel %vm578_vm8, %v4653_v1, %v4641_v37  ;;  %v5648_v37 = vld [vmem:[%s10118_s0] sm:$0xff] }
 0xf52   :  { %v4668_v11 = vmul.f32 %v4655_v34, %v10719_v54  ;;  %v4669_v51 = vmul.f32 %v4661_v2, %v10724_v20  ;;  %v4347_v54 = vld [vmem:[%s10128_s10 + $0x18] sm:$0xff] }
 0xf53   :  { %5518 = vmatpush1.bf16.msra.mxu0 %v5517_v38 }
 0xf54   :  { %v5557_v60 = vpack.c.bf16 %v4668_v11, %v4664_v23  ;;  %5520 = vmatprep.subr.bf16.mxu0 %v5519_v61  ;;  %v5555_v6 = vpack.c.bf16 %v4669_v51, %v4665_v63 }
 0xf56   :  { %5556 = vmatprep.subr.bf16.mxu1 %v5555_v6 }
 0xf57   :  { %5522 = vmatpush1.bf16.msra.mxu0 %v5521_v19  ;;  %5558 = vmatpush1.bf16.msra.mxu1 %v5557_v60 }
 0xf5a   :  { %4831 = vmatmul.mubr.f32.vlgmr.msra.gmra.mrb[28].mxu0 %v4344_v10  ;;  %4908 = vmatmul.mubr.f32.vlgmr.msra.gmra.mrb[28].mxu1 %v4344_v10 }
 0xf5b   :  { %5010 = vmatprep.mubr.msk.f32.mxu0 %vm716_vm0, %v4347_v54  ;;  %5012 = vmatprep.mubr.msk.f32.mxu1 %vm716_vm0, %v4347_v54  ;;  %v4753_v20 = vpop.permute.xlu0 %4752 }
 0xf5e   :  { %4837 = vmatmul.mubr.f32.gmra.mrb[30].mxu0 %v4346_v44  ;;  %4914 = vmatmul.mubr.f32.gmra.mrb[30].mxu1 %v4346_v44 }
 0xf61   :  { %v4758_v25 = vpop.permute.xlu1 %4757 }
0x102d   :  { %v4832_v8 = vpop.f32.mrb[28].mxu0  ;;  %v4909_v58 = vpop.f32.mrb[28].mxu1 }
0x102e   :  { %v4833_v24 = vadd.f32 %v4832_v8, %v4753_v20  ;;  %v4910_v40 = vadd.f32 %v4909_v58, %v4753_v20  ;;  %v4834_v12 = vpop.f32.mrb[29].mxu0  ;;  %v4911_v59 = vpop.f32.mrb[29].mxu1 }
0x102f   :  { %v4835_v31 = vadd.f32 %v4834_v12, %v4753_v20  ;;  %v4912_v16 = vadd.f32 %v4911_v59, %v4753_v20 }
0x1030   :  { %v4920_v21 = vadd.f32 %v5648_v37, %v4833_v24  ;;  %v4922_v29 = vadd.f32 %v5649_v41, %v4910_v40 }
0x1031   :  { %v4921_v7 = vadd.f32 %v5650_v14, %v4835_v31  ;;  %v4923_v32 = vadd.f32 %v5651_v47, %v4912_v16  ;;  %v4838_v55 = vpop.f32.mrb[30].mxu0  ;;  %v4915_v43 = vpop.f32.mrb[30].mxu1 }
0x1032   :  { %4928 = vst [vmem:[#allocation9] sm:$0xff] %v4920_v21  ;;  %4930 = vst [vmem:[#allocation9 + $0x10] sm:$0xff] %v4922_v29  ;;  %v4840_v57 = vpop.f32.mrb[31].mxu0  ;;  %v4917_v3 = vpop.f32.mrb[31].mxu1  ;;  %v4839_v26 = vadd.f32 %v4838_v55, %v4758_v25  ;;  %v4916_v50 = vadd.f32 %v4915_v43, %v4758_v25 }
0x1033   :  { %4929 = vst [vmem:[#allocation9 + $0x8] sm:$0xff] %v4921_v7  ;;  %4931 = vst [vmem:[#allocation9 + $0x18] sm:$0xff] %v4923_v32  ;;  %v4841_v17 = vadd.f32 %v4840_v57, %v4758_v25  ;;  %v4918_v27 = vadd.f32 %v4917_v3, %v4758_v25 }
0x1034   :  { %v4924_v15 = vadd.f32 %v5652_v39, %v4839_v26  ;;  %v4926_v28 = vadd.f32 %v5653_v33, %v4916_v50 }
0x1035   :  { %v4925_v5 = vadd.f32 %v5654_v56, %v4841_v17  ;;  %v4927_v13 = vadd.f32 %v5655_v52, %v4918_v27 }
0x1036   :  { %4932 = vst [vmem:[#allocation9 + $0x20] sm:$0xff] %v4924_v15  ;;  %4934 = vst [vmem:[#allocation9 + $0x30] sm:$0xff] %v4926_v28 }
0x1037   :  { %4933 = vst [vmem:[#allocation9 + $0x28] sm:$0xff] %v4925_v5  ;;  %4935 = vst [vmem:[#allocation9 + $0x38] sm:$0xff] %v4927_v13 }
0x1038   :  { %5733 = shalt.err (!%p5730_p0)
}
0x1039   :  { %s5734_s11 = scalar_lea.hbm %s10130_s12, 1024 }
0x103a   :  { %p5735_p1 = scmp.ne.s32.totalorder %s10130_s12, %s5734_s11  ;;  %p5738_p2 = scmp.lt.u32.totalorder %s5734_s11, %s10130_s12 }
0x103c   :  { %p5740_p3 = pnand %p5738_p2, %p5735_p1 }
0x103e   :  { %5743 = shalt.err (!%p5740_p3)
}
0x103f   :  { %4947 = dma.vmem_to_hbm [thread:$0]  %s4942_s19, 1024, %s10130_s12, [#allocation5], %s5754_s4, %s5754_s4, %s5755_s22  }
0x1040   :  { %5748 = dma.done.wait [#allocation5], 1024  }
0x1041   :  { %5749 = vsyncadd [#allocation5], 4294966272 }
0x1042   :  { %4951 = vsyncpa [#allocation4], 1 }
0x1043   :  { %4952 = vsyncpa [#allocation7], 1 }
0x1044   :  { %4953 = vsyncpa [#allocation5], 1 }

</bundles_post_ra>
